<compile_context>
chip_gen: v7x
topology: tpu7x:2x2x1
jax: 0.10.0
libtpu: 0.0.40
codegen_flags: <defaults>
</compile_context>

<pallas_src>
import functools

import jax
import jax.numpy as jnp
from jax.experimental import pallas as pl
from jax.experimental.pallas import tpu as pltpu

D_MODEL = 512
D_HID = 512 * 8 // 3  # 1365
RMS_EPS = 1e-6


def _round_up(n, m):
    return (n + m - 1) // m * m


def _tpu_generation():
    """Best-effort TPU generation detection for tuning defaults."""
    try:
        kind = jax.devices()[0].device_kind.lower()
    except Exception:
        return None
    if ("v5 lite" in kind) or ("v5e" in kind) or ("v5lite" in kind):
        return "v5e"
    if "v6" in kind:
        return "v6e"
    if "7" in kind:
        return "v7x"
    return None


# Per-generation tuning: (row tile, hidden-pad granularity, vmem limit, min grid steps)
_GEN_DEFAULTS = {
    "v5e": dict(tm=512, h_gran=128, vmem=96 << 20, min_tiles=1),
    "v6e": dict(tm=1024, h_gran=256, vmem=96 << 20, min_tiles=1),
    "v7x": dict(tm=512, h_gran=256, vmem=48 << 20, min_tiles=2),
    None:  dict(tm=512, h_gran=256, vmem=48 << 20, min_tiles=1),
}


def prepare_weights(gain, w_swish, w_gate, w_out, *, h_gran=256):
    """One-time weight prep (hoisted out of the forward pass).

    Returns (gain2d f32 (1,D), fused w_in bf16 (D, 2*Hp), w_out bf16 (Hp, D)).
    Hidden dim is zero-padded to a multiple of `h_gran`; zero columns give
    silu(0)*0 = 0 and the matching zero rows of w_out contribute nothing, so
    numerics are unchanged.
    """
    d_model, d_hid = w_swish.shape
    h_pad = _round_up(d_hid, h_gran)
    pad_cols = ((0, 0), (0, h_pad - d_hid))
    w_in = jnp.concatenate(
        [jnp.pad(w_swish, pad_cols), jnp.pad(w_gate, pad_cols)],
        axis=1).astype(jnp.bfloat16)                                  # (D, 2*Hp)
    w_out_p = jnp.pad(w_out, ((0, h_pad - d_hid), (0, 0))).astype(jnp.bfloat16)
    gain2d = gain.reshape(1, d_model).astype(jnp.float32)
    return gain2d, w_in, w_out_p


def mlp_kernel(x_ref, g_ref, win_ref, wout_ref, o_ref):
    # x_ref:    (tm, D)        input rows (f32)
    # g_ref:    (1, D)         RMSNorm gain (f32)
    # win_ref:  (D, 2*Hp)      fused [w_swish | w_gate], bf16, H zero-padded
    # wout_ref: (Hp, D)        lin_out weight, bf16, H zero-padded
    # o_ref:    (tm, D)        output rows
    x = x_ref[...].astype(jnp.float32)

    # ---- RMSNorm (f32) ----
    ms = jnp.mean(x * x, axis=-1, keepdims=True)
    norm = x * jax.lax.rsqrt(ms + RMS_EPS) * g_ref[...]

    # ---- fused swish/gate projection: one bf16 MXU matmul, f32 accumulate ----
    pre = jnp.dot(norm.astype(jnp.bfloat16), win_ref[...],
                  preferred_element_type=jnp.float32)
    h = pre.shape[1] // 2            # Hp is a multiple of 128 -> lane-aligned slice
    a = pre[:, :h]                   # swish pre-activation
    b = pre[:, h:]                   # gate
    gated = a * jax.nn.sigmoid(a) * b        # silu(a) * b, f32 on VPU/EUP

    # ---- output projection: bf16 operands, f32 accumulate ----
    out = jnp.dot(gated.astype(jnp.bfloat16), wout_ref[...],
                  preferred_element_type=jnp.float32)

    # ---- residual (f32) ----
    o_ref[...] = (x + out).astype(o_ref.dtype)


@functools.partial(jax.jit,
                   static_argnames=("tm", "min_tiles", "vmem_limit_bytes"))
def mlp_forward(x, gain2d, w_in, w_out_p, *,
                tm=512, min_tiles=1, vmem_limit_bytes=48 << 20):
    """x: (batch, seq, d_model) f32; pre-prepared weights from prepare_weights."""
    batch, seq, d_model = x.shape
    h_pad = w_in.shape[1] // 2
    M = batch * seq

    # --- balanced row tiling -------------------------------------------------
    # n_tiles near-equal tiles (8-multiple rows each); min_tiles=2 on v7x so
    # both TensorCores get work even for small M.
    n_tiles = max(pl.cdiv(M, tm), min_tiles, 1)
    tm_eff = max(8, _round_up(pl.cdiv(M, n_tiles), 8))
    M_pad = n_tiles * tm_eff

    x2d = x.reshape(M, d_model)
    if M_pad != M:
        x2d = jnp.pad(x2d, ((0, M_pad - M), (0, 0)))

    # Grid-invariant operands: single-buffered (constant index_map => no
    # benefit from double-buffering, just VMEM cost).
    invariant = pl.Buffered(1)

    out2d = pl.pallas_call(
        mlp_kernel,
        out_shape=jax.ShapeDtypeStruct((M_pad, d_model), x.dtype),
        grid_spec=pltpu.PrefetchScalarGridSpec(
            num_scalar_prefetch=0,
            grid=(n_tiles,),
            in_specs=[
                pl.BlockSpec((tm_eff, d_model), lambda i: (i, 0)),       # x rows
                pl.BlockSpec((1, d_model), lambda i: (0, 0),
                             pipeline_mode=invariant),                   # rms gain
                pl.BlockSpec((d_model, 2 * h_pad), lambda i: (0, 0),
                             pipeline_mode=invariant),                   # fused w_in
                pl.BlockSpec((h_pad, d_model), lambda i: (0, 0),
                             pipeline_mode=invariant),                   # w_out
            ],
            out_specs=pl.BlockSpec((tm_eff, d_model), lambda i: (i, 0)),
        ),
        compiler_params=pltpu.CompilerParams(
            dimension_semantics=("parallel",),
            vmem_limit_bytes=vmem_limit_bytes,
        ),
    )(x2d, gain2d, w_in, w_out_p)

    return out2d[:M].reshape(batch, seq, d_model)


def reference_forward(x, gain, w_swish, w_gate, w_out):
    xf = x.astype(jnp.float32)
    ms = jnp.mean(xf * xf, axis=-1, keepdims=True)
    norm = xf * jax.lax.rsqrt(ms + RMS_EPS) * gain
    a = norm @ w_swish
    b = norm @ w_gate
    gated = a * jax.nn.sigmoid(a) * b
    return x + gated @ w_out


if __name__ == "__main__":
    key = jax.random.PRNGKey(0)
    k_x, k_g, k_ws, k_wg, k_wo = jax.random.split(key, 5)

    batch, seq = 2, 8
    x = jax.random.normal(k_x, (batch, seq, D_MODEL), dtype=jnp.float32)

    # Deterministic synthetic parameters (shapes match the module's __init__,
    # pre-transposed to (in_dim, out_dim)).
    gain = 1.0 + 0.02 * jax.random.normal(k_g, (D_MODEL,), dtype=jnp.float32)
    scale_in = 1.0 / jnp.sqrt(jnp.float32(D_MODEL))
    scale_hid = 1.0 / jnp.sqrt(jnp.float32(D_HID))
    w_swish = jax.random.normal(k_ws, (D_MODEL, D_HID), dtype=jnp.float32) * scale_in
    w_gate = jax.random.normal(k_wg, (D_MODEL, D_HID), dtype=jnp.float32) * scale_in
    w_out = jax.random.normal(k_wo, (D_HID, D_MODEL), dtype=jnp.float32) * scale_hid

    cfg = _GEN_DEFAULTS.get(_tpu_generation(), _GEN_DEFAULTS[None])

    # One-time weight prep (hoisted out of the forward / jit).
    gain2d, w_in, w_out_p = prepare_weights(
        gain, w_swish, w_gate, w_out, h_gran=cfg["h_gran"])
    gain2d, w_in, w_out_p = jax.block_until_ready((gain2d, w_in, w_out_p))

    y = mlp_forward(x, gain2d, w_in, w_out_p,
                    tm=cfg["tm"], min_tiles=cfg["min_tiles"],
                    vmem_limit_bytes=cfg["vmem"])
    y = jax.block_until_ready(y)

    y_ref = reference_forward(x, gain, w_swish, w_gate, w_out)
    assert y.shape == x.shape and y.dtype == x.dtype
    # Tolerance accounts for bf16 matmul operands (f32 accumulation).
    assert jnp.allclose(y, y_ref, atol=5e-2, rtol=5e-2), "mismatch vs reference"

    print("KERNEL_OK")
</pallas_src>

<mosaic_0001>
module attributes {stable_mosaic.version = 11 : i64} {
  func.func @mlp_kernel(%arg0: i32, %arg1: memref<16x512xf32, #tpu.memory_space<vmem>>, %arg2: memref<1x512xf32, #tpu.memory_space<vmem>>, %arg3: memref<512x3072xbf16, #tpu.memory_space<vmem>>, %arg4: memref<1536x512xbf16, #tpu.memory_space<vmem>>, %arg5: memref<16x512xf32, #tpu.memory_space<vmem>>) attributes {dimension_semantics = [#tpu.dimension_semantics<parallel>], iteration_bounds = array<i64: 1>, scalar_prefetch = 0 : i64, scratch_operands = 0 : i64, tpu.core_type = #tpu.core_type<tc>, window_params = [{transform_indices = @transform_0, window_bounds = array<i64: 16, 512>}, {pipeline_mode = #tpu.pipeline_mode<synchronous>, transform_indices = @transform_1, window_bounds = array<i64: 1, 512>}, {pipeline_mode = #tpu.pipeline_mode<synchronous>, transform_indices = @transform_2, window_bounds = array<i64: 512, 3072>}, {pipeline_mode = #tpu.pipeline_mode<synchronous>, transform_indices = @transform_3, window_bounds = array<i64: 1536, 512>}, {transform_indices = @transform_4, window_bounds = array<i64: 16, 512>}]} {
    %c0 = arith.constant 0 : index
    %c0_0 = arith.constant 0 : index
    %0 = vector.load %arg1[%c0, %c0_0] : memref<16x512xf32, #tpu.memory_space<vmem>>, vector<16x512xf32>
    %1 = arith.mulf %0, %0 : vector<16x512xf32>
    %cst = arith.constant dense<0.000000e+00> : vector<16xf32>
    %2 = vector.multi_reduction <add>, %1, %cst [1] : vector<16x512xf32> to vector<16xf32>
    %3 = vector.shape_cast %2 : vector<16xf32> to vector<16x1xf32>
    %cst_1 = arith.constant 5.120000e+02 : f32
    %4 = vector.broadcast %cst_1 : f32 to vector<16x1xf32>
    %5 = arith.divf %3, %4 : vector<16x1xf32>
    %cst_2 = arith.constant 9.99999997E-7 : f32
    %6 = vector.broadcast %cst_2 : f32 to vector<16x1xf32>
    %7 = arith.addf %5, %6 : vector<16x1xf32>
    %8 = math.rsqrt %7 : vector<16x1xf32>
    %9 = vector.broadcast %8 : vector<16x1xf32> to vector<16x512xf32>
    %10 = arith.mulf %0, %9 : vector<16x512xf32>
    %c0_3 = arith.constant 0 : index
    %c0_4 = arith.constant 0 : index
    %11 = vector.load %arg2[%c0_3, %c0_4] : memref<1x512xf32, #tpu.memory_space<vmem>>, vector<1x512xf32>
    %12 = vector.broadcast %11 : vector<1x512xf32> to vector<16x512xf32>
    %13 = arith.mulf %10, %12 : vector<16x512xf32>
    %14 = arith.truncf %13 : vector<16x512xf32> to vector<16x512xbf16>
    %c0_5 = arith.constant 0 : index
    %c0_6 = arith.constant 0 : index
    %15 = vector.load %arg3[%c0_5, %c0_6] : memref<512x3072xbf16, #tpu.memory_space<vmem>>, vector<512x3072xbf16>
    %cst_7 = arith.constant dense<0.000000e+00> : vector<16x3072xf32>
    %16 = tpu.matmul %14, %15, %cst_7 {dimension_numbers = #tpu.dot_dimension_numbers<[1], [0], [0], [1], [0, 0, 1, 1], [], []>} : vector<16x512xbf16>, vector<512x3072xbf16>, vector<16x3072xf32> -> vector<16x3072xf32>
    %17 = vector.extract_strided_slice %16 {offsets = [0, 0], sizes = [16, 1536], strides = [1, 1]} : vector<16x3072xf32> to vector<16x1536xf32>
    %18 = vector.extract_strided_slice %16 {offsets = [0, 1536], sizes = [16, 1536], strides = [1, 1]} : vector<16x3072xf32> to vector<16x1536xf32>
    %19 = arith.negf %17 : vector<16x1536xf32>
    %20 = math.exp %19 : vector<16x1536xf32>
    %cst_8 = arith.constant 1.000000e+00 : f32
    %21 = vector.broadcast %cst_8 : f32 to vector<16x1536xf32>
    %22 = arith.addf %21, %20 : vector<16x1536xf32>
    %23 = arith.divf %21, %22 : vector<16x1536xf32>
    %24 = arith.mulf %17, %23 : vector<16x1536xf32>
    %25 = arith.mulf %24, %18 : vector<16x1536xf32>
    %26 = arith.truncf %25 : vector<16x1536xf32> to vector<16x1536xbf16>
    %c0_9 = arith.constant 0 : index
    %c0_10 = arith.constant 0 : index
    %27 = vector.load %arg4[%c0_9, %c0_10] : memref<1536x512xbf16, #tpu.memory_space<vmem>>, vector<1536x512xbf16>
    %cst_11 = arith.constant dense<0.000000e+00> : vector<16x512xf32>
    %28 = tpu.matmul %26, %27, %cst_11 {dimension_numbers = #tpu.dot_dimension_numbers<[1], [0], [0], [1], [0, 0, 1, 1], [], []>} : vector<16x1536xbf16>, vector<1536x512xbf16>, vector<16x512xf32> -> vector<16x512xf32>
    %29 = arith.addf %0, %28 : vector<16x512xf32>
    %c0_12 = arith.constant 0 : index
    %c0_13 = arith.constant 0 : index
    %30 = vector.load %arg5[%c0_12, %c0_13] : memref<16x512xf32, #tpu.memory_space<vmem>>, vector<16x512xf32>
    tpu.vector_store %arg5[%c0_12, %c0_13], %29 {strides = array<i32>} : memref<16x512xf32, #tpu.memory_space<vmem>>, vector<16x512xf32>,
    return
  }
  func.func @transform_0(%arg0: i32) -> (i32, i32) {
    %c0_i32 = arith.constant 0 : i32
    %c0_i32_0 = arith.constant 0 : i32
    return %arg0, %c0_i32 : i32, i32
  }
  func.func @transform_1(%arg0: i32) -> (i32, i32) {
    %c0_i32 = arith.constant 0 : i32
    %c0_i32_0 = arith.constant 0 : i32
    %c0_i32_1 = arith.constant 0 : i32
    return %c0_i32, %c0_i32_0 : i32, i32
  }
  func.func @transform_2(%arg0: i32) -> (i32, i32) {
    %c0_i32 = arith.constant 0 : i32
    %c0_i32_0 = arith.constant 0 : i32
    %c0_i32_1 = arith.constant 0 : i32
    return %c0_i32, %c0_i32_0 : i32, i32
  }
  func.func @transform_3(%arg0: i32) -> (i32, i32) {
    %c0_i32 = arith.constant 0 : i32
    %c0_i32_0 = arith.constant 0 : i32
    %c0_i32_1 = arith.constant 0 : i32
    return %c0_i32, %c0_i32_0 : i32, i32
  }
  func.func @transform_4(%arg0: i32) -> (i32, i32) {
    %c0_i32 = arith.constant 0 : i32
    %c0_i32_0 = arith.constant 0 : i32
    return %arg0, %c0_i32 : i32, i32
  }
}

</mosaic_0001>

<bundles_post_ra>
// kernel: mlp_forward.1
= control target key start
LH: loop header
LB: loop body
LE: loop exit
PB: predicated region body
PF: predicated region fallthrough
CT: control target
= control target key end

     0   :  { %9 = vsyncpa [#allocation3], 0  ;;  %s11277_s0 = inlined_call_operand.hbm [shape: f32[16,512], index: 0, kind: input, shape index: {}]   ;;  %s11278_s1 = inlined_call_operand.hbm [shape: f32[1,512], index: 1, kind: input, shape index: {}]   ;;  %s11279_s2 = inlined_call_operand.hbm [shape: bf16[512,3072], index: 2, kind: input, shape index: {}]   ;;  %s11280_s3 = inlined_call_operand.hbm [shape: bf16[1536,512], index: 3, kind: input, shape index: {}]   ;;  %s11281_s4 = inlined_call_operand.hbm [shape: f32[16,512], index: 4, kind: output, shape index: {}]  }
   0x1   :  { %10 = vsyncpa [#allocation6], 0 }
   0x2   :  { %11 = vsyncpa [#allocation9], 0 }
   0x3   :  { %12 = vsyncpa [#allocation4], 0  ;;  %s10930_s15 = smov [#allocation5]   ;;  %s10931_s17 = smov [#allocation2]  }
   0x4   :  { %s31_s16 = sshll.u32 %s10930_s15, 4  ;;  %s18_s18 = sshll.u32 %s10931_s17, 4  ;;  %s32_s16 = int_to_ptr.vmem [resolvable:$true] %s31_s16  ;;  %s10966_s18 = int_to_ptr.vmem [resolvable:$true] %s18_s18 }
   0x5   :  { %s10812_s21 = scalar_lea.hbm %s11278_s1, 64 }
   0x6   :  { %p10813_p0 = scmp.ne.s32.totalorder %s11278_s1, %s10812_s21  ;;  %p10816_p1 = scmp.lt.u32.totalorder %s10812_s21, %s11278_s1 }
   0x8   :  { %p10818_p2 = pnand %p10816_p1, %p10813_p0 }
   0xa   :  { %10821 = shalt.err (!%p10818_p2)
}
   0xb   :  { %s10822_s26 = scalar_lea.vmem %s32_s16, 64  ;;  %p10827_p4 = scmp.lt.s32.totalorder %s32_s16, %s32_s16 }
   0xc   :  { %p10823_p3 = scmp.ne.s32.totalorder %s32_s16, %s10822_s26  ;;  %p10828_p5 = scmp.lt.s32.totalorder %s10822_s26, %s10822_s26 }
   0xe   :  { %p10829_p6 = por %p10828_p5, %p10827_p4 }
  0x10   :  { %p10830_p7 = pnand %p10829_p6, %p10823_p3 }
  0x12   :  { %10833 = shalt.err (!%p10830_p7)
}
  0x13   :  { %34 = dma.hbm_to_vmem [thread:$0]  %s11278_s1, 64, %s32_s16, [#allocation6]  }
  0x14   :  { %s10834_s5 = scalar_lea.hbm %s11277_s0, 1024 }
  0x15   :  { %p10835_p8 = scmp.ne.s32.totalorder %s11277_s0, %s10834_s5  ;;  %p10838_p9 = scmp.lt.u32.totalorder %s10834_s5, %s11277_s0 }
  0x17   :  { %p10840_p10 = pnand %p10838_p9, %p10835_p8 }
  0x19   :  { %10843 = shalt.err (!%p10840_p10)
}
  0x1a   :  { %s10844_s10 = scalar_lea.vmem %s10966_s18, 1024  ;;  %p10849_p12 = scmp.lt.s32.totalorder %s10966_s18, %s10966_s18 }
  0x1b   :  { %p10845_p11 = scmp.ne.s32.totalorder %s10966_s18, %s10844_s10  ;;  %p10850_p13 = scmp.lt.s32.totalorder %s10844_s10, %s10844_s10 }
  0x1d   :  { %p10851_p0 = por %p10850_p13, %p10849_p12 }
  0x1f   :  { %p10852_p1 = pnand %p10851_p0, %p10845_p11 }
  0x21   :  { %10855 = shalt.err (!%p10852_p1)
}
  0x22   :  { %s10932_s1 = smov 512   ;;  %s10933_s11 = smov 32  }
  0x23   :  { %24 = dma.hbm_to_vmem [thread:$0]  %s11277_s0, 1024, %s10966_s18, [#allocation3], %s10932_s1, %s10932_s1, %s10933_s11  }
  0x24   :  { %s10934_s14 = smov [#allocation7]   ;;  %s10856_s19 = scalar_lea.hbm %s11279_s2, 98304 }
  0x25   :  { %s40_s15 = sshll.u32 %s10934_s14, 4  ;;  %p10857_p2 = scmp.ne.s32.totalorder %s11279_s2, %s10856_s19  ;;  %s41_s15 = int_to_ptr.vmem [resolvable:$true] %s40_s15 }
  0x26   :  { %p10860_p3 = scmp.lt.u32.totalorder %s10856_s19, %s11279_s2 }
  0x28   :  { %p10862_p4 = pnand %p10860_p3, %p10857_p2 }
  0x2a   :  { %10865 = shalt.err (!%p10862_p4)
}
  0x2b   :  { %s10866_s24 = scalar_lea.vmem %s41_s15, 98304  ;;  %p10871_p6 = scmp.lt.s32.totalorder %s41_s15, %s41_s15 }
  0x2c   :  { %p10867_p5 = scmp.ne.s32.totalorder %s41_s15, %s10866_s24  ;;  %p10872_p7 = scmp.lt.s32.totalorder %s10866_s24, %s10866_s24 }
  0x2e   :  { %p10873_p8 = por %p10872_p7, %p10871_p6 }
  0x30   :  { %p10874_p9 = pnand %p10873_p8, %p10867_p5 }
  0x32   :  { %10877 = shalt.err (!%p10874_p9)
}
  0x33   :  { %s10935_s0 = smov 1536   ;;  %s10936_s18 = smov 96  }
  0x34   :  { %46 = dma.hbm_to_vmem [thread:$0]  %s11279_s2, 98304, %s41_s15, [#allocation6], %s10935_s0, %s10935_s0, %s10936_s18  }
  0x35   :  { %s10937_s27 = smov [#allocation8]   ;;  %s10878_s5 = scalar_lea.hbm %s11280_s3, 49152 }
  0x36   :  { %s52_s28 = sshll.u32 %s10937_s27, 4  ;;  %p10879_p10 = scmp.ne.s32.totalorder %s11280_s3, %s10878_s5  ;;  %s53_s28 = int_to_ptr.vmem [resolvable:$true] %s52_s28 }
  0x37   :  { %p10882_p11 = scmp.lt.u32.totalorder %s10878_s5, %s11280_s3 }
  0x39   :  { %p10884_p12 = pnand %p10882_p11, %p10879_p10 }
  0x3b   :  { %10887 = shalt.err (!%p10884_p12)
}
  0x3c   :  { %s10888_s10 = scalar_lea.vmem %s53_s28, 49152  ;;  %p10893_p0 = scmp.lt.s32.totalorder %s53_s28, %s53_s28 }
  0x3d   :  { %p10889_p13 = scmp.ne.s32.totalorder %s53_s28, %s10888_s10  ;;  %p10894_p1 = scmp.lt.s32.totalorder %s10888_s10, %s10888_s10 }
  0x3f   :  { %p10895_p2 = por %p10894_p1, %p10893_p0 }
  0x41   :  { %p10896_p3 = pnand %p10895_p2, %p10889_p13 }
  0x43   :  { %10899 = shalt.err (!%p10896_p3)
}
  0x44   :  { %s10938_s2 = smov 256   ;;  %s10939_s12 = smov 16  }
  0x45   :  { %58 = dma.hbm_to_vmem [thread:$0]  %s11280_s3, 49152, %s53_s28, [#allocation9], %s10938_s2, %s10938_s2, %s10939_s12  }
  0x46   :  { %10922 = dma.done.wait [#allocation3], 1024  }
  0x47   :  { %10923 = vsyncadd [#allocation3], 4294966272 }
  0x48   :  { %10924 = dma.done.wait [#allocation6], 98368  }
  0x49   :  { %10925 = vsyncadd [#allocation6], 4294868928 }
  0x4a   :  { %10926 = dma.done.wait [#allocation9], 49152  }
  0x4b   :  { %10927 = vsyncadd [#allocation9], 4294918144  ;;  %v71_v0 = vld [vmem:[#allocation2] sm:$0xff]  ;;  %v72_v1 = vld [vmem:[#allocation2 + $0x8] sm:$0xff]  ;;  %v114_v20 = vlaneseq  ;;  %s10940_s3 = smov [#allocation10]  }
  0x4c   :  { %v73_v2 = vld [vmem:[#allocation2 + $0x10] sm:$0xff]  ;;  %v74_v3 = vld [vmem:[#allocation2 + $0x18] sm:$0xff]  ;;  %v79_v4 = vmul.f32 %v71_v0, %v71_v0  ;;  %v80_v5 = vmul.f32 %v72_v1, %v72_v1  ;;  %v75_v7 = vld [vmem:[#allocation2 + $0x20] sm:$0xff]  ;;  %s8831_s15 = sshll.u32 %s10940_s3, 4  ;;  %s8832_s15 = int_to_ptr.vmem [resolvable:$true] %s8831_s15 }
  0x4d   :  { %v81_v6 = vmul.f32 %v73_v2, %v73_v2  ;;  %v76_v8 = vld [vmem:[#allocation2 + $0x28] sm:$0xff]  ;;  %v77_v9 = vld [vmem:[#allocation2 + $0x30] sm:$0xff]  ;;  %v78_v10 = vld [vmem:[#allocation2 + $0x38] sm:$0xff]  ;;  %v83_v11 = vmul.f32 %v75_v7, %v75_v7  ;;  %v82_v14 = vmul.f32 %v74_v3, %v74_v3  ;;  %v11024_v49 = vshrl.u32 %v114_v20, 7  ;;  %s10900_s16 = scalar_lea.vmem %s8832_s15, 1024  ;;  %p10905_p5 = scmp.lt.s32.totalorder %s8832_s15, %s8832_s15 }
  0x4e   :  { %v84_v12 = vmul.f32 %v76_v8, %v76_v8  ;;  %v146_v13 = vld [vmem:[#allocation7] sm:$0xff]  ;;  %v87_v15 = vadd.f32 %v80_v5, %v79_v4  ;;  %v85_v16 = vmul.f32 %v77_v9, %v77_v9  ;;  %v147_v18 = vld [vmem:[#allocation7 + $0x8] sm:$0xff]  ;;  %v86_v29 = vmul.f32 %v78_v10, %v78_v10  ;;  %v11027_v3 = vld [vmem:[#allocation5] sm:$0xf]  ;;  %p10901_p4 = scmp.ne.s32.totalorder %s8832_s15, %s10900_s16  ;;  %p10906_p6 = scmp.lt.s32.totalorder %s10900_s16, %s10900_s16 }
  0x4f   :  { %v158_v17 = vld [vmem:[#allocation7 + $0x60] sm:$0xff]  ;;  %v159_v19 = vld [vmem:[#allocation7 + $0x68] sm:$0xff]  ;;  %v124_v58 = vsub.s32 2, %v11024_v49 }
  0x50   :  { %v92_v21 = vadd.f32 %v84_v12, %v83_v11  ;;  %v8846_v22 = vcombine.high %v146_v13, %v158_v17  ;;  %v8848_v23 = vcombine.high %v147_v18, %v159_v19  ;;  %v8845_v24 = vcombine.low %v146_v13, %v158_v17  ;;  %v170_v25 = vld [vmem:[#allocation7 + $0xc0] sm:$0xff]  ;;  %v171_v27 = vld [vmem:[#allocation7 + $0xc8] sm:$0xff]  ;;  %p10907_p7 = por %p10906_p6, %p10905_p5 }
  0x51   :  { %v182_v26 = vld [vmem:[#allocation7 + $0x120] sm:$0xff]  ;;  %v88_v28 = vadd.f32 %v87_v15, %v81_v6  ;;  %v8847_v30 = vcombine.low %v147_v18, %v159_v19  ;;  %v183_v32 = vld [vmem:[#allocation7 + $0x128] sm:$0xff]  ;;  %v11030_v4 = vrot.slane %v11027_v3, %v124_v58 }
  0x52   :  { %v8870_v31 = vcombine.high %v170_v25, %v182_v26  ;;  %v194_v33 = vld [vmem:[#allocation7 + $0x180] sm:$0xff]  ;;  %v93_v35 = vadd.f32 %v92_v21, %v85_v16  ;;  %4754 = vmatprep.subr.bf16.mxu0 %v8846_v22  ;;  %4840 = vmatprep.subr.bf16.mxu1 %v8848_v23  ;;  %v8872_v36 = vcombine.high %v171_v27, %v183_v32  ;;  %v195_v37 = vld [vmem:[#allocation7 + $0x188] sm:$0xff]  ;;  %p10908_p8 = pnand %p10907_p7, %p10901_p4 }
  0x53   :  { %v206_v34 = vld [vmem:[#allocation7 + $0x1e0] sm:$0xff]  ;;  %v207_v38 = vld [vmem:[#allocation7 + $0x1e8] sm:$0xff]  ;;  %v89_v39 = vadd.f32 %v88_v28, %v82_v14  ;;  %4755 = vmatpush1.bf16.msra.mxu0 %v8845_v24  ;;  %4841 = vmatpush1.bf16.msra.mxu1 %v8847_v30  ;;  %v8869_v40 = vcombine.low %v170_v25, %v182_v26  ;;  %v8871_v41 = vcombine.low %v171_v27, %v183_v32 }
  0x54   :  { %4756 = vmatprep.subr.bf16.mxu0 %v8870_v31  ;;  %4842 = vmatprep.subr.bf16.mxu1 %v8872_v36  ;;  %v8894_v42 = vcombine.high %v194_v33, %v206_v34  ;;  %v8896_v43 = vcombine.high %v195_v37, %v207_v38  ;;  %v218_v44 = vld [vmem:[#allocation7 + $0x240] sm:$0xff]  ;;  %v94_v45 = vadd.f32 %v93_v35, %v86_v29  ;;  %v219_v47 = vld [vmem:[#allocation7 + $0x248] sm:$0xff] }
  0x55   :  { %90 = vadd.xlane.f32.xlu0 %v89_v39  ;;  %v230_v46 = vld [vmem:[#allocation7 + $0x2a0] sm:$0xff]  ;;  %v231_v48 = vld [vmem:[#allocation7 + $0x2a8] sm:$0xff]  ;;  %v8893_v50 = vcombine.low %v194_v33, %v206_v34  ;;  %v8895_v51 = vcombine.low %v195_v37, %v207_v38 }
  0x56   :  { %v8918_v52 = vcombine.high %v218_v44, %v230_v46  ;;  %v8920_v53 = vcombine.high %v219_v47, %v231_v48  ;;  %v242_v54 = vld [vmem:[#allocation7 + $0x300] sm:$0xff]  ;;  %v243_v56 = vld [vmem:[#allocation7 + $0x308] sm:$0xff]  ;;  %v8917_v59 = vcombine.low %v218_v44, %v230_v46  ;;  %v8919_v60 = vcombine.low %v219_v47, %v231_v48 }
  0x57   :  { %4757 = vmatpush1.bf16.msra.mxu0 %v8869_v40  ;;  %4843 = vmatpush1.bf16.msra.mxu1 %v8871_v41  ;;  %v254_v55 = vld [vmem:[#allocation7 + $0x360] sm:$0xff]  ;;  %v255_v57 = vld [vmem:[#allocation7 + $0x368] sm:$0xff] }
  0x58   :  { %4758 = vmatprep.subr.bf16.mxu0 %v8894_v42  ;;  %4844 = vmatprep.subr.bf16.mxu1 %v8896_v43  ;;  %v266_v61 = vld [vmem:[#allocation7 + $0x3c0] sm:$0xff]  ;;  %v267_v63 = vld [vmem:[#allocation7 + $0x3c8] sm:$0xff]  ;;  %v8942_v1 = vcombine.high %v242_v54, %v254_v55  ;;  %v8944_v2 = vcombine.high %v243_v56, %v255_v57  ;;  %v8941_v5 = vcombine.low %v242_v54, %v254_v55 }
  0x59   :  { %95 = vadd.xlane.f32.xlu0 %v94_v45  ;;  %v278_v62 = vld [vmem:[#allocation7 + $0x420] sm:$0xff]  ;;  %v279_v0 = vld [vmem:[#allocation7 + $0x428] sm:$0xff]  ;;  %v8943_v6 = vcombine.low %v243_v56, %v255_v57 }
  0x5a   :  { %v290_v7 = vld [vmem:[#allocation7 + $0x480] sm:$0xff]  ;;  %v8966_v8 = vcombine.high %v266_v61, %v278_v62  ;;  %v8968_v9 = vcombine.high %v267_v63, %v279_v0  ;;  %v291_v11 = vld [vmem:[#allocation7 + $0x488] sm:$0xff]  ;;  %v8965_v13 = vcombine.low %v266_v61, %v278_v62  ;;  %v8967_v14 = vcombine.low %v267_v63, %v279_v0 }
  0x5b   :  { %4759 = vmatpush1.bf16.msra.mxu0 %v8893_v50  ;;  %4845 = vmatpush1.bf16.msra.mxu1 %v8895_v51  ;;  %v302_v10 = vld [vmem:[#allocation7 + $0x4e0] sm:$0xff]  ;;  %v303_v12 = vld [vmem:[#allocation7 + $0x4e8] sm:$0xff] }
  0x5c   :  { %4760 = vmatprep.subr.bf16.mxu0 %v8918_v52  ;;  %4846 = vmatprep.subr.bf16.mxu1 %v8920_v53  ;;  %v314_v15 = vld [vmem:[#allocation7 + $0x540] sm:$0xff]  ;;  %v8990_v16 = vcombine.high %v290_v7, %v302_v10  ;;  %v8992_v17 = vcombine.high %v291_v11, %v303_v12  ;;  %v315_v19 = vld [vmem:[#allocation7 + $0x548] sm:$0xff]  ;;  %v8989_v21 = vcombine.low %v290_v7, %v302_v10 }
  0x5d   :  { %v326_v18 = vld [vmem:[#allocation7 + $0x5a0] sm:$0xff]  ;;  %v327_v20 = vld [vmem:[#allocation7 + $0x5a8] sm:$0xff]  ;;  %v8991_v22 = vcombine.low %v291_v11, %v303_v12 }
  0x5e   :  { %v338_v23 = vld [vmem:[#allocation7 + $0x600] sm:$0xff]  ;;  %v9014_v24 = vcombine.high %v314_v15, %v326_v18  ;;  %v9016_v25 = vcombine.high %v315_v19, %v327_v20  ;;  %v339_v27 = vld [vmem:[#allocation7 + $0x608] sm:$0xff]  ;;  %v9013_v29 = vcombine.low %v314_v15, %v326_v18  ;;  %v9015_v30 = vcombine.low %v315_v19, %v327_v20 }
  0x5f   :  { %4761 = vmatpush1.bf16.msra.mxu0 %v8917_v59  ;;  %4847 = vmatpush1.bf16.msra.mxu1 %v8919_v60  ;;  %v350_v26 = vld [vmem:[#allocation7 + $0x660] sm:$0xff]  ;;  %v351_v28 = vld [vmem:[#allocation7 + $0x668] sm:$0xff] }
  0x60   :  { %4762 = vmatprep.subr.bf16.mxu0 %v8942_v1  ;;  %4848 = vmatprep.subr.bf16.mxu1 %v8944_v2  ;;  %v362_v31 = vld [vmem:[#allocation7 + $0x6c0] sm:$0xff]  ;;  %v9038_v32 = vcombine.high %v338_v23, %v350_v26  ;;  %v9040_v33 = vcombine.high %v339_v27, %v351_v28  ;;  %v363_v35 = vld [vmem:[#allocation7 + $0x6c8] sm:$0xff]  ;;  %v9037_v37 = vcombine.low %v338_v23, %v350_v26 }
  0x61   :  { %v374_v34 = vld [vmem:[#allocation7 + $0x720] sm:$0xff]  ;;  %v375_v36 = vld [vmem:[#allocation7 + $0x728] sm:$0xff]  ;;  %v9039_v38 = vcombine.low %v339_v27, %v351_v28 }
  0x62   :  { %v386_v39 = vld [vmem:[#allocation7 + $0x780] sm:$0xff]  ;;  %v9062_v40 = vcombine.high %v362_v31, %v374_v34  ;;  %v9064_v41 = vcombine.high %v363_v35, %v375_v36  ;;  %v387_v43 = vld [vmem:[#allocation7 + $0x788] sm:$0xff]  ;;  %v9061_v45 = vcombine.low %v362_v31, %v374_v34  ;;  %v9063_v46 = vcombine.low %v363_v35, %v375_v36 }
  0x63   :  { %4763 = vmatpush1.bf16.msra.mxu0 %v8941_v5  ;;  %4849 = vmatpush1.bf16.msra.mxu1 %v8943_v6  ;;  %v398_v42 = vld [vmem:[#allocation7 + $0x7e0] sm:$0xff]  ;;  %v399_v44 = vld [vmem:[#allocation7 + $0x7e8] sm:$0xff] }
  0x64   :  { %4764 = vmatprep.subr.bf16.mxu0 %v8966_v8  ;;  %4850 = vmatprep.subr.bf16.mxu1 %v8968_v9  ;;  %v410_v47 = vld [vmem:[#allocation7 + $0x840] sm:$0xff]  ;;  %v9086_v48 = vcombine.high %v386_v39, %v398_v42  ;;  %v9088_v50 = vcombine.high %v387_v43, %v399_v44  ;;  %v411_v52 = vld [vmem:[#allocation7 + $0x848] sm:$0xff]  ;;  %v9085_v54 = vcombine.low %v386_v39, %v398_v42 }
  0x65   :  { %v422_v51 = vld [vmem:[#allocation7 + $0x8a0] sm:$0xff]  ;;  %v423_v53 = vld [vmem:[#allocation7 + $0x8a8] sm:$0xff]  ;;  %v9087_v55 = vcombine.low %v387_v43, %v399_v44  ;;  %v116_v44 = vsub.s32 0, %v11024_v49 }
  0x66   :  { %v434_v56 = vld [vmem:[#allocation7 + $0x900] sm:$0xff]  ;;  %v435_v58 = vld [vmem:[#allocation7 + $0x908] sm:$0xff]  ;;  %v9110_v60 = vcombine.high %v410_v47, %v422_v51  ;;  %v9112_v61 = vcombine.high %v411_v52, %v423_v53  ;;  %v9109_v1 = vcombine.low %v410_v47, %v422_v51  ;;  %v9111_v5 = vcombine.low %v411_v52, %v423_v53 }
  0x67   :  { %4765 = vmatpush1.bf16.msra.mxu0 %v8965_v13  ;;  %4851 = vmatpush1.bf16.msra.mxu1 %v8967_v14  ;;  %v446_v57 = vld [vmem:[#allocation7 + $0x960] sm:$0xff]  ;;  %v447_v59 = vld [vmem:[#allocation7 + $0x968] sm:$0xff]  ;;  %v128_v51 = vsub.s32 3, %v11024_v49 }
  0x68   :  { %4766 = vmatprep.subr.bf16.mxu0 %v8990_v16  ;;  %4852 = vmatprep.subr.bf16.mxu1 %v8992_v17  ;;  %v11032_v62 = vld [vmem:[#allocation7 + $0xc00] sm:$0xff]  ;;  %v11036_v0 = vld [vmem:[#allocation7 + $0xc08] sm:$0xff]  ;;  %v9134_v12 = vcombine.high %v434_v56, %v446_v57  ;;  %v9136_v13 = vcombine.high %v435_v58, %v447_v59  ;;  %v9133_v14 = vcombine.low %v434_v56, %v446_v57 }
  0x69   :  { %v11034_v63 = vld [vmem:[#allocation7 + $0xc60] sm:$0xff]  ;;  %v11038_v2 = vld [vmem:[#allocation7 + $0xc68] sm:$0xff]  ;;  %v9135_v15 = vcombine.low %v435_v58, %v447_v59 }
  0x6a   :  { %v458_v6 = vld [vmem:[#allocation7 + $0x9c0] sm:$0xff]  ;;  %v459_v8 = vld [vmem:[#allocation7 + $0x9c8] sm:$0xff]  ;;  %v9229_v10 = vcombine.low %v11032_v62, %v11034_v63  ;;  %v9231_v11 = vcombine.low %v11036_v0, %v11038_v2  ;;  %v9230_v36 = vcombine.high %v11032_v62, %v11034_v63 }
  0x6b   :  { %4767 = vmatpush1.bf16.msra.mxu0 %v8989_v21  ;;  %4853 = vmatpush1.bf16.msra.mxu1 %v8991_v22  ;;  %v470_v7 = vld [vmem:[#allocation7 + $0xa20] sm:$0xff]  ;;  %v471_v9 = vld [vmem:[#allocation7 + $0xa28] sm:$0xff] }
  0x6c   :  { %4768 = vmatprep.subr.bf16.mxu0 %v9014_v24  ;;  %4854 = vmatprep.subr.bf16.mxu1 %v9016_v25  ;;  %v482_v16 = vld [vmem:[#allocation7 + $0xa80] sm:$0xff]  ;;  %v483_v18 = vld [vmem:[#allocation7 + $0xa88] sm:$0xff]  ;;  %v9158_v20 = vcombine.high %v458_v6, %v470_v7  ;;  %v9160_v21 = vcombine.high %v459_v8, %v471_v9  ;;  %v9157_v22 = vcombine.low %v458_v6, %v470_v7  ;;  %v10802_v7 = vld [vmem:[#allocation2 + $0x38] sm:$0xff] }
  0x6d   :  { %v494_v17 = vld [vmem:[#allocation7 + $0xae0] sm:$0xff]  ;;  %v495_v19 = vld [vmem:[#allocation7 + $0xae8] sm:$0xff]  ;;  %v9159_v23 = vcombine.low %v459_v8, %v471_v9  ;;  %v129_v9 = vrot.slane %v11027_v3, %v128_v51 }
  0x6e   :  { %v506_v24 = vld [vmem:[#allocation7 + $0xb40] sm:$0xff]  ;;  %v507_v26 = vld [vmem:[#allocation7 + $0xb48] sm:$0xff]  ;;  %v9182_v28 = vcombine.high %v482_v16, %v494_v17  ;;  %v9183_v31 = vcombine.low %v483_v18, %v495_v19 }
  0x6f   :  { %4769 = vmatpush1.bf16.msra.mxu0 %v9013_v29  ;;  %4855 = vmatpush1.bf16.msra.mxu1 %v9015_v30  ;;  %v518_v25 = vld [vmem:[#allocation7 + $0xba0] sm:$0xff]  ;;  %v519_v27 = vld [vmem:[#allocation7 + $0xba8] sm:$0xff]  ;;  %v9184_v29 = vcombine.high %v483_v18, %v495_v19  ;;  %v9181_v30 = vcombine.low %v482_v16, %v494_v17 }
  0x70   :  { %4770 = vmatprep.subr.bf16.mxu0 %v9038_v32  ;;  %4856 = vmatprep.subr.bf16.mxu1 %v9040_v33  ;;  %v9206_v32 = vcombine.high %v506_v24, %v518_v25  ;;  %v9208_v33 = vcombine.high %v507_v26, %v519_v27  ;;  %v9205_v34 = vcombine.low %v506_v24, %v518_v25  ;;  %v10796_v47 = vld [vmem:[#allocation2 + $0x10] sm:$0xff]  ;;  %v10797_v52 = vld [vmem:[#allocation2] sm:$0xff] }
  0x71   :  { %v9207_v35 = vcombine.low %v507_v26, %v519_v27  ;;  %v10799_v59 = vld [vmem:[#allocation2 + $0x20] sm:$0xff]  ;;  %v555_v16 = vld [vmem:[#allocation7 + $0xcc8] sm:$0xff] }
  0x72   :  { %v578_v26 = vld [vmem:[#allocation7 + $0xd80] sm:$0xff] }
  0x73   :  { %4771 = vmatpush1.bf16.msra.mxu0 %v9037_v37  ;;  %4857 = vmatpush1.bf16.msra.mxu1 %v9039_v38  ;;  %v9232_v37 = vcombine.high %v11036_v0, %v11038_v2  ;;  %v590_v27 = vld [vmem:[#allocation7 + $0xde0] sm:$0xff] }
  0x74   :  { %4772 = vmatprep.subr.bf16.mxu0 %v9062_v40  ;;  %4858 = vmatprep.subr.bf16.mxu1 %v9064_v41  ;;  %v9277_v62 = vcombine.low %v578_v26, %v590_v27 }
  0x77   :  { %4773 = vmatpush1.bf16.msra.mxu0 %v9061_v45  ;;  %4859 = vmatpush1.bf16.msra.mxu1 %v9063_v46  ;;  %v120_v45 = vsub.s32 1, %v11024_v49  ;;  %v10803_v49 = vld [vmem:[#allocation2 + $0x18] sm:$0xff] }
  0x78   :  { %4774 = vmatprep.subr.bf16.mxu0 %v9086_v48  ;;  %4860 = vmatprep.subr.bf16.mxu1 %v9088_v50  ;;  %v117_v50 = vrot.slane %v11027_v3, %v116_v44 }
  0x7b   :  { %4775 = vmatpush1.bf16.msra.mxu0 %v9085_v54  ;;  %4861 = vmatpush1.bf16.msra.mxu1 %v9087_v55  ;;  %v121_v54 = vrot.slane %v11027_v3, %v120_v45  ;;  %v10798_v55 = vld [vmem:[#allocation2 + $0x8] sm:$0xff] }
  0x7c   :  { %4776 = vmatprep.subr.bf16.mxu0 %v9110_v60  ;;  %4862 = vmatprep.subr.bf16.mxu1 %v9112_v61  ;;  %v10800_v61 = vld [vmem:[#allocation2 + $0x28] sm:$0xff] }
  0x7f   :  { %4777 = vmatpush1.bf16.msra.mxu0 %v9109_v1  ;;  %4863 = vmatpush1.bf16.msra.mxu1 %v9111_v5  ;;  %v10801_v5 = vld [vmem:[#allocation2 + $0x30] sm:$0xff] }
  0x80   :  { %4778 = vmatprep.subr.bf16.mxu0 %v9134_v12  ;;  %4864 = vmatprep.subr.bf16.mxu1 %v9136_v13 }
  0x83   :  { %4779 = vmatpush1.bf16.msra.mxu0 %v9133_v14  ;;  %4865 = vmatpush1.bf16.msra.mxu1 %v9135_v15  ;;  %v554_v14 = vld [vmem:[#allocation7 + $0xcc0] sm:$0xff] }
  0x84   :  { %4780 = vmatprep.subr.bf16.mxu0 %v9158_v20  ;;  %4866 = vmatprep.subr.bf16.mxu1 %v9160_v21  ;;  %v566_v15 = vld [vmem:[#allocation7 + $0xd20] sm:$0xff]  ;;  %v567_v21 = vld [vmem:[#allocation7 + $0xd28] sm:$0xff] }
  0x87   :  { %4781 = vmatpush1.bf16.msra.mxu0 %v9157_v22  ;;  %4867 = vmatpush1.bf16.msra.mxu1 %v9159_v23 }
  0x88   :  { %4782 = vmatprep.subr.bf16.mxu0 %v9182_v28  ;;  %4868 = vmatprep.subr.bf16.mxu1 %v9184_v29  ;;  %v579_v28 = vld [vmem:[#allocation7 + $0xd88] sm:$0xff]  ;;  %v9254_v29 = vcombine.high %v554_v14, %v566_v15 }
  0x8b   :  { %4783 = vmatpush1.bf16.msra.mxu0 %v9181_v30  ;;  %4869 = vmatpush1.bf16.msra.mxu1 %v9183_v31  ;;  %v9256_v30 = vcombine.high %v555_v16, %v567_v21  ;;  %v591_v31 = vld [vmem:[#allocation7 + $0xde8] sm:$0xff] }
  0x8c   :  { %4784 = vmatprep.subr.bf16.mxu0 %v9206_v32  ;;  %4870 = vmatprep.subr.bf16.mxu1 %v9208_v33  ;;  %v9253_v32 = vcombine.low %v554_v14, %v566_v15  ;;  %v9255_v33 = vcombine.low %v555_v16, %v567_v21  ;;  %v9279_v63 = vcombine.low %v579_v28, %v591_v31  ;;  %v722_v14 = vld [vmem:[#allocation7 + $0x1200] sm:$0xff]  ;;  %v723_v16 = vld [vmem:[#allocation7 + $0x1208] sm:$0xff] }
  0x8d   :  { %v734_v15 = vld [vmem:[#allocation7 + $0x1260] sm:$0xff] }
  0x8f   :  { %4785 = vmatpush1.bf16.msra.mxu0 %v9205_v34  ;;  %4871 = vmatpush1.bf16.msra.mxu1 %v9207_v35  ;;  %v602_v34 = vld [vmem:[#allocation7 + $0xe40] sm:$0xff]  ;;  %v9278_v35 = vcombine.high %v578_v26, %v590_v27  ;;  %v747_v26 = vld [vmem:[#allocation7 + $0x12c8] sm:$0xff] }
  0x90   :  { %4797 = vmatprep.subr.bf16.mxu0 %v9230_v36  ;;  %4883 = vmatprep.subr.bf16.mxu1 %v9232_v37  ;;  %v9280_v36 = vcombine.high %v579_v28, %v591_v31  ;;  %v614_v37 = vld [vmem:[#allocation7 + $0xea0] sm:$0xff]  ;;  %v759_v27 = vld [vmem:[#allocation7 + $0x1328] sm:$0xff]  ;;  %v9421_v28 = vcombine.low %v722_v14, %v734_v15 }
  0x91   :  { %v9302_v0 = vcombine.high %v602_v34, %v614_v37  ;;  %v9448_v31 = vcombine.high %v747_v26, %v759_v27 }
  0xe2   :  { %v91_v38 = vpop.xlane.xlu0 %90 }
  0xe3   :  { %v98_v39 = vmul.f32 0.001953125, %v91_v38  ;;  %v603_v38 = vld [vmem:[#allocation7 + $0xe48] sm:$0xff] }
  0xe5   :  { %v100_v40 = vadd.f32 1e-06, %v98_v39  ;;  %v615_v39 = vld [vmem:[#allocation7 + $0xea8] sm:$0xff] }
  0xe6   :  { %v96_v41 = vpop.xlane.xlu0 %95  ;;  %v9304_v2 = vcombine.high %v603_v38, %v615_v39 }
  0xe7   :  { %10696 = vrsqrt.f32 %v100_v40  ;;  %v99_v42 = vmul.f32 0.001953125, %v96_v41  ;;  %v627_v40 = vld [vmem:[#allocation7 + $0xf08] sm:$0xff] }
  0xe8   :  { %v639_v41 = vld [vmem:[#allocation7 + $0xf68] sm:$0xff] }
  0xe9   :  { %v101_v43 = vadd.f32 1e-06, %v99_v42  ;;  %v9301_v42 = vcombine.low %v602_v34, %v614_v37  ;;  %v9328_v45 = vcombine.high %v627_v40, %v639_v41  ;;  %v771_v34 = vld [vmem:[#allocation7 + $0x1388] sm:$0xff]  ;;  %v9447_v37 = vcombine.low %v747_v26, %v759_v27 }
  0xeb   :  { %10698 = vrsqrt.f32 %v101_v43  ;;  %v9303_v43 = vcombine.low %v603_v38, %v615_v39 }
  0xf1   :  { %v10697_v46 = vpop.eup %10696 }
  0xf2   :  { %v106_v48 = vmul.f32 %v10796_v47, %v10697_v46  ;;  %v104_v53 = vmul.f32 %v10797_v52, %v10697_v46  ;;  %v105_v56 = vmul.f32 %v10798_v55, %v10697_v46  ;;  %v107_v12 = vmul.f32 %v10803_v49, %v10697_v46  ;;  %v650_v46 = vld [vmem:[#allocation7 + $0xfc0] sm:$0xff] }
  0xf3   :  { %v662_v47 = vld [vmem:[#allocation7 + $0x1020] sm:$0xff]  ;;  %v9327_v52 = vcombine.low %v627_v40, %v639_v41 }
  0xf4   :  { %v136_v57 = vmul.f32 %v11030_v4, %v106_v48  ;;  %v134_v13 = vmul.f32 %v117_v50, %v104_v53  ;;  %v135_v17 = vmul.f32 %v121_v54, %v105_v56  ;;  %v137_v3 = vmul.f32 %v129_v9, %v107_v12  ;;  %v651_v48 = vld [vmem:[#allocation7 + $0xfc8] sm:$0xff]  ;;  %v674_v55 = vld [vmem:[#allocation7 + $0x1080] sm:$0xff] }
  0xf5   :  { %v10699_v58 = vpop.eup %10698  ;;  %v9350_v53 = vcombine.high %v650_v46, %v662_v47  ;;  %v686_v56 = vld [vmem:[#allocation7 + $0x10e0] sm:$0xff] }
  0xf6   :  { %v108_v60 = vmul.f32 %v10799_v59, %v10699_v58  ;;  %v109_v1 = vmul.f32 %v10800_v61, %v10699_v58  ;;  %v110_v6 = vmul.f32 %v10801_v5, %v10699_v58  ;;  %v111_v8 = vmul.f32 %v10802_v7, %v10699_v58  ;;  %v687_v58 = vld [vmem:[#allocation7 + $0x10e8] sm:$0xff]  ;;  %v698_v5 = vld [vmem:[#allocation7 + $0x1140] sm:$0xff] }
  0xf7   :  { %v9349_v59 = vcombine.low %v650_v46, %v662_v47  ;;  %v9374_v61 = vcombine.high %v674_v55, %v686_v56  ;;  %v699_v7 = vld [vmem:[#allocation7 + $0x1148] sm:$0xff] }
  0xf8   :  { %v138_v18 = vmul.f32 %v117_v50, %v108_v60  ;;  %v139_v19 = vmul.f32 %v121_v54, %v109_v1  ;;  %v140_v20 = vmul.f32 %v11030_v4, %v110_v6  ;;  %v141_v22 = vmul.f32 %v129_v9, %v111_v8  ;;  %v663_v50 = vld [vmem:[#allocation7 + $0x1028] sm:$0xff]  ;;  %v710_v6 = vld [vmem:[#allocation7 + $0x11a0] sm:$0xff] }
  0xf9   :  { %v9352_v54 = vcombine.high %v651_v48, %v663_v50  ;;  %v9351_v60 = vcombine.low %v651_v48, %v663_v50  ;;  %v711_v8 = vld [vmem:[#allocation7 + $0x11a8] sm:$0xff]  ;;  %v9373_v9 = vcombine.low %v674_v55, %v686_v56  ;;  %v9398_v12 = vcombine.high %v698_v5, %v710_v6 }
  0xfa   :  { %v11056_v23 = vpack.c.bf16 %v138_v18, %v134_v13  ;;  %v11058_v24 = vpack.c.bf16 %v139_v19, %v135_v17  ;;  %v11060_v25 = vpack.c.bf16 %v140_v20, %v136_v57  ;;  %v11064_v4 = vpack.c.bf16 %v141_v22, %v137_v3  ;;  %v675_v57 = vld [vmem:[#allocation7 + $0x1088] sm:$0xff]  ;;  %v746_v22 = vld [vmem:[#allocation7 + $0x12c0] sm:$0xff] }
  0xfb   :  { %v9376_v1 = vcombine.high %v675_v57, %v687_v58  ;;  %v9375_v49 = vcombine.low %v675_v57, %v687_v58  ;;  %v9400_v13 = vcombine.high %v699_v7, %v711_v8  ;;  %v735_v17 = vld [vmem:[#allocation7 + $0x1268] sm:$0xff]  ;;  %v9397_v18 = vcombine.low %v698_v5, %v710_v6  ;;  %v758_v3 = vld [vmem:[#allocation7 + $0x1320] sm:$0xff] }
  0xfc   :  { %4786 = vmatprep.mubr.bf16.mxu0 %v11058_v24  ;;  %4872 = vmatprep.mubr.bf16.mxu1 %v11058_v24  ;;  %v9399_v19 = vcombine.low %v699_v7, %v711_v8  ;;  %v9422_v20 = vcombine.high %v722_v14, %v734_v15  ;;  %v9424_v21 = vcombine.high %v723_v16, %v735_v17 }
  0xfd   :  { %4787 = vmatmul.mubr.bf16.vlgmr.msra.gmra.mrb[0].mxu0 %v11056_v23  ;;  %4873 = vmatmul.mubr.bf16.vlgmr.msra.gmra.mrb[0].mxu1 %v11056_v23 }
  0xfe   :  { %4798 = vmatpush1.bf16.msra.mxu0 %v9229_v10  ;;  %4884 = vmatpush1.bf16.msra.mxu1 %v9231_v11  ;;  %v626_v10 = vld [vmem:[#allocation7 + $0xf00] sm:$0xff] }
  0xff   :  { %4829 = vmatprep.mubr.bf16.mxu0 %v11064_v4  ;;  %4915 = vmatprep.mubr.bf16.mxu1 %v11064_v4  ;;  %v638_v11 = vld [vmem:[#allocation7 + $0xf60] sm:$0xff] }
 0x100   :  { %4799 = vmatprep.subr.bf16.mxu0 %v9254_v29  ;;  %4885 = vmatprep.subr.bf16.mxu1 %v9256_v30  ;;  %v9326_v44 = vcombine.high %v626_v10, %v638_v11  ;;  %v9325_v51 = vcombine.low %v626_v10, %v638_v11  ;;  %v9423_v29 = vcombine.low %v723_v16, %v735_v17 }
 0x101   :  { %v9446_v30 = vcombine.high %v746_v22, %v758_v3 }
 0x102   :  { %4800 = vmatpush1.bf16.msra.mxu0 %v9253_v32  ;;  %4886 = vmatpush1.bf16.msra.mxu1 %v9255_v33  ;;  %v770_v32 = vld [vmem:[#allocation7 + $0x1380] sm:$0xff] }
 0x103   :  { %4801 = vmatprep.subr.bf16.mxu0 %v9278_v35  ;;  %4887 = vmatprep.subr.bf16.mxu1 %v9280_v36  ;;  %v782_v33 = vld [vmem:[#allocation7 + $0x13e0] sm:$0xff]  ;;  %v783_v35 = vld [vmem:[#allocation7 + $0x13e8] sm:$0xff]  ;;  %v9445_v36 = vcombine.low %v746_v22, %v758_v3 }
 0x104   :  { %v9470_v38 = vcombine.high %v770_v32, %v782_v33  ;;  %v9472_v39 = vcombine.high %v771_v34, %v783_v35  ;;  %v9469_v10 = vcombine.low %v770_v32, %v782_v33  ;;  %v9471_v11 = vcombine.low %v771_v34, %v783_v35 }
 0x106   :  { %4802 = vmatpush1.bf16.msra.mxu0 %v9277_v62  ;;  %4888 = vmatpush1.bf16.msra.mxu1 %v9279_v63  ;;  %v794_v62 = vld [vmem:[#allocation7 + $0x1440] sm:$0xff] }
 0x107   :  { %4803 = vmatprep.subr.bf16.mxu0 %v9302_v0  ;;  %4889 = vmatprep.subr.bf16.mxu1 %v9304_v2  ;;  %v806_v63 = vld [vmem:[#allocation7 + $0x14a0] sm:$0xff]  ;;  %v795_v0 = vld [vmem:[#allocation7 + $0x1448] sm:$0xff] }
 0x108   :  { %v807_v2 = vld [vmem:[#allocation7 + $0x14a8] sm:$0xff]  ;;  %v9494_v40 = vcombine.high %v794_v62, %v806_v63  ;;  %v9493_v46 = vcombine.low %v794_v62, %v806_v63 }
 0x109   :  { %v9496_v41 = vcombine.high %v795_v0, %v807_v2  ;;  %v9495_v47 = vcombine.low %v795_v0, %v807_v2 }
 0x10a   :  { %4804 = vmatpush1.bf16.msra.mxu0 %v9301_v42  ;;  %4890 = vmatpush1.bf16.msra.mxu1 %v9303_v43  ;;  %v818_v42 = vld [vmem:[#allocation7 + $0x1500] sm:$0xff] }
 0x10b   :  { %4805 = vmatprep.subr.bf16.mxu0 %v9326_v44  ;;  %4891 = vmatprep.subr.bf16.mxu1 %v9328_v45  ;;  %v830_v43 = vld [vmem:[#allocation7 + $0x1560] sm:$0xff]  ;;  %v819_v44 = vld [vmem:[#allocation7 + $0x1508] sm:$0xff] }
 0x10c   :  { %v831_v45 = vld [vmem:[#allocation7 + $0x1568] sm:$0xff]  ;;  %v9518_v48 = vcombine.high %v818_v42, %v830_v43  ;;  %v9517_v55 = vcombine.low %v818_v42, %v830_v43 }
 0x10d   :  { %v9520_v50 = vcombine.high %v819_v44, %v831_v45  ;;  %v9519_v56 = vcombine.low %v819_v44, %v831_v45 }
 0x10e   :  { %4806 = vmatpush1.bf16.msra.mxu0 %v9325_v51  ;;  %4892 = vmatpush1.bf16.msra.mxu1 %v9327_v52  ;;  %v842_v51 = vld [vmem:[#allocation7 + $0x15c0] sm:$0xff] }
 0x10f   :  { %4807 = vmatprep.subr.bf16.mxu0 %v9350_v53  ;;  %4893 = vmatprep.subr.bf16.mxu1 %v9352_v54  ;;  %v854_v52 = vld [vmem:[#allocation7 + $0x1620] sm:$0xff]  ;;  %v843_v53 = vld [vmem:[#allocation7 + $0x15c8] sm:$0xff] }
 0x110   :  { %v855_v54 = vld [vmem:[#allocation7 + $0x1628] sm:$0xff]  ;;  %v9542_v57 = vcombine.high %v842_v51, %v854_v52  ;;  %v9541_v5 = vcombine.low %v842_v51, %v854_v52 }
 0x111   :  { %v9544_v58 = vcombine.high %v843_v53, %v855_v54  ;;  %v9543_v6 = vcombine.low %v843_v53, %v855_v54 }
 0x112   :  { %4808 = vmatpush1.bf16.msra.mxu0 %v9349_v59  ;;  %4894 = vmatpush1.bf16.msra.mxu1 %v9351_v60  ;;  %v866_v59 = vld [vmem:[#allocation7 + $0x1680] sm:$0xff] }
 0x113   :  { %4809 = vmatprep.subr.bf16.mxu0 %v9374_v61  ;;  %4895 = vmatprep.subr.bf16.mxu1 %v9376_v1  ;;  %v878_v60 = vld [vmem:[#allocation7 + $0x16e0] sm:$0xff]  ;;  %v867_v61 = vld [vmem:[#allocation7 + $0x1688] sm:$0xff] }
 0x114   :  { %v879_v1 = vld [vmem:[#allocation7 + $0x16e8] sm:$0xff]  ;;  %v9566_v7 = vcombine.high %v866_v59, %v878_v60  ;;  %v9565_v14 = vcombine.low %v866_v59, %v878_v60 }
 0x115   :  { %v9568_v8 = vcombine.high %v867_v61, %v879_v1  ;;  %v9567_v15 = vcombine.low %v867_v61, %v879_v1 }
 0x116   :  { %4810 = vmatpush1.bf16.msra.mxu0 %v9373_v9  ;;  %4896 = vmatpush1.bf16.msra.mxu1 %v9375_v49  ;;  %v890_v9 = vld [vmem:[#allocation7 + $0x1740] sm:$0xff] }
 0x117   :  { %4811 = vmatprep.subr.bf16.mxu0 %v9398_v12  ;;  %4897 = vmatprep.subr.bf16.mxu1 %v9400_v13  ;;  %v902_v49 = vld [vmem:[#allocation7 + $0x17a0] sm:$0xff]  ;;  %v891_v12 = vld [vmem:[#allocation7 + $0x1748] sm:$0xff] }
 0x118   :  { %v903_v13 = vld [vmem:[#allocation7 + $0x17a8] sm:$0xff]  ;;  %v9590_v16 = vcombine.high %v890_v9, %v902_v49  ;;  %v9589_v22 = vcombine.low %v890_v9, %v902_v49 }
 0x119   :  { %v9592_v17 = vcombine.high %v891_v12, %v903_v13  ;;  %v9591_v3 = vcombine.low %v891_v12, %v903_v13 }
 0x11a   :  { %4812 = vmatpush1.bf16.msra.mxu0 %v9397_v18  ;;  %4898 = vmatpush1.bf16.msra.mxu1 %v9399_v19  ;;  %v148_v18 = vld [vmem:[#allocation7 + $0x10] sm:$0xff] }
 0x11b   :  { %4813 = vmatprep.subr.bf16.mxu0 %v9422_v20  ;;  %4899 = vmatprep.subr.bf16.mxu1 %v9424_v21  ;;  %v160_v19 = vld [vmem:[#allocation7 + $0x70] sm:$0xff]  ;;  %v149_v20 = vld [vmem:[#allocation7 + $0x18] sm:$0xff] }
 0x11c   :  { %v161_v21 = vld [vmem:[#allocation7 + $0x78] sm:$0xff]  ;;  %v8850_v26 = vcombine.high %v148_v18, %v160_v19  ;;  %v8849_v32 = vcombine.low %v148_v18, %v160_v19 }
 0x11d   :  { %v8852_v27 = vcombine.high %v149_v20, %v161_v21  ;;  %v8851_v33 = vcombine.low %v149_v20, %v161_v21 }
 0x11e   :  { %4814 = vmatpush1.bf16.msra.mxu0 %v9421_v28  ;;  %4900 = vmatpush1.bf16.msra.mxu1 %v9423_v29  ;;  %v172_v28 = vld [vmem:[#allocation7 + $0xd0] sm:$0xff] }
 0x11f   :  { %4815 = vmatprep.subr.bf16.mxu0 %v9446_v30  ;;  %4901 = vmatprep.subr.bf16.mxu1 %v9448_v31  ;;  %v184_v29 = vld [vmem:[#allocation7 + $0x130] sm:$0xff]  ;;  %v173_v30 = vld [vmem:[#allocation7 + $0xd8] sm:$0xff] }
 0x120   :  { %v185_v31 = vld [vmem:[#allocation7 + $0x138] sm:$0xff]  ;;  %v8874_v34 = vcombine.high %v172_v28, %v184_v29  ;;  %v8873_v62 = vcombine.low %v172_v28, %v184_v29 }
 0x121   :  { %v8876_v35 = vcombine.high %v173_v30, %v185_v31  ;;  %v8875_v63 = vcombine.low %v173_v30, %v185_v31 }
 0x122   :  { %4816 = vmatpush1.bf16.msra.mxu0 %v9445_v36  ;;  %4902 = vmatpush1.bf16.msra.mxu1 %v9447_v37  ;;  %v196_v36 = vld [vmem:[#allocation7 + $0x190] sm:$0xff] }
 0x123   :  { %4817 = vmatprep.subr.bf16.mxu0 %v9470_v38  ;;  %4903 = vmatprep.subr.bf16.mxu1 %v9472_v39  ;;  %v208_v37 = vld [vmem:[#allocation7 + $0x1f0] sm:$0xff]  ;;  %v197_v38 = vld [vmem:[#allocation7 + $0x198] sm:$0xff] }
 0x124   :  { %v209_v39 = vld [vmem:[#allocation7 + $0x1f8] sm:$0xff]  ;;  %v8898_v0 = vcombine.high %v196_v36, %v208_v37  ;;  %v8897_v42 = vcombine.low %v196_v36, %v208_v37 }
 0x125   :  { %v8900_v2 = vcombine.high %v197_v38, %v209_v39  ;;  %v8899_v43 = vcombine.low %v197_v38, %v209_v39 }
 0x126   :  { %4818 = vmatpush1.bf16.msra.mxu0 %v9469_v10  ;;  %4904 = vmatpush1.bf16.msra.mxu1 %v9471_v11  ;;  %v220_v10 = vld [vmem:[#allocation7 + $0x250] sm:$0xff] }
 0x127   :  { %4819 = vmatprep.subr.bf16.mxu0 %v9494_v40  ;;  %4905 = vmatprep.subr.bf16.mxu1 %v9496_v41  ;;  %v232_v11 = vld [vmem:[#allocation7 + $0x2b0] sm:$0xff]  ;;  %v221_v40 = vld [vmem:[#allocation7 + $0x258] sm:$0xff] }
 0x128   :  { %v233_v41 = vld [vmem:[#allocation7 + $0x2b8] sm:$0xff]  ;;  %v8922_v44 = vcombine.high %v220_v10, %v232_v11  ;;  %v8921_v51 = vcombine.low %v220_v10, %v232_v11 }
 0x129   :  { %v8924_v45 = vcombine.high %v221_v40, %v233_v41  ;;  %v8923_v52 = vcombine.low %v221_v40, %v233_v41 }
 0x12a   :  { %4820 = vmatpush1.bf16.msra.mxu0 %v9493_v46  ;;  %4906 = vmatpush1.bf16.msra.mxu1 %v9495_v47  ;;  %v244_v46 = vld [vmem:[#allocation7 + $0x310] sm:$0xff] }
 0x12b   :  { %4821 = vmatprep.subr.bf16.mxu0 %v9518_v48  ;;  %4907 = vmatprep.subr.bf16.mxu1 %v9520_v50  ;;  %v256_v47 = vld [vmem:[#allocation7 + $0x370] sm:$0xff]  ;;  %v245_v48 = vld [vmem:[#allocation7 + $0x318] sm:$0xff] }
 0x12c   :  { %v257_v50 = vld [vmem:[#allocation7 + $0x378] sm:$0xff]  ;;  %v8946_v53 = vcombine.high %v244_v46, %v256_v47  ;;  %v8945_v59 = vcombine.low %v244_v46, %v256_v47 }
 0x12d   :  { %v8948_v54 = vcombine.high %v245_v48, %v257_v50  ;;  %v8947_v60 = vcombine.low %v245_v48, %v257_v50 }
 0x12e   :  { %4822 = vmatpush1.bf16.msra.mxu0 %v9517_v55  ;;  %4908 = vmatpush1.bf16.msra.mxu1 %v9519_v56  ;;  %v268_v55 = vld [vmem:[#allocation7 + $0x3d0] sm:$0xff] }
 0x12f   :  { %4823 = vmatprep.subr.bf16.mxu0 %v9542_v57  ;;  %4909 = vmatprep.subr.bf16.mxu1 %v9544_v58  ;;  %v280_v56 = vld [vmem:[#allocation7 + $0x430] sm:$0xff]  ;;  %v269_v57 = vld [vmem:[#allocation7 + $0x3d8] sm:$0xff] }
 0x130   :  { %v281_v58 = vld [vmem:[#allocation7 + $0x438] sm:$0xff]  ;;  %v8970_v61 = vcombine.high %v268_v55, %v280_v56  ;;  %v8969_v9 = vcombine.low %v268_v55, %v280_v56 }
 0x131   :  { %v8972_v1 = vcombine.high %v269_v57, %v281_v58  ;;  %v8971_v49 = vcombine.low %v269_v57, %v281_v58 }
 0x132   :  { %4824 = vmatpush1.bf16.msra.mxu0 %v9541_v5  ;;  %4910 = vmatpush1.bf16.msra.mxu1 %v9543_v6  ;;  %v292_v5 = vld [vmem:[#allocation7 + $0x490] sm:$0xff] }
 0x133   :  { %4825 = vmatprep.subr.bf16.mxu0 %v9566_v7  ;;  %4911 = vmatprep.subr.bf16.mxu1 %v9568_v8  ;;  %v304_v6 = vld [vmem:[#allocation7 + $0x4f0] sm:$0xff]  ;;  %v293_v7 = vld [vmem:[#allocation7 + $0x498] sm:$0xff] }
 0x134   :  { %v305_v8 = vld [vmem:[#allocation7 + $0x4f8] sm:$0xff]  ;;  %v8994_v12 = vcombine.high %v292_v5, %v304_v6  ;;  %v8993_v18 = vcombine.low %v292_v5, %v304_v6 }
 0x135   :  { %v8996_v13 = vcombine.high %v293_v7, %v305_v8  ;;  %v8995_v19 = vcombine.low %v293_v7, %v305_v8 }
 0x136   :  { %4826 = vmatpush1.bf16.msra.mxu0 %v9565_v14  ;;  %4912 = vmatpush1.bf16.msra.mxu1 %v9567_v15  ;;  %v316_v14 = vld [vmem:[#allocation7 + $0x550] sm:$0xff] }
 0x137   :  { %4827 = vmatprep.subr.bf16.mxu0 %v9590_v16  ;;  %4913 = vmatprep.subr.bf16.mxu1 %v9592_v17  ;;  %v328_v15 = vld [vmem:[#allocation7 + $0x5b0] sm:$0xff]  ;;  %v317_v16 = vld [vmem:[#allocation7 + $0x558] sm:$0xff] }
 0x138   :  { %v329_v17 = vld [vmem:[#allocation7 + $0x5b8] sm:$0xff]  ;;  %v9018_v20 = vcombine.high %v316_v14, %v328_v15  ;;  %v9017_v28 = vcombine.low %v316_v14, %v328_v15 }
 0x139   :  { %v9020_v21 = vcombine.high %v317_v16, %v329_v17  ;;  %v9019_v29 = vcombine.low %v317_v16, %v329_v17 }
 0x13a   :  { %4828 = vmatpush1.bf16.msra.mxu0 %v9589_v22  ;;  %4914 = vmatpush1.bf16.msra.mxu1 %v9591_v3  ;;  %v340_v22 = vld [vmem:[#allocation7 + $0x610] sm:$0xff] }
 0x13b   :  { %4926 = vmatprep.subr.bf16.mxu0 %v8850_v26  ;;  %5012 = vmatprep.subr.bf16.mxu1 %v8852_v27  ;;  %v352_v3 = vld [vmem:[#allocation7 + $0x670] sm:$0xff]  ;;  %v341_v26 = vld [vmem:[#allocation7 + $0x618] sm:$0xff] }
 0x13c   :  { %v353_v27 = vld [vmem:[#allocation7 + $0x678] sm:$0xff]  ;;  %v9042_v30 = vcombine.high %v340_v22, %v352_v3  ;;  %v9041_v36 = vcombine.low %v340_v22, %v352_v3 }
 0x13d   :  { %4830 = vmatmul.mubr.bf16.vlgmr.msra.gmra.mrb[0].mxu0 %v11060_v25  ;;  %4916 = vmatmul.mubr.bf16.vlgmr.msra.gmra.mrb[0].mxu1 %v11060_v25  ;;  %v9044_v31 = vcombine.high %v341_v26, %v353_v27  ;;  %v9043_v37 = vcombine.low %v341_v26, %v353_v27 }
 0x13e   :  { %4927 = vmatpush1.bf16.msra.mxu0 %v8849_v32  ;;  %4958 = vmatprep.mubr.bf16.mxu0 %v11058_v24  ;;  %v364_v32 = vld [vmem:[#allocation7 + $0x6d0] sm:$0xff] }
 0x13f   :  { %5013 = vmatpush1.bf16.msra.mxu1 %v8851_v33  ;;  %5044 = vmatprep.mubr.bf16.mxu1 %v11058_v24  ;;  %v376_v33 = vld [vmem:[#allocation7 + $0x730] sm:$0xff] }
 0x140   :  { %4928 = vmatprep.subr.bf16.mxu0 %v8874_v34  ;;  %5014 = vmatprep.subr.bf16.mxu1 %v8876_v35  ;;  %v365_v34 = vld [vmem:[#allocation7 + $0x6d8] sm:$0xff]  ;;  %v9066_v38 = vcombine.high %v364_v32, %v376_v33  ;;  %v9065_v10 = vcombine.low %v364_v32, %v376_v33 }
 0x141   :  { %v377_v35 = vld [vmem:[#allocation7 + $0x738] sm:$0xff] }
 0x142   :  { %4929 = vmatpush1.bf16.msra.mxu0 %v8873_v62  ;;  %v9068_v39 = vcombine.high %v365_v34, %v377_v35  ;;  %v388_v62 = vld [vmem:[#allocation7 + $0x790] sm:$0xff]  ;;  %v9067_v11 = vcombine.low %v365_v34, %v377_v35 }
 0x143   :  { %5015 = vmatpush1.bf16.msra.mxu1 %v8875_v63  ;;  %4930 = vmatprep.subr.bf16.mxu0 %v8898_v0  ;;  %v400_v63 = vld [vmem:[#allocation7 + $0x7f0] sm:$0xff]  ;;  %v389_v0 = vld [vmem:[#allocation7 + $0x798] sm:$0xff] }
 0x144   :  { %5016 = vmatprep.subr.bf16.mxu1 %v8900_v2  ;;  %v401_v2 = vld [vmem:[#allocation7 + $0x7f8] sm:$0xff]  ;;  %v9090_v40 = vcombine.high %v388_v62, %v400_v63  ;;  %v9089_v46 = vcombine.low %v388_v62, %v400_v63 }
 0x145   :  { %v9092_v41 = vcombine.high %v389_v0, %v401_v2  ;;  %v9091_v47 = vcombine.low %v389_v0, %v401_v2  ;;  %v569_v62 = vld [vmem:[#allocation7 + $0xd38] sm:$0xff]  ;;  %v580_v2 = vld [vmem:[#allocation7 + $0xd90] sm:$0xff] }
 0x146   :  { %4931 = vmatpush1.bf16.msra.mxu0 %v8897_v42  ;;  %v412_v42 = vld [vmem:[#allocation7 + $0x850] sm:$0xff] }
 0x147   :  { %5017 = vmatpush1.bf16.msra.mxu1 %v8899_v43  ;;  %4932 = vmatprep.subr.bf16.mxu0 %v8922_v44  ;;  %v424_v43 = vld [vmem:[#allocation7 + $0x8b0] sm:$0xff]  ;;  %v413_v44 = vld [vmem:[#allocation7 + $0x858] sm:$0xff] }
 0x148   :  { %5018 = vmatprep.subr.bf16.mxu1 %v8924_v45  ;;  %v425_v45 = vld [vmem:[#allocation7 + $0x8b8] sm:$0xff]  ;;  %v9114_v48 = vcombine.high %v412_v42, %v424_v43  ;;  %v9113_v55 = vcombine.low %v412_v42, %v424_v43 }
 0x149   :  { %v9116_v50 = vcombine.high %v413_v44, %v425_v45  ;;  %v9115_v56 = vcombine.low %v413_v44, %v425_v45 }
 0x14a   :  { %4933 = vmatpush1.bf16.msra.mxu0 %v8921_v51  ;;  %v436_v51 = vld [vmem:[#allocation7 + $0x910] sm:$0xff] }
 0x14b   :  { %5019 = vmatpush1.bf16.msra.mxu1 %v8923_v52  ;;  %4934 = vmatprep.subr.bf16.mxu0 %v8946_v53  ;;  %v448_v52 = vld [vmem:[#allocation7 + $0x970] sm:$0xff]  ;;  %v437_v53 = vld [vmem:[#allocation7 + $0x918] sm:$0xff] }
 0x14c   :  { %5020 = vmatprep.subr.bf16.mxu1 %v8948_v54  ;;  %v449_v54 = vld [vmem:[#allocation7 + $0x978] sm:$0xff]  ;;  %v9138_v57 = vcombine.high %v436_v51, %v448_v52  ;;  %v9137_v5 = vcombine.low %v436_v51, %v448_v52 }
 0x14d   :  { %v9140_v58 = vcombine.high %v437_v53, %v449_v54  ;;  %v9139_v6 = vcombine.low %v437_v53, %v449_v54 }
 0x14e   :  { %4935 = vmatpush1.bf16.msra.mxu0 %v8945_v59  ;;  %v460_v59 = vld [vmem:[#allocation7 + $0x9d0] sm:$0xff] }
 0x14f   :  { %5021 = vmatpush1.bf16.msra.mxu1 %v8947_v60  ;;  %4936 = vmatprep.subr.bf16.mxu0 %v8970_v61  ;;  %v472_v60 = vld [vmem:[#allocation7 + $0xa30] sm:$0xff]  ;;  %v461_v61 = vld [vmem:[#allocation7 + $0x9d8] sm:$0xff] }
 0x150   :  { %5022 = vmatprep.subr.bf16.mxu1 %v8972_v1  ;;  %v473_v1 = vld [vmem:[#allocation7 + $0xa38] sm:$0xff]  ;;  %v9162_v7 = vcombine.high %v460_v59, %v472_v60  ;;  %v9161_v14 = vcombine.low %v460_v59, %v472_v60 }
 0x151   :  { %v9164_v8 = vcombine.high %v461_v61, %v473_v1  ;;  %v9163_v15 = vcombine.low %v461_v61, %v473_v1 }
 0x152   :  { %4937 = vmatpush1.bf16.msra.mxu0 %v8969_v9  ;;  %v484_v9 = vld [vmem:[#allocation7 + $0xa90] sm:$0xff] }
 0x153   :  { %5023 = vmatpush1.bf16.msra.mxu1 %v8971_v49  ;;  %4938 = vmatprep.subr.bf16.mxu0 %v8994_v12  ;;  %v496_v49 = vld [vmem:[#allocation7 + $0xaf0] sm:$0xff]  ;;  %v485_v12 = vld [vmem:[#allocation7 + $0xa98] sm:$0xff] }
 0x154   :  { %5024 = vmatprep.subr.bf16.mxu1 %v8996_v13  ;;  %v497_v13 = vld [vmem:[#allocation7 + $0xaf8] sm:$0xff]  ;;  %v9186_v16 = vcombine.high %v484_v9, %v496_v49  ;;  %v9185_v22 = vcombine.low %v484_v9, %v496_v49 }
 0x155   :  { %v9188_v17 = vcombine.high %v485_v12, %v497_v13  ;;  %v9187_v3 = vcombine.low %v485_v12, %v497_v13 }
 0x156   :  { %4939 = vmatpush1.bf16.msra.mxu0 %v8993_v18  ;;  %v508_v18 = vld [vmem:[#allocation7 + $0xb50] sm:$0xff] }
 0x157   :  { %5025 = vmatpush1.bf16.msra.mxu1 %v8995_v19  ;;  %4940 = vmatprep.subr.bf16.mxu0 %v9018_v20  ;;  %v520_v19 = vld [vmem:[#allocation7 + $0xbb0] sm:$0xff]  ;;  %v509_v20 = vld [vmem:[#allocation7 + $0xb58] sm:$0xff] }
 0x158   :  { %5026 = vmatprep.subr.bf16.mxu1 %v9020_v21  ;;  %v521_v21 = vld [vmem:[#allocation7 + $0xbb8] sm:$0xff]  ;;  %v9210_v26 = vcombine.high %v508_v18, %v520_v19  ;;  %v9209_v32 = vcombine.low %v508_v18, %v520_v19 }
 0x159   :  { %v9212_v27 = vcombine.high %v509_v20, %v521_v21  ;;  %v9211_v33 = vcombine.low %v509_v20, %v521_v21 }
 0x15a   :  { %4941 = vmatpush1.bf16.msra.mxu0 %v9017_v28  ;;  %v532_v28 = vld [vmem:[#allocation7 + $0xc10] sm:$0xff] }
 0x15b   :  { %5027 = vmatpush1.bf16.msra.mxu1 %v9019_v29  ;;  %4942 = vmatprep.subr.bf16.mxu0 %v9042_v30  ;;  %v544_v29 = vld [vmem:[#allocation7 + $0xc70] sm:$0xff]  ;;  %v533_v30 = vld [vmem:[#allocation7 + $0xc18] sm:$0xff] }
 0x15c   :  { %5028 = vmatprep.subr.bf16.mxu1 %v9044_v31  ;;  %v545_v31 = vld [vmem:[#allocation7 + $0xc78] sm:$0xff]  ;;  %v9234_v34 = vcombine.high %v532_v28, %v544_v29 }
 0x15d   :  { %v9236_v35 = vcombine.high %v533_v30, %v545_v31  ;;  %v9235_v63 = vcombine.low %v533_v30, %v545_v31 }
 0x15e   :  { %4943 = vmatpush1.bf16.msra.mxu0 %v9041_v36  ;;  %v556_v36 = vld [vmem:[#allocation7 + $0xcd0] sm:$0xff] }
 0x15f   :  { %5029 = vmatpush1.bf16.msra.mxu1 %v9043_v37  ;;  %4944 = vmatprep.subr.bf16.mxu0 %v9066_v38  ;;  %v568_v37 = vld [vmem:[#allocation7 + $0xd30] sm:$0xff]  ;;  %v9233_v38 = vcombine.low %v532_v28, %v544_v29 }
 0x160   :  { %5030 = vmatprep.subr.bf16.mxu1 %v9068_v39  ;;  %v557_v39 = vld [vmem:[#allocation7 + $0xcd8] sm:$0xff]  ;;  %v9258_v0 = vcombine.high %v556_v36, %v568_v37  ;;  %v9257_v42 = vcombine.low %v556_v36, %v568_v37 }
 0x161   :  { %v9259_v43 = vcombine.low %v557_v39, %v569_v62 }
 0x162   :  { %4945 = vmatpush1.bf16.msra.mxu0 %v9065_v10  ;;  %v592_v10 = vld [vmem:[#allocation7 + $0xdf0] sm:$0xff] }
 0x163   :  { %5031 = vmatpush1.bf16.msra.mxu1 %v9067_v11  ;;  %4946 = vmatprep.subr.bf16.mxu0 %v9090_v40  ;;  %v9260_v11 = vcombine.high %v557_v39, %v569_v62  ;;  %v581_v40 = vld [vmem:[#allocation7 + $0xd98] sm:$0xff]  ;;  %v9282_v44 = vcombine.high %v580_v2, %v592_v10  ;;  %v9281_v51 = vcombine.low %v580_v2, %v592_v10  ;;  %v748_v62 = vld [vmem:[#allocation7 + $0x12d0] sm:$0xff] }
 0x164   :  { %5032 = vmatprep.subr.bf16.mxu1 %v9092_v41  ;;  %v593_v41 = vld [vmem:[#allocation7 + $0xdf8] sm:$0xff] }
 0x165   :  { %v9284_v45 = vcombine.high %v581_v40, %v593_v41  ;;  %v9283_v52 = vcombine.low %v581_v40, %v593_v41  ;;  %v761_v2 = vld [vmem:[#allocation7 + $0x1338] sm:$0xff] }
 0x166   :  { %4947 = vmatpush1.bf16.msra.mxu0 %v9089_v46  ;;  %v604_v46 = vld [vmem:[#allocation7 + $0xe50] sm:$0xff] }
 0x167   :  { %5033 = vmatpush1.bf16.msra.mxu1 %v9091_v47  ;;  %4948 = vmatprep.subr.bf16.mxu0 %v9114_v48  ;;  %v616_v47 = vld [vmem:[#allocation7 + $0xeb0] sm:$0xff]  ;;  %v605_v48 = vld [vmem:[#allocation7 + $0xe58] sm:$0xff] }
 0x168   :  { %5034 = vmatprep.subr.bf16.mxu1 %v9116_v50  ;;  %v617_v50 = vld [vmem:[#allocation7 + $0xeb8] sm:$0xff]  ;;  %v9306_v53 = vcombine.high %v604_v46, %v616_v47  ;;  %v9305_v59 = vcombine.low %v604_v46, %v616_v47 }
 0x169   :  { %v9308_v54 = vcombine.high %v605_v48, %v617_v50  ;;  %v9307_v60 = vcombine.low %v605_v48, %v617_v50 }
 0x16a   :  { %4949 = vmatpush1.bf16.msra.mxu0 %v9113_v55  ;;  %v628_v55 = vld [vmem:[#allocation7 + $0xf10] sm:$0xff] }
 0x16b   :  { %5035 = vmatpush1.bf16.msra.mxu1 %v9115_v56  ;;  %4950 = vmatprep.subr.bf16.mxu0 %v9138_v57  ;;  %v640_v56 = vld [vmem:[#allocation7 + $0xf70] sm:$0xff]  ;;  %v629_v57 = vld [vmem:[#allocation7 + $0xf18] sm:$0xff] }
 0x16c   :  { %5036 = vmatprep.subr.bf16.mxu1 %v9140_v58  ;;  %v641_v58 = vld [vmem:[#allocation7 + $0xf78] sm:$0xff]  ;;  %v9330_v61 = vcombine.high %v628_v55, %v640_v56  ;;  %v9329_v9 = vcombine.low %v628_v55, %v640_v56 }
 0x16d   :  { %v9332_v1 = vcombine.high %v629_v57, %v641_v58  ;;  %v9331_v49 = vcombine.low %v629_v57, %v641_v58 }
 0x16e   :  { %4951 = vmatpush1.bf16.msra.mxu0 %v9137_v5  ;;  %v652_v5 = vld [vmem:[#allocation7 + $0xfd0] sm:$0xff] }
 0x16f   :  { %5037 = vmatpush1.bf16.msra.mxu1 %v9139_v6  ;;  %4952 = vmatprep.subr.bf16.mxu0 %v9162_v7  ;;  %v664_v6 = vld [vmem:[#allocation7 + $0x1030] sm:$0xff]  ;;  %v653_v7 = vld [vmem:[#allocation7 + $0xfd8] sm:$0xff] }
 0x170   :  { %5038 = vmatprep.subr.bf16.mxu1 %v9164_v8  ;;  %v665_v8 = vld [vmem:[#allocation7 + $0x1038] sm:$0xff]  ;;  %v9354_v12 = vcombine.high %v652_v5, %v664_v6  ;;  %v9353_v18 = vcombine.low %v652_v5, %v664_v6 }
 0x171   :  { %v9356_v13 = vcombine.high %v653_v7, %v665_v8  ;;  %v9355_v19 = vcombine.low %v653_v7, %v665_v8 }
 0x172   :  { %4953 = vmatpush1.bf16.msra.mxu0 %v9161_v14  ;;  %v676_v14 = vld [vmem:[#allocation7 + $0x1090] sm:$0xff] }
 0x173   :  { %5039 = vmatpush1.bf16.msra.mxu1 %v9163_v15  ;;  %4954 = vmatprep.subr.bf16.mxu0 %v9186_v16  ;;  %v688_v15 = vld [vmem:[#allocation7 + $0x10f0] sm:$0xff]  ;;  %v677_v16 = vld [vmem:[#allocation7 + $0x1098] sm:$0xff] }
 0x174   :  { %5040 = vmatprep.subr.bf16.mxu1 %v9188_v17  ;;  %v689_v17 = vld [vmem:[#allocation7 + $0x10f8] sm:$0xff]  ;;  %v9378_v20 = vcombine.high %v676_v14, %v688_v15  ;;  %v9377_v28 = vcombine.low %v676_v14, %v688_v15 }
 0x175   :  { %v9380_v21 = vcombine.high %v677_v16, %v689_v17  ;;  %v9379_v29 = vcombine.low %v677_v16, %v689_v17 }
 0x176   :  { %4955 = vmatpush1.bf16.msra.mxu0 %v9185_v22  ;;  %v700_v22 = vld [vmem:[#allocation7 + $0x1150] sm:$0xff] }
 0x177   :  { %5041 = vmatpush1.bf16.msra.mxu1 %v9187_v3  ;;  %4956 = vmatprep.subr.bf16.mxu0 %v9210_v26  ;;  %v712_v3 = vld [vmem:[#allocation7 + $0x11b0] sm:$0xff]  ;;  %v701_v26 = vld [vmem:[#allocation7 + $0x1158] sm:$0xff] }
 0x178   :  { %5042 = vmatprep.subr.bf16.mxu1 %v9212_v27  ;;  %v713_v27 = vld [vmem:[#allocation7 + $0x11b8] sm:$0xff]  ;;  %v9402_v30 = vcombine.high %v700_v22, %v712_v3  ;;  %v9401_v36 = vcombine.low %v700_v22, %v712_v3 }
 0x179   :  { %v9404_v31 = vcombine.high %v701_v26, %v713_v27  ;;  %v9403_v37 = vcombine.low %v701_v26, %v713_v27 }
 0x17a   :  { %4957 = vmatpush1.bf16.msra.mxu0 %v9209_v32  ;;  %v724_v32 = vld [vmem:[#allocation7 + $0x1210] sm:$0xff] }
 0x17b   :  { %5043 = vmatpush1.bf16.msra.mxu1 %v9211_v33  ;;  %4969 = vmatprep.subr.bf16.mxu0 %v9234_v34  ;;  %v736_v33 = vld [vmem:[#allocation7 + $0x1270] sm:$0xff]  ;;  %v725_v34 = vld [vmem:[#allocation7 + $0x1218] sm:$0xff] }
 0x17c   :  { %5055 = vmatprep.subr.bf16.mxu1 %v9236_v35  ;;  %v737_v35 = vld [vmem:[#allocation7 + $0x1278] sm:$0xff]  ;;  %v9425_v10 = vcombine.low %v724_v32, %v736_v33 }
 0x17d   :  { %4959 = vmatmul.mubr.bf16.vlgmr.msra.gmra.mrb[4].mxu0 %v11056_v23  ;;  %v9428_v39 = vcombine.high %v725_v34, %v737_v35 }
 0x17e   :  { %5045 = vmatmul.mubr.bf16.vlgmr.msra.gmra.mrb[4].mxu1 %v11056_v23  ;;  %4970 = vmatpush1.bf16.msra.mxu0 %v9233_v38  ;;  %v9426_v38 = vcombine.high %v724_v32, %v736_v33 }
 0x17f   :  { %5001 = vmatprep.mubr.bf16.mxu0 %v11064_v4  ;;  %5056 = vmatpush1.bf16.msra.mxu1 %v9235_v63  ;;  %v760_v63 = vld [vmem:[#allocation7 + $0x1330] sm:$0xff] }
 0x180   :  { %5087 = vmatprep.mubr.bf16.mxu1 %v11064_v4  ;;  %4971 = vmatprep.subr.bf16.mxu0 %v9258_v0  ;;  %v749_v0 = vld [vmem:[#allocation7 + $0x12d8] sm:$0xff]  ;;  %v9450_v40 = vcombine.high %v748_v62, %v760_v63  ;;  %v9449_v46 = vcombine.low %v748_v62, %v760_v63 }
 0x181   :  { %5057 = vmatprep.subr.bf16.mxu1 %v9260_v11  ;;  %v9427_v11 = vcombine.low %v725_v34, %v737_v35  ;;  %v9452_v41 = vcombine.high %v749_v0, %v761_v2  ;;  %v9451_v47 = vcombine.low %v749_v0, %v761_v2 }
 0x182   :  { %4972 = vmatpush1.bf16.msra.mxu0 %v9257_v42  ;;  %v772_v42 = vld [vmem:[#allocation7 + $0x1390] sm:$0xff] }
 0x183   :  { %5058 = vmatpush1.bf16.msra.mxu1 %v9259_v43  ;;  %4973 = vmatprep.subr.bf16.mxu0 %v9282_v44  ;;  %v784_v43 = vld [vmem:[#allocation7 + $0x13f0] sm:$0xff]  ;;  %v773_v44 = vld [vmem:[#allocation7 + $0x1398] sm:$0xff] }
 0x184   :  { %5059 = vmatprep.subr.bf16.mxu1 %v9284_v45  ;;  %v785_v45 = vld [vmem:[#allocation7 + $0x13f8] sm:$0xff]  ;;  %v9474_v48 = vcombine.high %v772_v42, %v784_v43  ;;  %v9473_v55 = vcombine.low %v772_v42, %v784_v43  ;;  %v187_v42 = vld [vmem:[#allocation7 + $0x148] sm:$0xff] }
 0x185   :  { %v9476_v50 = vcombine.high %v773_v44, %v785_v45  ;;  %v9475_v56 = vcombine.low %v773_v44, %v785_v45  ;;  %v198_v45 = vld [vmem:[#allocation7 + $0x1a0] sm:$0xff] }
 0x186   :  { %4974 = vmatpush1.bf16.msra.mxu0 %v9281_v51  ;;  %v796_v51 = vld [vmem:[#allocation7 + $0x1450] sm:$0xff] }
 0x187   :  { %5060 = vmatpush1.bf16.msra.mxu1 %v9283_v52  ;;  %4975 = vmatprep.subr.bf16.mxu0 %v9306_v53  ;;  %v808_v52 = vld [vmem:[#allocation7 + $0x14b0] sm:$0xff]  ;;  %v797_v53 = vld [vmem:[#allocation7 + $0x1458] sm:$0xff] }
 0x188   :  { %5061 = vmatprep.subr.bf16.mxu1 %v9308_v54  ;;  %v809_v54 = vld [vmem:[#allocation7 + $0x14b8] sm:$0xff]  ;;  %v9498_v57 = vcombine.high %v796_v51, %v808_v52  ;;  %v9497_v5 = vcombine.low %v796_v51, %v808_v52 }
 0x189   :  { %v9500_v58 = vcombine.high %v797_v53, %v809_v54  ;;  %v9499_v6 = vcombine.low %v797_v53, %v809_v54 }
 0x18a   :  { %4976 = vmatpush1.bf16.msra.mxu0 %v9305_v59  ;;  %v820_v59 = vld [vmem:[#allocation7 + $0x1510] sm:$0xff] }
 0x18b   :  { %5062 = vmatpush1.bf16.msra.mxu1 %v9307_v60  ;;  %4977 = vmatprep.subr.bf16.mxu0 %v9330_v61  ;;  %v832_v60 = vld [vmem:[#allocation7 + $0x1570] sm:$0xff]  ;;  %v821_v61 = vld [vmem:[#allocation7 + $0x1518] sm:$0xff] }
 0x18c   :  { %5063 = vmatprep.subr.bf16.mxu1 %v9332_v1  ;;  %v833_v1 = vld [vmem:[#allocation7 + $0x1578] sm:$0xff]  ;;  %v9522_v7 = vcombine.high %v820_v59, %v832_v60  ;;  %v9521_v14 = vcombine.low %v820_v59, %v832_v60 }
 0x18d   :  { %v9524_v8 = vcombine.high %v821_v61, %v833_v1  ;;  %v9523_v15 = vcombine.low %v821_v61, %v833_v1 }
 0x18e   :  { %4978 = vmatpush1.bf16.msra.mxu0 %v9329_v9  ;;  %v844_v9 = vld [vmem:[#allocation7 + $0x15d0] sm:$0xff] }
 0x18f   :  { %5064 = vmatpush1.bf16.msra.mxu1 %v9331_v49  ;;  %4979 = vmatprep.subr.bf16.mxu0 %v9354_v12  ;;  %v856_v49 = vld [vmem:[#allocation7 + $0x1630] sm:$0xff]  ;;  %v845_v12 = vld [vmem:[#allocation7 + $0x15d8] sm:$0xff] }
 0x190   :  { %5065 = vmatprep.subr.bf16.mxu1 %v9356_v13  ;;  %v857_v13 = vld [vmem:[#allocation7 + $0x1638] sm:$0xff]  ;;  %v9546_v16 = vcombine.high %v844_v9, %v856_v49  ;;  %v9545_v22 = vcombine.low %v844_v9, %v856_v49 }
 0x191   :  { %v9548_v17 = vcombine.high %v845_v12, %v857_v13  ;;  %v9547_v3 = vcombine.low %v845_v12, %v857_v13 }
 0x192   :  { %4980 = vmatpush1.bf16.msra.mxu0 %v9353_v18  ;;  %v868_v18 = vld [vmem:[#allocation7 + $0x1690] sm:$0xff] }
 0x193   :  { %5066 = vmatpush1.bf16.msra.mxu1 %v9355_v19  ;;  %4981 = vmatprep.subr.bf16.mxu0 %v9378_v20  ;;  %v880_v19 = vld [vmem:[#allocation7 + $0x16f0] sm:$0xff]  ;;  %v869_v20 = vld [vmem:[#allocation7 + $0x1698] sm:$0xff] }
 0x194   :  { %5067 = vmatprep.subr.bf16.mxu1 %v9380_v21  ;;  %v881_v21 = vld [vmem:[#allocation7 + $0x16f8] sm:$0xff]  ;;  %v9570_v26 = vcombine.high %v868_v18, %v880_v19  ;;  %v9569_v32 = vcombine.low %v868_v18, %v880_v19 }
 0x195   :  { %v9572_v27 = vcombine.high %v869_v20, %v881_v21  ;;  %v9571_v33 = vcombine.low %v869_v20, %v881_v21 }
 0x196   :  { %4982 = vmatpush1.bf16.msra.mxu0 %v9377_v28  ;;  %v892_v28 = vld [vmem:[#allocation7 + $0x1750] sm:$0xff] }
 0x197   :  { %5068 = vmatpush1.bf16.msra.mxu1 %v9379_v29  ;;  %4983 = vmatprep.subr.bf16.mxu0 %v9402_v30  ;;  %v904_v29 = vld [vmem:[#allocation7 + $0x17b0] sm:$0xff]  ;;  %v893_v30 = vld [vmem:[#allocation7 + $0x1758] sm:$0xff] }
 0x198   :  { %5069 = vmatprep.subr.bf16.mxu1 %v9404_v31  ;;  %v905_v31 = vld [vmem:[#allocation7 + $0x17b8] sm:$0xff]  ;;  %v9594_v34 = vcombine.high %v892_v28, %v904_v29  ;;  %v9593_v62 = vcombine.low %v892_v28, %v904_v29 }
 0x199   :  { %v9596_v35 = vcombine.high %v893_v30, %v905_v31  ;;  %v9595_v63 = vcombine.low %v893_v30, %v905_v31 }
 0x19a   :  { %4984 = vmatpush1.bf16.msra.mxu0 %v9401_v36  ;;  %v150_v36 = vld [vmem:[#allocation7 + $0x20] sm:$0xff] }
 0x19b   :  { %5070 = vmatpush1.bf16.msra.mxu1 %v9403_v37  ;;  %4985 = vmatprep.subr.bf16.mxu0 %v9426_v38  ;;  %v162_v37 = vld [vmem:[#allocation7 + $0x80] sm:$0xff]  ;;  %v151_v38 = vld [vmem:[#allocation7 + $0x28] sm:$0xff] }
 0x19c   :  { %5071 = vmatprep.subr.bf16.mxu1 %v9428_v39  ;;  %v163_v39 = vld [vmem:[#allocation7 + $0x88] sm:$0xff]  ;;  %v8854_v0 = vcombine.high %v150_v36, %v162_v37 }
 0x19d   :  { %v8856_v2 = vcombine.high %v151_v38, %v163_v39  ;;  %v8855_v43 = vcombine.low %v151_v38, %v163_v39 }
 0x19e   :  { %4986 = vmatpush1.bf16.msra.mxu0 %v9425_v10  ;;  %v174_v10 = vld [vmem:[#allocation7 + $0xe0] sm:$0xff] }
 0x19f   :  { %5072 = vmatpush1.bf16.msra.mxu1 %v9427_v11  ;;  %4987 = vmatprep.subr.bf16.mxu0 %v9450_v40  ;;  %v186_v11 = vld [vmem:[#allocation7 + $0x140] sm:$0xff]  ;;  %v8853_v40 = vcombine.low %v150_v36, %v162_v37 }
 0x1a0   :  { %5073 = vmatprep.subr.bf16.mxu1 %v9452_v41  ;;  %v175_v41 = vld [vmem:[#allocation7 + $0xe8] sm:$0xff]  ;;  %v8878_v44 = vcombine.high %v174_v10, %v186_v11  ;;  %v8877_v51 = vcombine.low %v174_v10, %v186_v11 }
 0x1a1   :  { %v8879_v52 = vcombine.low %v175_v41, %v187_v42 }
 0x1a2   :  { %4988 = vmatpush1.bf16.msra.mxu0 %v9449_v46  ;;  %v210_v46 = vld [vmem:[#allocation7 + $0x200] sm:$0xff] }
 0x1a3   :  { %5074 = vmatpush1.bf16.msra.mxu1 %v9451_v47  ;;  %4989 = vmatprep.subr.bf16.mxu0 %v9474_v48  ;;  %v8880_v47 = vcombine.high %v175_v41, %v187_v42  ;;  %v199_v48 = vld [vmem:[#allocation7 + $0x1a8] sm:$0xff]  ;;  %v8902_v53 = vcombine.high %v198_v45, %v210_v46  ;;  %v8901_v59 = vcombine.low %v198_v45, %v210_v46  ;;  %v366_v42 = vld [vmem:[#allocation7 + $0x6e0] sm:$0xff] }
 0x1a4   :  { %5075 = vmatprep.subr.bf16.mxu1 %v9476_v50  ;;  %v211_v50 = vld [vmem:[#allocation7 + $0x208] sm:$0xff] }
 0x1a5   :  { %v8904_v54 = vcombine.high %v199_v48, %v211_v50  ;;  %v8903_v60 = vcombine.low %v199_v48, %v211_v50  ;;  %v379_v45 = vld [vmem:[#allocation7 + $0x748] sm:$0xff] }
 0x1a6   :  { %4990 = vmatpush1.bf16.msra.mxu0 %v9473_v55  ;;  %v222_v55 = vld [vmem:[#allocation7 + $0x260] sm:$0xff] }
 0x1a7   :  { %5076 = vmatpush1.bf16.msra.mxu1 %v9475_v56  ;;  %4991 = vmatprep.subr.bf16.mxu0 %v9498_v57  ;;  %v234_v56 = vld [vmem:[#allocation7 + $0x2c0] sm:$0xff]  ;;  %v223_v57 = vld [vmem:[#allocation7 + $0x268] sm:$0xff] }
 0x1a8   :  { %5077 = vmatprep.subr.bf16.mxu1 %v9500_v58  ;;  %v235_v58 = vld [vmem:[#allocation7 + $0x2c8] sm:$0xff]  ;;  %v8926_v61 = vcombine.high %v222_v55, %v234_v56  ;;  %v8925_v9 = vcombine.low %v222_v55, %v234_v56 }
 0x1a9   :  { %v8928_v1 = vcombine.high %v223_v57, %v235_v58  ;;  %v8927_v49 = vcombine.low %v223_v57, %v235_v58 }
 0x1aa   :  { %4992 = vmatpush1.bf16.msra.mxu0 %v9497_v5  ;;  %v246_v5 = vld [vmem:[#allocation7 + $0x320] sm:$0xff] }
 0x1ab   :  { %5078 = vmatpush1.bf16.msra.mxu1 %v9499_v6  ;;  %4993 = vmatprep.subr.bf16.mxu0 %v9522_v7  ;;  %v258_v6 = vld [vmem:[#allocation7 + $0x380] sm:$0xff]  ;;  %v247_v7 = vld [vmem:[#allocation7 + $0x328] sm:$0xff] }
 0x1ac   :  { %5079 = vmatprep.subr.bf16.mxu1 %v9524_v8  ;;  %v259_v8 = vld [vmem:[#allocation7 + $0x388] sm:$0xff]  ;;  %v8950_v12 = vcombine.high %v246_v5, %v258_v6  ;;  %v8949_v18 = vcombine.low %v246_v5, %v258_v6 }
 0x1ad   :  { %v8952_v13 = vcombine.high %v247_v7, %v259_v8  ;;  %v8951_v19 = vcombine.low %v247_v7, %v259_v8 }
 0x1ae   :  { %4994 = vmatpush1.bf16.msra.mxu0 %v9521_v14  ;;  %v270_v14 = vld [vmem:[#allocation7 + $0x3e0] sm:$0xff] }
 0x1af   :  { %5080 = vmatpush1.bf16.msra.mxu1 %v9523_v15  ;;  %4995 = vmatprep.subr.bf16.mxu0 %v9546_v16  ;;  %v282_v15 = vld [vmem:[#allocation7 + $0x440] sm:$0xff]  ;;  %v271_v16 = vld [vmem:[#allocation7 + $0x3e8] sm:$0xff] }
 0x1b0   :  { %5081 = vmatprep.subr.bf16.mxu1 %v9548_v17  ;;  %v283_v17 = vld [vmem:[#allocation7 + $0x448] sm:$0xff]  ;;  %v8974_v20 = vcombine.high %v270_v14, %v282_v15  ;;  %v8973_v28 = vcombine.low %v270_v14, %v282_v15 }
 0x1b1   :  { %v8976_v21 = vcombine.high %v271_v16, %v283_v17  ;;  %v8975_v29 = vcombine.low %v271_v16, %v283_v17 }
 0x1b2   :  { %4996 = vmatpush1.bf16.msra.mxu0 %v9545_v22  ;;  %v294_v22 = vld [vmem:[#allocation7 + $0x4a0] sm:$0xff] }
 0x1b3   :  { %5082 = vmatpush1.bf16.msra.mxu1 %v9547_v3  ;;  %4997 = vmatprep.subr.bf16.mxu0 %v9570_v26  ;;  %v306_v3 = vld [vmem:[#allocation7 + $0x500] sm:$0xff]  ;;  %v295_v26 = vld [vmem:[#allocation7 + $0x4a8] sm:$0xff] }
 0x1b4   :  { %5083 = vmatprep.subr.bf16.mxu1 %v9572_v27  ;;  %v307_v27 = vld [vmem:[#allocation7 + $0x508] sm:$0xff]  ;;  %v8998_v30 = vcombine.high %v294_v22, %v306_v3  ;;  %v8997_v36 = vcombine.low %v294_v22, %v306_v3 }
 0x1b5   :  { %v9000_v31 = vcombine.high %v295_v26, %v307_v27  ;;  %v8999_v37 = vcombine.low %v295_v26, %v307_v27 }
 0x1b6   :  { %4998 = vmatpush1.bf16.msra.mxu0 %v9569_v32  ;;  %v318_v32 = vld [vmem:[#allocation7 + $0x560] sm:$0xff] }
 0x1b7   :  { %5084 = vmatpush1.bf16.msra.mxu1 %v9571_v33  ;;  %4999 = vmatprep.subr.bf16.mxu0 %v9594_v34  ;;  %v330_v33 = vld [vmem:[#allocation7 + $0x5c0] sm:$0xff]  ;;  %v319_v34 = vld [vmem:[#allocation7 + $0x568] sm:$0xff] }
 0x1b8   :  { %5085 = vmatprep.subr.bf16.mxu1 %v9596_v35  ;;  %v331_v35 = vld [vmem:[#allocation7 + $0x5c8] sm:$0xff]  ;;  %v9022_v38 = vcombine.high %v318_v32, %v330_v33  ;;  %v9021_v10 = vcombine.low %v318_v32, %v330_v33 }
 0x1b9   :  { %v9024_v39 = vcombine.high %v319_v34, %v331_v35  ;;  %v9023_v11 = vcombine.low %v319_v34, %v331_v35 }
 0x1ba   :  { %5000 = vmatpush1.bf16.msra.mxu0 %v9593_v62  ;;  %v342_v62 = vld [vmem:[#allocation7 + $0x620] sm:$0xff] }
 0x1bb   :  { %5086 = vmatpush1.bf16.msra.mxu1 %v9595_v63  ;;  %5098 = vmatprep.subr.bf16.mxu0 %v8854_v0  ;;  %v354_v63 = vld [vmem:[#allocation7 + $0x680] sm:$0xff]  ;;  %v343_v0 = vld [vmem:[#allocation7 + $0x628] sm:$0xff] }
 0x1bc   :  { %5184 = vmatprep.subr.bf16.mxu1 %v8856_v2  ;;  %v355_v2 = vld [vmem:[#allocation7 + $0x688] sm:$0xff]  ;;  %v9045_v46 = vcombine.low %v342_v62, %v354_v63 }
 0x1bd   :  { %5002 = vmatmul.mubr.bf16.vlgmr.msra.gmra.mrb[4].mxu0 %v11060_v25  ;;  %v9048_v41 = vcombine.high %v343_v0, %v355_v2 }
 0x1be   :  { %5088 = vmatmul.mubr.bf16.vlgmr.msra.gmra.mrb[4].mxu1 %v11060_v25  ;;  %5099 = vmatpush1.bf16.msra.mxu0 %v8853_v40  ;;  %v9046_v40 = vcombine.high %v342_v62, %v354_v63 }
 0x1bf   :  { %5130 = vmatprep.mubr.bf16.mxu0 %v11058_v24  ;;  %5185 = vmatpush1.bf16.msra.mxu1 %v8855_v43  ;;  %v378_v43 = vld [vmem:[#allocation7 + $0x740] sm:$0xff] }
 0x1c0   :  { %5216 = vmatprep.mubr.bf16.mxu1 %v11058_v24  ;;  %5100 = vmatprep.subr.bf16.mxu0 %v8878_v44  ;;  %v367_v44 = vld [vmem:[#allocation7 + $0x6e8] sm:$0xff]  ;;  %v9070_v48 = vcombine.high %v366_v42, %v378_v43  ;;  %v9069_v55 = vcombine.low %v366_v42, %v378_v43 }
 0x1c1   :  { %5186 = vmatprep.subr.bf16.mxu1 %v8880_v47  ;;  %v9047_v47 = vcombine.low %v343_v0, %v355_v2  ;;  %v9072_v50 = vcombine.high %v367_v44, %v379_v45  ;;  %v9071_v56 = vcombine.low %v367_v44, %v379_v45 }
 0x1c2   :  { %5101 = vmatpush1.bf16.msra.mxu0 %v8877_v51  ;;  %v390_v51 = vld [vmem:[#allocation7 + $0x7a0] sm:$0xff] }
 0x1c3   :  { %5187 = vmatpush1.bf16.msra.mxu1 %v8879_v52  ;;  %5102 = vmatprep.subr.bf16.mxu0 %v8902_v53  ;;  %v402_v52 = vld [vmem:[#allocation7 + $0x800] sm:$0xff]  ;;  %v391_v53 = vld [vmem:[#allocation7 + $0x7a8] sm:$0xff] }
 0x1c4   :  { %5188 = vmatprep.subr.bf16.mxu1 %v8904_v54  ;;  %v403_v54 = vld [vmem:[#allocation7 + $0x808] sm:$0xff]  ;;  %v9094_v57 = vcombine.high %v390_v51, %v402_v52  ;;  %v9093_v5 = vcombine.low %v390_v51, %v402_v52 }
 0x1c5   :  { %v9096_v58 = vcombine.high %v391_v53, %v403_v54  ;;  %v9095_v6 = vcombine.low %v391_v53, %v403_v54  ;;  %v571_v51 = vld [vmem:[#allocation7 + $0xd48] sm:$0xff]  ;;  %v582_v54 = vld [vmem:[#allocation7 + $0xda0] sm:$0xff] }
 0x1c6   :  { %5103 = vmatpush1.bf16.msra.mxu0 %v8901_v59  ;;  %v414_v59 = vld [vmem:[#allocation7 + $0x860] sm:$0xff] }
 0x1c7   :  { %5189 = vmatpush1.bf16.msra.mxu1 %v8903_v60  ;;  %5104 = vmatprep.subr.bf16.mxu0 %v8926_v61  ;;  %v426_v60 = vld [vmem:[#allocation7 + $0x8c0] sm:$0xff]  ;;  %v415_v61 = vld [vmem:[#allocation7 + $0x868] sm:$0xff] }
 0x1c8   :  { %5190 = vmatprep.subr.bf16.mxu1 %v8928_v1  ;;  %v427_v1 = vld [vmem:[#allocation7 + $0x8c8] sm:$0xff]  ;;  %v9118_v7 = vcombine.high %v414_v59, %v426_v60  ;;  %v9117_v14 = vcombine.low %v414_v59, %v426_v60 }
 0x1c9   :  { %v9120_v8 = vcombine.high %v415_v61, %v427_v1  ;;  %v9119_v15 = vcombine.low %v415_v61, %v427_v1 }
 0x1ca   :  { %5105 = vmatpush1.bf16.msra.mxu0 %v8925_v9  ;;  %v438_v9 = vld [vmem:[#allocation7 + $0x920] sm:$0xff] }
 0x1cb   :  { %5191 = vmatpush1.bf16.msra.mxu1 %v8927_v49  ;;  %5106 = vmatprep.subr.bf16.mxu0 %v8950_v12  ;;  %v450_v49 = vld [vmem:[#allocation7 + $0x980] sm:$0xff]  ;;  %v439_v12 = vld [vmem:[#allocation7 + $0x928] sm:$0xff] }
 0x1cc   :  { %5192 = vmatprep.subr.bf16.mxu1 %v8952_v13  ;;  %v451_v13 = vld [vmem:[#allocation7 + $0x988] sm:$0xff]  ;;  %v9142_v16 = vcombine.high %v438_v9, %v450_v49  ;;  %v9141_v22 = vcombine.low %v438_v9, %v450_v49 }
 0x1cd   :  { %v9144_v17 = vcombine.high %v439_v12, %v451_v13  ;;  %v9143_v3 = vcombine.low %v439_v12, %v451_v13 }
 0x1ce   :  { %5107 = vmatpush1.bf16.msra.mxu0 %v8949_v18  ;;  %v462_v18 = vld [vmem:[#allocation7 + $0x9e0] sm:$0xff] }
 0x1cf   :  { %5193 = vmatpush1.bf16.msra.mxu1 %v8951_v19  ;;  %5108 = vmatprep.subr.bf16.mxu0 %v8974_v20  ;;  %v474_v19 = vld [vmem:[#allocation7 + $0xa40] sm:$0xff]  ;;  %v463_v20 = vld [vmem:[#allocation7 + $0x9e8] sm:$0xff] }
 0x1d0   :  { %5194 = vmatprep.subr.bf16.mxu1 %v8976_v21  ;;  %v475_v21 = vld [vmem:[#allocation7 + $0xa48] sm:$0xff]  ;;  %v9166_v26 = vcombine.high %v462_v18, %v474_v19  ;;  %v9165_v32 = vcombine.low %v462_v18, %v474_v19 }
 0x1d1   :  { %v9168_v27 = vcombine.high %v463_v20, %v475_v21  ;;  %v9167_v33 = vcombine.low %v463_v20, %v475_v21 }
 0x1d2   :  { %5109 = vmatpush1.bf16.msra.mxu0 %v8973_v28  ;;  %v486_v28 = vld [vmem:[#allocation7 + $0xaa0] sm:$0xff] }
 0x1d3   :  { %5195 = vmatpush1.bf16.msra.mxu1 %v8975_v29  ;;  %5110 = vmatprep.subr.bf16.mxu0 %v8998_v30  ;;  %v498_v29 = vld [vmem:[#allocation7 + $0xb00] sm:$0xff]  ;;  %v487_v30 = vld [vmem:[#allocation7 + $0xaa8] sm:$0xff] }
 0x1d4   :  { %5196 = vmatprep.subr.bf16.mxu1 %v9000_v31  ;;  %v499_v31 = vld [vmem:[#allocation7 + $0xb08] sm:$0xff]  ;;  %v9190_v34 = vcombine.high %v486_v28, %v498_v29  ;;  %v9189_v62 = vcombine.low %v486_v28, %v498_v29 }
 0x1d5   :  { %v9192_v35 = vcombine.high %v487_v30, %v499_v31  ;;  %v9191_v63 = vcombine.low %v487_v30, %v499_v31 }
 0x1d6   :  { %5111 = vmatpush1.bf16.msra.mxu0 %v8997_v36  ;;  %v510_v36 = vld [vmem:[#allocation7 + $0xb60] sm:$0xff] }
 0x1d7   :  { %5197 = vmatpush1.bf16.msra.mxu1 %v8999_v37  ;;  %5112 = vmatprep.subr.bf16.mxu0 %v9022_v38  ;;  %v522_v37 = vld [vmem:[#allocation7 + $0xbc0] sm:$0xff]  ;;  %v511_v38 = vld [vmem:[#allocation7 + $0xb68] sm:$0xff] }
 0x1d8   :  { %5198 = vmatprep.subr.bf16.mxu1 %v9024_v39  ;;  %v523_v39 = vld [vmem:[#allocation7 + $0xbc8] sm:$0xff]  ;;  %v9214_v0 = vcombine.high %v510_v36, %v522_v37  ;;  %v9213_v42 = vcombine.low %v510_v36, %v522_v37 }
 0x1d9   :  { %v9216_v2 = vcombine.high %v511_v38, %v523_v39  ;;  %v9215_v43 = vcombine.low %v511_v38, %v523_v39 }
 0x1da   :  { %5113 = vmatpush1.bf16.msra.mxu0 %v9021_v10  ;;  %v534_v10 = vld [vmem:[#allocation7 + $0xc20] sm:$0xff] }
 0x1db   :  { %5199 = vmatpush1.bf16.msra.mxu1 %v9023_v11  ;;  %5114 = vmatprep.subr.bf16.mxu0 %v9046_v40  ;;  %v546_v11 = vld [vmem:[#allocation7 + $0xc80] sm:$0xff]  ;;  %v535_v40 = vld [vmem:[#allocation7 + $0xc28] sm:$0xff] }
 0x1dc   :  { %5200 = vmatprep.subr.bf16.mxu1 %v9048_v41  ;;  %v547_v41 = vld [vmem:[#allocation7 + $0xc88] sm:$0xff]  ;;  %v9238_v44 = vcombine.high %v534_v10, %v546_v11 }
 0x1dd   :  { %v9240_v45 = vcombine.high %v535_v40, %v547_v41  ;;  %v9239_v52 = vcombine.low %v535_v40, %v547_v41  ;;  %v703_v40 = vld [vmem:[#allocation7 + $0x1168] sm:$0xff] }
 0x1de   :  { %5115 = vmatpush1.bf16.msra.mxu0 %v9045_v46  ;;  %v558_v46 = vld [vmem:[#allocation7 + $0xce0] sm:$0xff]  ;;  %v715_v41 = vld [vmem:[#allocation7 + $0x11c8] sm:$0xff] }
 0x1df   :  { %5201 = vmatpush1.bf16.msra.mxu1 %v9047_v47  ;;  %5116 = vmatprep.subr.bf16.mxu0 %v9070_v48  ;;  %v570_v47 = vld [vmem:[#allocation7 + $0xd40] sm:$0xff]  ;;  %v9237_v48 = vcombine.low %v534_v10, %v546_v11 }
 0x1e0   :  { %5202 = vmatprep.subr.bf16.mxu1 %v9072_v50  ;;  %v559_v50 = vld [vmem:[#allocation7 + $0xce8] sm:$0xff]  ;;  %v9262_v53 = vcombine.high %v558_v46, %v570_v47  ;;  %v9261_v59 = vcombine.low %v558_v46, %v570_v47 }
 0x1e1   :  { %v9263_v60 = vcombine.low %v559_v50, %v571_v51 }
 0x1e2   :  { %5117 = vmatpush1.bf16.msra.mxu0 %v9069_v55  ;;  %v594_v55 = vld [vmem:[#allocation7 + $0xe00] sm:$0xff] }
 0x1e3   :  { %5203 = vmatpush1.bf16.msra.mxu1 %v9071_v56  ;;  %5118 = vmatprep.subr.bf16.mxu0 %v9094_v57  ;;  %v9264_v56 = vcombine.high %v559_v50, %v571_v51  ;;  %v583_v57 = vld [vmem:[#allocation7 + $0xda8] sm:$0xff]  ;;  %v9286_v61 = vcombine.high %v582_v54, %v594_v55  ;;  %v9285_v9 = vcombine.low %v582_v54, %v594_v55  ;;  %v726_v51 = vld [vmem:[#allocation7 + $0x1220] sm:$0xff] }
 0x1e4   :  { %5204 = vmatprep.subr.bf16.mxu1 %v9096_v58  ;;  %v595_v58 = vld [vmem:[#allocation7 + $0xe08] sm:$0xff]  ;;  %v9408_v50 = vcombine.high %v703_v40, %v715_v41 }
 0x1e5   :  { %v9288_v1 = vcombine.high %v583_v57, %v595_v58  ;;  %v9287_v49 = vcombine.low %v583_v57, %v595_v58  ;;  %v739_v54 = vld [vmem:[#allocation7 + $0x1288] sm:$0xff] }
 0x1e6   :  { %5119 = vmatpush1.bf16.msra.mxu0 %v9093_v5  ;;  %v606_v5 = vld [vmem:[#allocation7 + $0xe60] sm:$0xff] }
 0x1e7   :  { %5205 = vmatpush1.bf16.msra.mxu1 %v9095_v6  ;;  %5120 = vmatprep.subr.bf16.mxu0 %v9118_v7  ;;  %v618_v6 = vld [vmem:[#allocation7 + $0xec0] sm:$0xff]  ;;  %v607_v7 = vld [vmem:[#allocation7 + $0xe68] sm:$0xff] }
 0x1e8   :  { %5206 = vmatprep.subr.bf16.mxu1 %v9120_v8  ;;  %v619_v8 = vld [vmem:[#allocation7 + $0xec8] sm:$0xff]  ;;  %v9310_v12 = vcombine.high %v606_v5, %v618_v6  ;;  %v9309_v18 = vcombine.low %v606_v5, %v618_v6 }
 0x1e9   :  { %v9312_v13 = vcombine.high %v607_v7, %v619_v8  ;;  %v9311_v19 = vcombine.low %v607_v7, %v619_v8 }
 0x1ea   :  { %5121 = vmatpush1.bf16.msra.mxu0 %v9117_v14  ;;  %v630_v14 = vld [vmem:[#allocation7 + $0xf20] sm:$0xff] }
 0x1eb   :  { %5207 = vmatpush1.bf16.msra.mxu1 %v9119_v15  ;;  %5122 = vmatprep.subr.bf16.mxu0 %v9142_v16  ;;  %v642_v15 = vld [vmem:[#allocation7 + $0xf80] sm:$0xff]  ;;  %v631_v16 = vld [vmem:[#allocation7 + $0xf28] sm:$0xff] }
 0x1ec   :  { %5208 = vmatprep.subr.bf16.mxu1 %v9144_v17  ;;  %v643_v17 = vld [vmem:[#allocation7 + $0xf88] sm:$0xff]  ;;  %v9334_v20 = vcombine.high %v630_v14, %v642_v15  ;;  %v9333_v28 = vcombine.low %v630_v14, %v642_v15 }
 0x1ed   :  { %v9336_v21 = vcombine.high %v631_v16, %v643_v17  ;;  %v9335_v29 = vcombine.low %v631_v16, %v643_v17 }
 0x1ee   :  { %5123 = vmatpush1.bf16.msra.mxu0 %v9141_v22  ;;  %v654_v22 = vld [vmem:[#allocation7 + $0xfe0] sm:$0xff] }
 0x1ef   :  { %5209 = vmatpush1.bf16.msra.mxu1 %v9143_v3  ;;  %5124 = vmatprep.subr.bf16.mxu0 %v9166_v26  ;;  %v666_v3 = vld [vmem:[#allocation7 + $0x1040] sm:$0xff]  ;;  %v655_v26 = vld [vmem:[#allocation7 + $0xfe8] sm:$0xff] }
 0x1f0   :  { %5210 = vmatprep.subr.bf16.mxu1 %v9168_v27  ;;  %v667_v27 = vld [vmem:[#allocation7 + $0x1048] sm:$0xff]  ;;  %v9358_v30 = vcombine.high %v654_v22, %v666_v3  ;;  %v9357_v36 = vcombine.low %v654_v22, %v666_v3 }
 0x1f1   :  { %v9360_v31 = vcombine.high %v655_v26, %v667_v27  ;;  %v9359_v37 = vcombine.low %v655_v26, %v667_v27 }
 0x1f2   :  { %5125 = vmatpush1.bf16.msra.mxu0 %v9165_v32  ;;  %v678_v32 = vld [vmem:[#allocation7 + $0x10a0] sm:$0xff] }
 0x1f3   :  { %5211 = vmatpush1.bf16.msra.mxu1 %v9167_v33  ;;  %5126 = vmatprep.subr.bf16.mxu0 %v9190_v34  ;;  %v690_v33 = vld [vmem:[#allocation7 + $0x1100] sm:$0xff]  ;;  %v679_v34 = vld [vmem:[#allocation7 + $0x10a8] sm:$0xff] }
 0x1f4   :  { %5212 = vmatprep.subr.bf16.mxu1 %v9192_v35  ;;  %v691_v35 = vld [vmem:[#allocation7 + $0x1108] sm:$0xff]  ;;  %v9382_v38 = vcombine.high %v678_v32, %v690_v33 }
 0x1f5   :  { %v9383_v47 = vcombine.low %v679_v34, %v691_v35 }
 0x1f6   :  { %5127 = vmatpush1.bf16.msra.mxu0 %v9189_v62 }
 0x1f7   :  { %5213 = vmatpush1.bf16.msra.mxu1 %v9191_v63  ;;  %5128 = vmatprep.subr.bf16.mxu0 %v9214_v0  ;;  %v9384_v63 = vcombine.high %v679_v34, %v691_v35  ;;  %v702_v0 = vld [vmem:[#allocation7 + $0x1160] sm:$0xff] }
 0x1f8   :  { %5214 = vmatprep.subr.bf16.mxu1 %v9216_v2  ;;  %v714_v2 = vld [vmem:[#allocation7 + $0x11c0] sm:$0xff] }
 0x1f9   :  { %v9405_v55 = vcombine.low %v702_v0, %v714_v2 }
 0x1fa   :  { %5129 = vmatpush1.bf16.msra.mxu0 %v9213_v42 }
 0x1fb   :  { %5215 = vmatpush1.bf16.msra.mxu1 %v9215_v43  ;;  %5141 = vmatprep.subr.bf16.mxu0 %v9238_v44  ;;  %v9381_v44 = vcombine.low %v678_v32, %v690_v33 }
 0x1fc   :  { %5227 = vmatprep.subr.bf16.mxu1 %v9240_v45 }
 0x1fd   :  { %5131 = vmatmul.mubr.bf16.vlgmr.msra.gmra.mrb[8].mxu0 %v11056_v23 }
 0x1fe   :  { %5217 = vmatmul.mubr.bf16.vlgmr.msra.gmra.mrb[8].mxu1 %v11056_v23  ;;  %5142 = vmatpush1.bf16.msra.mxu0 %v9237_v48  ;;  %v9406_v48 = vcombine.high %v702_v0, %v714_v2 }
 0x1ff   :  { %5173 = vmatprep.mubr.bf16.mxu0 %v11064_v4  ;;  %5228 = vmatpush1.bf16.msra.mxu1 %v9239_v52  ;;  %v738_v52 = vld [vmem:[#allocation7 + $0x1280] sm:$0xff] }
 0x200   :  { %5259 = vmatprep.mubr.bf16.mxu1 %v11064_v4  ;;  %5143 = vmatprep.subr.bf16.mxu0 %v9262_v53  ;;  %v727_v53 = vld [vmem:[#allocation7 + $0x1228] sm:$0xff]  ;;  %v9430_v57 = vcombine.high %v726_v51, %v738_v52  ;;  %v9429_v5 = vcombine.low %v726_v51, %v738_v52 }
 0x201   :  { %5229 = vmatprep.subr.bf16.mxu1 %v9264_v56  ;;  %v9407_v56 = vcombine.low %v703_v40, %v715_v41  ;;  %v9432_v58 = vcombine.high %v727_v53, %v739_v54  ;;  %v9431_v6 = vcombine.low %v727_v53, %v739_v54 }
 0x202   :  { %5144 = vmatpush1.bf16.msra.mxu0 %v9261_v59  ;;  %v750_v59 = vld [vmem:[#allocation7 + $0x12e0] sm:$0xff] }
 0x203   :  { %5230 = vmatpush1.bf16.msra.mxu1 %v9263_v60  ;;  %5145 = vmatprep.subr.bf16.mxu0 %v9286_v61  ;;  %v762_v60 = vld [vmem:[#allocation7 + $0x1340] sm:$0xff]  ;;  %v751_v61 = vld [vmem:[#allocation7 + $0x12e8] sm:$0xff] }
 0x204   :  { %5231 = vmatprep.subr.bf16.mxu1 %v9288_v1  ;;  %v763_v1 = vld [vmem:[#allocation7 + $0x1348] sm:$0xff]  ;;  %v9454_v7 = vcombine.high %v750_v59, %v762_v60  ;;  %v9453_v14 = vcombine.low %v750_v59, %v762_v60 }
 0x205   :  { %v9456_v8 = vcombine.high %v751_v61, %v763_v1  ;;  %v9455_v15 = vcombine.low %v751_v61, %v763_v1 }
 0x206   :  { %5146 = vmatpush1.bf16.msra.mxu0 %v9285_v9  ;;  %v774_v9 = vld [vmem:[#allocation7 + $0x13a0] sm:$0xff] }
 0x207   :  { %5232 = vmatpush1.bf16.msra.mxu1 %v9287_v49  ;;  %5147 = vmatprep.subr.bf16.mxu0 %v9310_v12  ;;  %v786_v49 = vld [vmem:[#allocation7 + $0x1400] sm:$0xff]  ;;  %v775_v12 = vld [vmem:[#allocation7 + $0x13a8] sm:$0xff] }
 0x208   :  { %5233 = vmatprep.subr.bf16.mxu1 %v9312_v13  ;;  %v787_v13 = vld [vmem:[#allocation7 + $0x1408] sm:$0xff]  ;;  %v9478_v16 = vcombine.high %v774_v9, %v786_v49  ;;  %v9477_v22 = vcombine.low %v774_v9, %v786_v49 }
 0x209   :  { %v9480_v17 = vcombine.high %v775_v12, %v787_v13  ;;  %v9479_v3 = vcombine.low %v775_v12, %v787_v13 }
 0x20a   :  { %5148 = vmatpush1.bf16.msra.mxu0 %v9309_v18  ;;  %v798_v18 = vld [vmem:[#allocation7 + $0x1460] sm:$0xff] }
 0x20b   :  { %5234 = vmatpush1.bf16.msra.mxu1 %v9311_v19  ;;  %5149 = vmatprep.subr.bf16.mxu0 %v9334_v20  ;;  %v810_v19 = vld [vmem:[#allocation7 + $0x14c0] sm:$0xff]  ;;  %v799_v20 = vld [vmem:[#allocation7 + $0x1468] sm:$0xff] }
 0x20c   :  { %5235 = vmatprep.subr.bf16.mxu1 %v9336_v21  ;;  %v811_v21 = vld [vmem:[#allocation7 + $0x14c8] sm:$0xff]  ;;  %v9502_v26 = vcombine.high %v798_v18, %v810_v19  ;;  %v9501_v32 = vcombine.low %v798_v18, %v810_v19  ;;  %v189_v18 = vld [vmem:[#allocation7 + $0x158] sm:$0xff] }
 0x20d   :  { %v9504_v27 = vcombine.high %v799_v20, %v811_v21  ;;  %v9503_v33 = vcombine.low %v799_v20, %v811_v21  ;;  %v200_v21 = vld [vmem:[#allocation7 + $0x1b0] sm:$0xff] }
 0x20e   :  { %5150 = vmatpush1.bf16.msra.mxu0 %v9333_v28  ;;  %v822_v28 = vld [vmem:[#allocation7 + $0x1520] sm:$0xff] }
 0x20f   :  { %5236 = vmatpush1.bf16.msra.mxu1 %v9335_v29  ;;  %5151 = vmatprep.subr.bf16.mxu0 %v9358_v30  ;;  %v834_v29 = vld [vmem:[#allocation7 + $0x1580] sm:$0xff]  ;;  %v823_v30 = vld [vmem:[#allocation7 + $0x1528] sm:$0xff] }
 0x210   :  { %v11092_v39 = vpop.f32.mrb[0].mxu0  ;;  %v11094_v62 = vpop.f32.mrb[0].mxu1  ;;  %5237 = vmatprep.subr.bf16.mxu1 %v9360_v31  ;;  %v835_v31 = vld [vmem:[#allocation7 + $0x1588] sm:$0xff]  ;;  %v9526_v34 = vcombine.high %v822_v28, %v834_v29  ;;  %v9525_v0 = vcombine.low %v822_v28, %v834_v29 }
 0x211   :  { %v11096_v10 = vpop.f32.mrb[1].mxu0  ;;  %v11098_v11 = vpop.f32.mrb[1].mxu1  ;;  %v9528_v35 = vcombine.high %v823_v30, %v835_v31  ;;  %v9527_v2 = vcombine.low %v823_v30, %v835_v31 }
 0x212   :  { %v11100_v42 = vpop.f32.mrb[2].mxu0  ;;  %v11102_v43 = vpop.f32.mrb[2].mxu1  ;;  %5152 = vmatpush1.bf16.msra.mxu0 %v9357_v36  ;;  %v846_v36 = vld [vmem:[#allocation7 + $0x15e0] sm:$0xff] }
 0x213   :  { %5238 = vmatpush1.bf16.msra.mxu1 %v9359_v37  ;;  %v11104_v45 = vpop.f32.mrb[3].mxu0  ;;  %v11106_v46 = vpop.f32.mrb[3].mxu1  ;;  %5153 = vmatprep.subr.bf16.mxu0 %v9382_v38  ;;  %v858_v37 = vld [vmem:[#allocation7 + $0x1640] sm:$0xff]  ;;  %v847_v38 = vld [vmem:[#allocation7 + $0x15e8] sm:$0xff] }
 0x214   :  { %5239 = vmatprep.subr.bf16.mxu1 %v9384_v63  ;;  %v859_v63 = vld [vmem:[#allocation7 + $0x1648] sm:$0xff]  ;;  %v9550_v40 = vcombine.high %v846_v36, %v858_v37  ;;  %v9549_v51 = vcombine.low %v846_v36, %v858_v37 }
 0x215   :  { %v9552_v41 = vcombine.high %v847_v38, %v859_v63  ;;  %v9551_v52 = vcombine.low %v847_v38, %v859_v63 }
 0x216   :  { %5154 = vmatpush1.bf16.msra.mxu0 %v9381_v44  ;;  %v870_v44 = vld [vmem:[#allocation7 + $0x16a0] sm:$0xff] }
 0x217   :  { %5240 = vmatpush1.bf16.msra.mxu1 %v9383_v47  ;;  %5155 = vmatprep.subr.bf16.mxu0 %v9406_v48  ;;  %v882_v47 = vld [vmem:[#allocation7 + $0x1700] sm:$0xff]  ;;  %v871_v48 = vld [vmem:[#allocation7 + $0x16a8] sm:$0xff] }
 0x218   :  { %5241 = vmatprep.subr.bf16.mxu1 %v9408_v50  ;;  %v883_v50 = vld [vmem:[#allocation7 + $0x1708] sm:$0xff]  ;;  %v9574_v53 = vcombine.high %v870_v44, %v882_v47  ;;  %v9573_v59 = vcombine.low %v870_v44, %v882_v47 }
 0x219   :  { %v9576_v54 = vcombine.high %v871_v48, %v883_v50  ;;  %v9575_v60 = vcombine.low %v871_v48, %v883_v50 }
 0x21a   :  { %5156 = vmatpush1.bf16.msra.mxu0 %v9405_v55  ;;  %v894_v55 = vld [vmem:[#allocation7 + $0x1760] sm:$0xff] }
 0x21b   :  { %5242 = vmatpush1.bf16.msra.mxu1 %v9407_v56  ;;  %5157 = vmatprep.subr.bf16.mxu0 %v9430_v57  ;;  %v906_v56 = vld [vmem:[#allocation7 + $0x17c0] sm:$0xff]  ;;  %v895_v57 = vld [vmem:[#allocation7 + $0x1768] sm:$0xff] }
 0x21c   :  { %5243 = vmatprep.subr.bf16.mxu1 %v9432_v58  ;;  %v907_v58 = vld [vmem:[#allocation7 + $0x17c8] sm:$0xff]  ;;  %v9598_v61 = vcombine.high %v894_v55, %v906_v56  ;;  %v9597_v9 = vcombine.low %v894_v55, %v906_v56 }
 0x21d   :  { %v9600_v1 = vcombine.high %v895_v57, %v907_v58  ;;  %v9599_v49 = vcombine.low %v895_v57, %v907_v58 }
 0x21e   :  { %5158 = vmatpush1.bf16.msra.mxu0 %v9429_v5  ;;  %v152_v5 = vld [vmem:[#allocation7 + $0x30] sm:$0xff] }
 0x21f   :  { %5244 = vmatpush1.bf16.msra.mxu1 %v9431_v6  ;;  %5159 = vmatprep.subr.bf16.mxu0 %v9454_v7  ;;  %v164_v6 = vld [vmem:[#allocation7 + $0x90] sm:$0xff]  ;;  %v153_v7 = vld [vmem:[#allocation7 + $0x38] sm:$0xff] }
 0x220   :  { %5245 = vmatprep.subr.bf16.mxu1 %v9456_v8  ;;  %v165_v8 = vld [vmem:[#allocation7 + $0x98] sm:$0xff]  ;;  %v8858_v12 = vcombine.high %v152_v5, %v164_v6 }
 0x221   :  { %v8860_v13 = vcombine.high %v153_v7, %v165_v8  ;;  %v8859_v19 = vcombine.low %v153_v7, %v165_v8 }
 0x222   :  { %5160 = vmatpush1.bf16.msra.mxu0 %v9453_v14  ;;  %v176_v14 = vld [vmem:[#allocation7 + $0xf0] sm:$0xff] }
 0x223   :  { %5246 = vmatpush1.bf16.msra.mxu1 %v9455_v15  ;;  %5161 = vmatprep.subr.bf16.mxu0 %v9478_v16  ;;  %v188_v15 = vld [vmem:[#allocation7 + $0x150] sm:$0xff]  ;;  %v8857_v16 = vcombine.low %v152_v5, %v164_v6 }
 0x224   :  { %5247 = vmatprep.subr.bf16.mxu1 %v9480_v17  ;;  %v177_v17 = vld [vmem:[#allocation7 + $0xf8] sm:$0xff]  ;;  %v8882_v20 = vcombine.high %v176_v14, %v188_v15  ;;  %v8881_v28 = vcombine.low %v176_v14, %v188_v15 }
 0x225   :  { %v8883_v29 = vcombine.low %v177_v17, %v189_v18 }
 0x226   :  { %5162 = vmatpush1.bf16.msra.mxu0 %v9477_v22  ;;  %v212_v22 = vld [vmem:[#allocation7 + $0x210] sm:$0xff] }
 0x227   :  { %5248 = vmatpush1.bf16.msra.mxu1 %v9479_v3  ;;  %5163 = vmatprep.subr.bf16.mxu0 %v9502_v26  ;;  %v8884_v3 = vcombine.high %v177_v17, %v189_v18  ;;  %v201_v26 = vld [vmem:[#allocation7 + $0x1b8] sm:$0xff]  ;;  %v8906_v30 = vcombine.high %v200_v21, %v212_v22  ;;  %v8905_v36 = vcombine.low %v200_v21, %v212_v22  ;;  %v344_v18 = vld [vmem:[#allocation7 + $0x630] sm:$0xff] }
 0x228   :  { %5249 = vmatprep.subr.bf16.mxu1 %v9504_v27  ;;  %v213_v27 = vld [vmem:[#allocation7 + $0x218] sm:$0xff] }
 0x229   :  { %v8908_v31 = vcombine.high %v201_v26, %v213_v27  ;;  %v8907_v37 = vcombine.low %v201_v26, %v213_v27  ;;  %v357_v21 = vld [vmem:[#allocation7 + $0x698] sm:$0xff] }
 0x22a   :  { %5164 = vmatpush1.bf16.msra.mxu0 %v9501_v32  ;;  %v224_v32 = vld [vmem:[#allocation7 + $0x270] sm:$0xff] }
 0x22b   :  { %5250 = vmatpush1.bf16.msra.mxu1 %v9503_v33  ;;  %5165 = vmatprep.subr.bf16.mxu0 %v9526_v34  ;;  %v236_v33 = vld [vmem:[#allocation7 + $0x2d0] sm:$0xff]  ;;  %v225_v34 = vld [vmem:[#allocation7 + $0x278] sm:$0xff] }
 0x22c   :  { %5251 = vmatprep.subr.bf16.mxu1 %v9528_v35  ;;  %v237_v35 = vld [vmem:[#allocation7 + $0x2d8] sm:$0xff]  ;;  %v8930_v38 = vcombine.high %v224_v32, %v236_v33  ;;  %v8929_v44 = vcombine.low %v224_v32, %v236_v33 }
 0x22d   :  { %v8932_v63 = vcombine.high %v225_v34, %v237_v35  ;;  %v8931_v47 = vcombine.low %v225_v34, %v237_v35 }
 0x22e   :  { %5166 = vmatpush1.bf16.msra.mxu0 %v9525_v0  ;;  %v248_v0 = vld [vmem:[#allocation7 + $0x330] sm:$0xff] }
 0x22f   :  { %5252 = vmatpush1.bf16.msra.mxu1 %v9527_v2  ;;  %5167 = vmatprep.subr.bf16.mxu0 %v9550_v40  ;;  %v260_v2 = vld [vmem:[#allocation7 + $0x390] sm:$0xff]  ;;  %v249_v40 = vld [vmem:[#allocation7 + $0x338] sm:$0xff] }
 0x230   :  { %5253 = vmatprep.subr.bf16.mxu1 %v9552_v41  ;;  %v261_v41 = vld [vmem:[#allocation7 + $0x398] sm:$0xff]  ;;  %v8954_v48 = vcombine.high %v248_v0, %v260_v2  ;;  %v8953_v55 = vcombine.low %v248_v0, %v260_v2 }
 0x231   :  { %v8956_v50 = vcombine.high %v249_v40, %v261_v41  ;;  %v8955_v56 = vcombine.low %v249_v40, %v261_v41 }
 0x232   :  { %5168 = vmatpush1.bf16.msra.mxu0 %v9549_v51  ;;  %v272_v51 = vld [vmem:[#allocation7 + $0x3f0] sm:$0xff] }
 0x233   :  { %5254 = vmatpush1.bf16.msra.mxu1 %v9551_v52  ;;  %5169 = vmatprep.subr.bf16.mxu0 %v9574_v53  ;;  %v284_v52 = vld [vmem:[#allocation7 + $0x450] sm:$0xff]  ;;  %v273_v53 = vld [vmem:[#allocation7 + $0x3f8] sm:$0xff] }
 0x234   :  { %5255 = vmatprep.subr.bf16.mxu1 %v9576_v54  ;;  %v285_v54 = vld [vmem:[#allocation7 + $0x458] sm:$0xff]  ;;  %v8978_v57 = vcombine.high %v272_v51, %v284_v52  ;;  %v8977_v5 = vcombine.low %v272_v51, %v284_v52 }
 0x235   :  { %v8980_v58 = vcombine.high %v273_v53, %v285_v54  ;;  %v8979_v6 = vcombine.low %v273_v53, %v285_v54 }
 0x236   :  { %5170 = vmatpush1.bf16.msra.mxu0 %v9573_v59  ;;  %v296_v59 = vld [vmem:[#allocation7 + $0x4b0] sm:$0xff] }
 0x237   :  { %5256 = vmatpush1.bf16.msra.mxu1 %v9575_v60  ;;  %5171 = vmatprep.subr.bf16.mxu0 %v9598_v61  ;;  %v308_v60 = vld [vmem:[#allocation7 + $0x510] sm:$0xff]  ;;  %v297_v61 = vld [vmem:[#allocation7 + $0x4b8] sm:$0xff] }
 0x238   :  { %5257 = vmatprep.subr.bf16.mxu1 %v9600_v1  ;;  %v309_v1 = vld [vmem:[#allocation7 + $0x518] sm:$0xff]  ;;  %v9002_v7 = vcombine.high %v296_v59, %v308_v60  ;;  %v9001_v14 = vcombine.low %v296_v59, %v308_v60 }
 0x239   :  { %v9004_v8 = vcombine.high %v297_v61, %v309_v1  ;;  %v9003_v15 = vcombine.low %v297_v61, %v309_v1 }
 0x23a   :  { %5172 = vmatpush1.bf16.msra.mxu0 %v9597_v9  ;;  %v320_v9 = vld [vmem:[#allocation7 + $0x570] sm:$0xff] }
 0x23b   :  { %5258 = vmatpush1.bf16.msra.mxu1 %v9599_v49  ;;  %5270 = vmatprep.subr.bf16.mxu0 %v8858_v12  ;;  %v332_v49 = vld [vmem:[#allocation7 + $0x5d0] sm:$0xff]  ;;  %v321_v12 = vld [vmem:[#allocation7 + $0x578] sm:$0xff] }
 0x23c   :  { %5356 = vmatprep.subr.bf16.mxu1 %v8860_v13  ;;  %v333_v13 = vld [vmem:[#allocation7 + $0x5d8] sm:$0xff]  ;;  %v9025_v22 = vcombine.low %v320_v9, %v332_v49 }
 0x23d   :  { %5174 = vmatmul.mubr.bf16.vlgmr.msra.gmra.mrb[8].mxu0 %v11060_v25  ;;  %v9028_v17 = vcombine.high %v321_v12, %v333_v13 }
 0x23e   :  { %5260 = vmatmul.mubr.bf16.vlgmr.msra.gmra.mrb[8].mxu1 %v11060_v25  ;;  %5271 = vmatpush1.bf16.msra.mxu0 %v8857_v16  ;;  %v9026_v16 = vcombine.high %v320_v9, %v332_v49 }
 0x23f   :  { %5302 = vmatprep.mubr.bf16.mxu0 %v11058_v24  ;;  %5357 = vmatpush1.bf16.msra.mxu1 %v8859_v19  ;;  %v356_v19 = vld [vmem:[#allocation7 + $0x690] sm:$0xff] }
 0x240   :  { %5388 = vmatprep.mubr.bf16.mxu1 %v11058_v24  ;;  %5272 = vmatprep.subr.bf16.mxu0 %v8882_v20  ;;  %v345_v20 = vld [vmem:[#allocation7 + $0x638] sm:$0xff]  ;;  %v9050_v26 = vcombine.high %v344_v18, %v356_v19  ;;  %v9049_v32 = vcombine.low %v344_v18, %v356_v19 }
 0x241   :  { %5358 = vmatprep.subr.bf16.mxu1 %v8884_v3  ;;  %v9027_v3 = vcombine.low %v321_v12, %v333_v13  ;;  %v9052_v27 = vcombine.high %v345_v20, %v357_v21  ;;  %v9051_v33 = vcombine.low %v345_v20, %v357_v21 }
 0x242   :  { %5273 = vmatpush1.bf16.msra.mxu0 %v8881_v28  ;;  %v368_v28 = vld [vmem:[#allocation7 + $0x6f0] sm:$0xff] }
 0x243   :  { %5359 = vmatpush1.bf16.msra.mxu1 %v8883_v29  ;;  %5274 = vmatprep.subr.bf16.mxu0 %v8906_v30  ;;  %v380_v29 = vld [vmem:[#allocation7 + $0x750] sm:$0xff]  ;;  %v369_v30 = vld [vmem:[#allocation7 + $0x6f8] sm:$0xff] }
 0x244   :  { %5360 = vmatprep.subr.bf16.mxu1 %v8908_v31  ;;  %v381_v31 = vld [vmem:[#allocation7 + $0x758] sm:$0xff]  ;;  %v9074_v34 = vcombine.high %v368_v28, %v380_v29  ;;  %v9073_v0 = vcombine.low %v368_v28, %v380_v29 }
 0x245   :  { %v9076_v35 = vcombine.high %v369_v30, %v381_v31  ;;  %v9075_v2 = vcombine.low %v369_v30, %v381_v31 }
 0x246   :  { %5275 = vmatpush1.bf16.msra.mxu0 %v8905_v36  ;;  %v392_v36 = vld [vmem:[#allocation7 + $0x7b0] sm:$0xff] }
 0x247   :  { %5361 = vmatpush1.bf16.msra.mxu1 %v8907_v37  ;;  %5276 = vmatprep.subr.bf16.mxu0 %v8930_v38  ;;  %v404_v37 = vld [vmem:[#allocation7 + $0x810] sm:$0xff]  ;;  %v393_v38 = vld [vmem:[#allocation7 + $0x7b8] sm:$0xff] }
 0x248   :  { %5362 = vmatprep.subr.bf16.mxu1 %v8932_v63  ;;  %v405_v63 = vld [vmem:[#allocation7 + $0x818] sm:$0xff]  ;;  %v9098_v40 = vcombine.high %v392_v36, %v404_v37  ;;  %v9097_v51 = vcombine.low %v392_v36, %v404_v37 }
 0x249   :  { %v9100_v41 = vcombine.high %v393_v38, %v405_v63  ;;  %v9099_v52 = vcombine.low %v393_v38, %v405_v63 }
 0x24a   :  { %5277 = vmatpush1.bf16.msra.mxu0 %v8929_v44  ;;  %v416_v44 = vld [vmem:[#allocation7 + $0x870] sm:$0xff] }
 0x24b   :  { %5363 = vmatpush1.bf16.msra.mxu1 %v8931_v47  ;;  %5278 = vmatprep.subr.bf16.mxu0 %v8954_v48  ;;  %v428_v47 = vld [vmem:[#allocation7 + $0x8d0] sm:$0xff]  ;;  %v417_v48 = vld [vmem:[#allocation7 + $0x878] sm:$0xff] }
 0x24c   :  { %5364 = vmatprep.subr.bf16.mxu1 %v8956_v50  ;;  %v429_v50 = vld [vmem:[#allocation7 + $0x8d8] sm:$0xff]  ;;  %v9122_v53 = vcombine.high %v416_v44, %v428_v47  ;;  %v9121_v59 = vcombine.low %v416_v44, %v428_v47 }
 0x24d   :  { %v9124_v54 = vcombine.high %v417_v48, %v429_v50  ;;  %v9123_v60 = vcombine.low %v417_v48, %v429_v50  ;;  %v573_v44 = vld [vmem:[#allocation7 + $0xd58] sm:$0xff]  ;;  %v584_v50 = vld [vmem:[#allocation7 + $0xdb0] sm:$0xff] }
 0x24e   :  { %5279 = vmatpush1.bf16.msra.mxu0 %v8953_v55  ;;  %v440_v55 = vld [vmem:[#allocation7 + $0x930] sm:$0xff] }
 0x24f   :  { %5365 = vmatpush1.bf16.msra.mxu1 %v8955_v56  ;;  %5280 = vmatprep.subr.bf16.mxu0 %v8978_v57  ;;  %v452_v56 = vld [vmem:[#allocation7 + $0x990] sm:$0xff]  ;;  %v441_v57 = vld [vmem:[#allocation7 + $0x938] sm:$0xff] }
 0x250   :  { %5366 = vmatprep.subr.bf16.mxu1 %v8980_v58  ;;  %v453_v58 = vld [vmem:[#allocation7 + $0x998] sm:$0xff]  ;;  %v9146_v61 = vcombine.high %v440_v55, %v452_v56  ;;  %v9145_v9 = vcombine.low %v440_v55, %v452_v56 }
 0x251   :  { %v9148_v1 = vcombine.high %v441_v57, %v453_v58  ;;  %v9147_v49 = vcombine.low %v441_v57, %v453_v58 }
 0x252   :  { %5281 = vmatpush1.bf16.msra.mxu0 %v8977_v5  ;;  %v464_v5 = vld [vmem:[#allocation7 + $0x9f0] sm:$0xff] }
 0x253   :  { %5367 = vmatpush1.bf16.msra.mxu1 %v8979_v6  ;;  %5282 = vmatprep.subr.bf16.mxu0 %v9002_v7  ;;  %v476_v6 = vld [vmem:[#allocation7 + $0xa50] sm:$0xff]  ;;  %v465_v7 = vld [vmem:[#allocation7 + $0x9f8] sm:$0xff] }
 0x254   :  { %5368 = vmatprep.subr.bf16.mxu1 %v9004_v8  ;;  %v477_v8 = vld [vmem:[#allocation7 + $0xa58] sm:$0xff]  ;;  %v9170_v12 = vcombine.high %v464_v5, %v476_v6  ;;  %v9169_v18 = vcombine.low %v464_v5, %v476_v6 }
 0x255   :  { %v9172_v13 = vcombine.high %v465_v7, %v477_v8  ;;  %v9171_v19 = vcombine.low %v465_v7, %v477_v8 }
 0x256   :  { %5283 = vmatpush1.bf16.msra.mxu0 %v9001_v14  ;;  %v488_v14 = vld [vmem:[#allocation7 + $0xab0] sm:$0xff] }
 0x257   :  { %5369 = vmatpush1.bf16.msra.mxu1 %v9003_v15  ;;  %5284 = vmatprep.subr.bf16.mxu0 %v9026_v16  ;;  %v500_v15 = vld [vmem:[#allocation7 + $0xb10] sm:$0xff]  ;;  %v489_v16 = vld [vmem:[#allocation7 + $0xab8] sm:$0xff] }
 0x258   :  { %5370 = vmatprep.subr.bf16.mxu1 %v9028_v17  ;;  %v501_v17 = vld [vmem:[#allocation7 + $0xb18] sm:$0xff]  ;;  %v9194_v20 = vcombine.high %v488_v14, %v500_v15  ;;  %v9193_v28 = vcombine.low %v488_v14, %v500_v15 }
 0x259   :  { %v9196_v21 = vcombine.high %v489_v16, %v501_v17  ;;  %v9195_v29 = vcombine.low %v489_v16, %v501_v17 }
 0x25a   :  { %5285 = vmatpush1.bf16.msra.mxu0 %v9025_v22  ;;  %v512_v22 = vld [vmem:[#allocation7 + $0xb70] sm:$0xff] }
 0x25b   :  { %5371 = vmatpush1.bf16.msra.mxu1 %v9027_v3  ;;  %5286 = vmatprep.subr.bf16.mxu0 %v9050_v26  ;;  %v524_v3 = vld [vmem:[#allocation7 + $0xbd0] sm:$0xff]  ;;  %v513_v26 = vld [vmem:[#allocation7 + $0xb78] sm:$0xff] }
 0x25c   :  { %5372 = vmatprep.subr.bf16.mxu1 %v9052_v27  ;;  %v525_v27 = vld [vmem:[#allocation7 + $0xbd8] sm:$0xff]  ;;  %v9218_v30 = vcombine.high %v512_v22, %v524_v3  ;;  %v9217_v36 = vcombine.low %v512_v22, %v524_v3 }
 0x25d   :  { %v9220_v31 = vcombine.high %v513_v26, %v525_v27  ;;  %v9219_v37 = vcombine.low %v513_v26, %v525_v27 }
 0x25e   :  { %5287 = vmatpush1.bf16.msra.mxu0 %v9049_v32  ;;  %v536_v32 = vld [vmem:[#allocation7 + $0xc30] sm:$0xff] }
 0x25f   :  { %5373 = vmatpush1.bf16.msra.mxu1 %v9051_v33  ;;  %5288 = vmatprep.subr.bf16.mxu0 %v9074_v34  ;;  %v548_v33 = vld [vmem:[#allocation7 + $0xc90] sm:$0xff]  ;;  %v537_v34 = vld [vmem:[#allocation7 + $0xc38] sm:$0xff] }
 0x260   :  { %5374 = vmatprep.subr.bf16.mxu1 %v9076_v35  ;;  %v549_v35 = vld [vmem:[#allocation7 + $0xc98] sm:$0xff]  ;;  %v9242_v38 = vcombine.high %v536_v32, %v548_v33 }
 0x261   :  { %v9244_v63 = vcombine.high %v537_v34, %v549_v35  ;;  %v9243_v47 = vcombine.low %v537_v34, %v549_v35 }
 0x262   :  { %5289 = vmatpush1.bf16.msra.mxu0 %v9073_v0  ;;  %v560_v0 = vld [vmem:[#allocation7 + $0xcf0] sm:$0xff] }
 0x263   :  { %5375 = vmatpush1.bf16.msra.mxu1 %v9075_v2  ;;  %5290 = vmatprep.subr.bf16.mxu0 %v9098_v40  ;;  %v572_v2 = vld [vmem:[#allocation7 + $0xd50] sm:$0xff]  ;;  %v9241_v40 = vcombine.low %v536_v32, %v548_v33 }
 0x264   :  { %5376 = vmatprep.subr.bf16.mxu1 %v9100_v41  ;;  %v561_v41 = vld [vmem:[#allocation7 + $0xcf8] sm:$0xff]  ;;  %v9266_v48 = vcombine.high %v560_v0, %v572_v2  ;;  %v9265_v55 = vcombine.low %v560_v0, %v572_v2 }
 0x265   :  { %v9267_v56 = vcombine.low %v561_v41, %v573_v44  ;;  %v705_v2 = vld [vmem:[#allocation7 + $0x1178] sm:$0xff] }
 0x266   :  { %5291 = vmatpush1.bf16.msra.mxu0 %v9097_v51  ;;  %v596_v51 = vld [vmem:[#allocation7 + $0xe10] sm:$0xff] }
 0x267   :  { %5377 = vmatpush1.bf16.msra.mxu1 %v9099_v52  ;;  %5292 = vmatprep.subr.bf16.mxu0 %v9122_v53  ;;  %v9268_v52 = vcombine.high %v561_v41, %v573_v44  ;;  %v585_v53 = vld [vmem:[#allocation7 + $0xdb8] sm:$0xff]  ;;  %v9290_v57 = vcombine.high %v584_v50, %v596_v51  ;;  %v9289_v5 = vcombine.low %v584_v50, %v596_v51 }
 0x268   :  { %5378 = vmatprep.subr.bf16.mxu1 %v9124_v54  ;;  %v597_v54 = vld [vmem:[#allocation7 + $0xe18] sm:$0xff] }
 0x269   :  { %v9292_v58 = vcombine.high %v585_v53, %v597_v54  ;;  %v9291_v6 = vcombine.low %v585_v53, %v597_v54 }
 0x26a   :  { %5293 = vmatpush1.bf16.msra.mxu0 %v9121_v59  ;;  %v608_v59 = vld [vmem:[#allocation7 + $0xe70] sm:$0xff] }
 0x26b   :  { %5379 = vmatpush1.bf16.msra.mxu1 %v9123_v60  ;;  %5294 = vmatprep.subr.bf16.mxu0 %v9146_v61  ;;  %v620_v60 = vld [vmem:[#allocation7 + $0xed0] sm:$0xff]  ;;  %v609_v61 = vld [vmem:[#allocation7 + $0xe78] sm:$0xff] }
 0x26c   :  { %5380 = vmatprep.subr.bf16.mxu1 %v9148_v1  ;;  %v621_v1 = vld [vmem:[#allocation7 + $0xed8] sm:$0xff]  ;;  %v9314_v7 = vcombine.high %v608_v59, %v620_v60  ;;  %v9313_v14 = vcombine.low %v608_v59, %v620_v60 }
 0x26d   :  { %v9316_v8 = vcombine.high %v609_v61, %v621_v1  ;;  %v9315_v15 = vcombine.low %v609_v61, %v621_v1 }
 0x26e   :  { %5295 = vmatpush1.bf16.msra.mxu0 %v9145_v9  ;;  %v632_v9 = vld [vmem:[#allocation7 + $0xf30] sm:$0xff] }
 0x26f   :  { %5381 = vmatpush1.bf16.msra.mxu1 %v9147_v49  ;;  %5296 = vmatprep.subr.bf16.mxu0 %v9170_v12  ;;  %v644_v49 = vld [vmem:[#allocation7 + $0xf90] sm:$0xff]  ;;  %v633_v12 = vld [vmem:[#allocation7 + $0xf38] sm:$0xff] }
 0x270   :  { %5382 = vmatprep.subr.bf16.mxu1 %v9172_v13  ;;  %v645_v13 = vld [vmem:[#allocation7 + $0xf98] sm:$0xff]  ;;  %v9338_v16 = vcombine.high %v632_v9, %v644_v49  ;;  %v9337_v22 = vcombine.low %v632_v9, %v644_v49 }
 0x271   :  { %v9340_v17 = vcombine.high %v633_v12, %v645_v13  ;;  %v9339_v3 = vcombine.low %v633_v12, %v645_v13 }
 0x272   :  { %5297 = vmatpush1.bf16.msra.mxu0 %v9169_v18  ;;  %v656_v18 = vld [vmem:[#allocation7 + $0xff0] sm:$0xff] }
 0x273   :  { %5383 = vmatpush1.bf16.msra.mxu1 %v9171_v19  ;;  %5298 = vmatprep.subr.bf16.mxu0 %v9194_v20  ;;  %v668_v19 = vld [vmem:[#allocation7 + $0x1050] sm:$0xff]  ;;  %v657_v20 = vld [vmem:[#allocation7 + $0xff8] sm:$0xff] }
 0x274   :  { %5384 = vmatprep.subr.bf16.mxu1 %v9196_v21  ;;  %v669_v21 = vld [vmem:[#allocation7 + $0x1058] sm:$0xff]  ;;  %v9362_v26 = vcombine.high %v656_v18, %v668_v19  ;;  %v9361_v32 = vcombine.low %v656_v18, %v668_v19 }
 0x275   :  { %v9364_v27 = vcombine.high %v657_v20, %v669_v21  ;;  %v9363_v33 = vcombine.low %v657_v20, %v669_v21 }
 0x276   :  { %5299 = vmatpush1.bf16.msra.mxu0 %v9193_v28  ;;  %v680_v28 = vld [vmem:[#allocation7 + $0x10b0] sm:$0xff] }
 0x277   :  { %5385 = vmatpush1.bf16.msra.mxu1 %v9195_v29  ;;  %5300 = vmatprep.subr.bf16.mxu0 %v9218_v30  ;;  %v692_v29 = vld [vmem:[#allocation7 + $0x1110] sm:$0xff]  ;;  %v681_v30 = vld [vmem:[#allocation7 + $0x10b8] sm:$0xff] }
 0x278   :  { %5386 = vmatprep.subr.bf16.mxu1 %v9220_v31  ;;  %v693_v31 = vld [vmem:[#allocation7 + $0x1118] sm:$0xff]  ;;  %v9386_v34 = vcombine.high %v680_v28, %v692_v29 }
 0x279   :  { %v9387_v51 = vcombine.low %v681_v30, %v693_v31 }
 0x27a   :  { %5301 = vmatpush1.bf16.msra.mxu0 %v9217_v36  ;;  %v9388_v36 = vcombine.high %v681_v30, %v693_v31 }
 0x27b   :  { %5387 = vmatpush1.bf16.msra.mxu1 %v9219_v37  ;;  %5313 = vmatprep.subr.bf16.mxu0 %v9242_v38  ;;  %v704_v37 = vld [vmem:[#allocation7 + $0x1170] sm:$0xff] }
 0x27c   :  { %5399 = vmatprep.subr.bf16.mxu1 %v9244_v63  ;;  %v716_v38 = vld [vmem:[#allocation7 + $0x11d0] sm:$0xff] }
 0x27d   :  { %5303 = vmatmul.mubr.bf16.vlgmr.msra.gmra.mrb[12].mxu0 %v11056_v23  ;;  %v9409_v59 = vcombine.low %v704_v37, %v716_v38 }
 0x27e   :  { %5389 = vmatmul.mubr.bf16.vlgmr.msra.gmra.mrb[12].mxu1 %v11056_v23  ;;  %5314 = vmatpush1.bf16.msra.mxu0 %v9241_v40  ;;  %v717_v40 = vld [vmem:[#allocation7 + $0x11d8] sm:$0xff] }
 0x27f   :  { %5345 = vmatprep.mubr.bf16.mxu0 %v11064_v4  ;;  %5400 = vmatpush1.bf16.msra.mxu1 %v9243_v47  ;;  %v9385_v47 = vcombine.low %v680_v28, %v692_v29  ;;  %v9412_v54 = vcombine.high %v705_v2, %v717_v40  ;;  %v9411_v60 = vcombine.low %v705_v2, %v717_v40 }
 0x280   :  { %5431 = vmatprep.mubr.bf16.mxu1 %v11064_v4  ;;  %5315 = vmatprep.subr.bf16.mxu0 %v9266_v48 }
 0x281   :  { %5401 = vmatprep.subr.bf16.mxu1 %v9268_v52  ;;  %v9410_v52 = vcombine.high %v704_v37, %v716_v38 }
 0x282   :  { %5316 = vmatpush1.bf16.msra.mxu0 %v9265_v55  ;;  %v728_v55 = vld [vmem:[#allocation7 + $0x1230] sm:$0xff] }
 0x283   :  { %5402 = vmatpush1.bf16.msra.mxu1 %v9267_v56  ;;  %5317 = vmatprep.subr.bf16.mxu0 %v9290_v57  ;;  %v740_v56 = vld [vmem:[#allocation7 + $0x1290] sm:$0xff]  ;;  %v729_v57 = vld [vmem:[#allocation7 + $0x1238] sm:$0xff] }
 0x284   :  { %5403 = vmatprep.subr.bf16.mxu1 %v9292_v58  ;;  %v741_v58 = vld [vmem:[#allocation7 + $0x1298] sm:$0xff]  ;;  %v9434_v61 = vcombine.high %v728_v55, %v740_v56  ;;  %v9433_v9 = vcombine.low %v728_v55, %v740_v56 }
 0x285   :  { %v9436_v1 = vcombine.high %v729_v57, %v741_v58  ;;  %v9435_v49 = vcombine.low %v729_v57, %v741_v58 }
 0x286   :  { %5318 = vmatpush1.bf16.msra.mxu0 %v9289_v5  ;;  %v752_v5 = vld [vmem:[#allocation7 + $0x12f0] sm:$0xff] }
 0x287   :  { %5404 = vmatpush1.bf16.msra.mxu1 %v9291_v6  ;;  %5319 = vmatprep.subr.bf16.mxu0 %v9314_v7  ;;  %v764_v6 = vld [vmem:[#allocation7 + $0x1350] sm:$0xff]  ;;  %v753_v7 = vld [vmem:[#allocation7 + $0x12f8] sm:$0xff] }
 0x288   :  { %5405 = vmatprep.subr.bf16.mxu1 %v9316_v8  ;;  %v765_v8 = vld [vmem:[#allocation7 + $0x1358] sm:$0xff]  ;;  %v9458_v12 = vcombine.high %v752_v5, %v764_v6  ;;  %v9457_v18 = vcombine.low %v752_v5, %v764_v6 }
 0x289   :  { %v9460_v13 = vcombine.high %v753_v7, %v765_v8  ;;  %v9459_v19 = vcombine.low %v753_v7, %v765_v8 }
 0x28a   :  { %5320 = vmatpush1.bf16.msra.mxu0 %v9313_v14  ;;  %v776_v14 = vld [vmem:[#allocation7 + $0x13b0] sm:$0xff] }
 0x28b   :  { %5406 = vmatpush1.bf16.msra.mxu1 %v9315_v15  ;;  %5321 = vmatprep.subr.bf16.mxu0 %v9338_v16  ;;  %v788_v15 = vld [vmem:[#allocation7 + $0x1410] sm:$0xff]  ;;  %v777_v16 = vld [vmem:[#allocation7 + $0x13b8] sm:$0xff] }
 0x28c   :  { %5407 = vmatprep.subr.bf16.mxu1 %v9340_v17  ;;  %v789_v17 = vld [vmem:[#allocation7 + $0x1418] sm:$0xff]  ;;  %v9482_v20 = vcombine.high %v776_v14, %v788_v15  ;;  %v9481_v28 = vcombine.low %v776_v14, %v788_v15 }
 0x28d   :  { %v9484_v21 = vcombine.high %v777_v16, %v789_v17  ;;  %v9483_v29 = vcombine.low %v777_v16, %v789_v17 }
 0x28e   :  { %5322 = vmatpush1.bf16.msra.mxu0 %v9337_v22  ;;  %v800_v22 = vld [vmem:[#allocation7 + $0x1470] sm:$0xff] }
 0x28f   :  { %5408 = vmatpush1.bf16.msra.mxu1 %v9339_v3  ;;  %5323 = vmatprep.subr.bf16.mxu0 %v9362_v26  ;;  %v812_v3 = vld [vmem:[#allocation7 + $0x14d0] sm:$0xff]  ;;  %v801_v26 = vld [vmem:[#allocation7 + $0x1478] sm:$0xff] }
 0x290   :  { %v11116_v35 = vpop.f32.mrb[4].mxu0  ;;  %5409 = vmatprep.subr.bf16.mxu1 %v9364_v27  ;;  %v813_v27 = vld [vmem:[#allocation7 + $0x14d8] sm:$0xff]  ;;  %v9506_v30 = vcombine.high %v800_v22, %v812_v3  ;;  %v9505_v37 = vcombine.low %v800_v22, %v812_v3 }
 0x291   :  { %v11118_v63 = vpop.f32.mrb[4].mxu1  ;;  %v11120_v0 = vpop.f32.mrb[5].mxu0  ;;  %v9508_v31 = vcombine.high %v801_v26, %v813_v27  ;;  %v9507_v38 = vcombine.low %v801_v26, %v813_v27 }
 0x292   :  { %v11122_v41 = vpop.f32.mrb[5].mxu1  ;;  %v11124_v44 = vpop.f32.mrb[6].mxu0  ;;  %5324 = vmatpush1.bf16.msra.mxu0 %v9361_v32  ;;  %v824_v32 = vld [vmem:[#allocation7 + $0x1530] sm:$0xff] }
 0x293   :  { %v11126_v48 = vpop.f32.mrb[6].mxu1  ;;  %5410 = vmatpush1.bf16.msra.mxu1 %v9363_v33  ;;  %v11128_v50 = vpop.f32.mrb[7].mxu0  ;;  %5325 = vmatprep.subr.bf16.mxu0 %v9386_v34  ;;  %v836_v33 = vld [vmem:[#allocation7 + $0x1590] sm:$0xff]  ;;  %v825_v34 = vld [vmem:[#allocation7 + $0x1538] sm:$0xff] }
 0x294   :  { %v11130_v53 = vpop.f32.mrb[7].mxu1  ;;  %5411 = vmatprep.subr.bf16.mxu1 %v9388_v36  ;;  %v837_v36 = vld [vmem:[#allocation7 + $0x1598] sm:$0xff]  ;;  %v9530_v2 = vcombine.high %v824_v32, %v836_v33  ;;  %v9529_v55 = vcombine.low %v824_v32, %v836_v33  ;;  %v191_v32 = vld [vmem:[#allocation7 + $0x168] sm:$0xff] }
 0x295   :  { %v9532_v40 = vcombine.high %v825_v34, %v837_v36  ;;  %v9531_v56 = vcombine.low %v825_v34, %v837_v36  ;;  %v202_v36 = vld [vmem:[#allocation7 + $0x1c0] sm:$0xff] }
 0x296   :  { %5326 = vmatpush1.bf16.msra.mxu0 %v9385_v47  ;;  %v848_v47 = vld [vmem:[#allocation7 + $0x15f0] sm:$0xff] }
 0x297   :  { %5412 = vmatpush1.bf16.msra.mxu1 %v9387_v51  ;;  %5327 = vmatprep.subr.bf16.mxu0 %v9410_v52  ;;  %v860_v51 = vld [vmem:[#allocation7 + $0x1650] sm:$0xff]  ;;  %v849_v52 = vld [vmem:[#allocation7 + $0x15f8] sm:$0xff] }
 0x298   :  { %5413 = vmatprep.subr.bf16.mxu1 %v9412_v54  ;;  %v861_v54 = vld [vmem:[#allocation7 + $0x1658] sm:$0xff]  ;;  %v9554_v57 = vcombine.high %v848_v47, %v860_v51  ;;  %v9553_v5 = vcombine.low %v848_v47, %v860_v51 }
 0x299   :  { %v9556_v58 = vcombine.high %v849_v52, %v861_v54  ;;  %v9555_v6 = vcombine.low %v849_v52, %v861_v54 }
 0x29a   :  { %5328 = vmatpush1.bf16.msra.mxu0 %v9409_v59  ;;  %v872_v59 = vld [vmem:[#allocation7 + $0x16b0] sm:$0xff] }
 0x29b   :  { %5414 = vmatpush1.bf16.msra.mxu1 %v9411_v60  ;;  %5329 = vmatprep.subr.bf16.mxu0 %v9434_v61  ;;  %v884_v60 = vld [vmem:[#allocation7 + $0x1710] sm:$0xff]  ;;  %v873_v61 = vld [vmem:[#allocation7 + $0x16b8] sm:$0xff] }
 0x29c   :  { %5415 = vmatprep.subr.bf16.mxu1 %v9436_v1  ;;  %v885_v1 = vld [vmem:[#allocation7 + $0x1718] sm:$0xff]  ;;  %v9578_v7 = vcombine.high %v872_v59, %v884_v60  ;;  %v9577_v14 = vcombine.low %v872_v59, %v884_v60 }
 0x29d   :  { %v9580_v8 = vcombine.high %v873_v61, %v885_v1  ;;  %v9579_v15 = vcombine.low %v873_v61, %v885_v1 }
 0x29e   :  { %5330 = vmatpush1.bf16.msra.mxu0 %v9433_v9  ;;  %v896_v9 = vld [vmem:[#allocation7 + $0x1770] sm:$0xff] }
 0x29f   :  { %5416 = vmatpush1.bf16.msra.mxu1 %v9435_v49  ;;  %5331 = vmatprep.subr.bf16.mxu0 %v9458_v12  ;;  %v908_v49 = vld [vmem:[#allocation7 + $0x17d0] sm:$0xff]  ;;  %v897_v12 = vld [vmem:[#allocation7 + $0x1778] sm:$0xff] }
 0x2a0   :  { %5417 = vmatprep.subr.bf16.mxu1 %v9460_v13  ;;  %v909_v13 = vld [vmem:[#allocation7 + $0x17d8] sm:$0xff]  ;;  %v9602_v16 = vcombine.high %v896_v9, %v908_v49  ;;  %v9601_v22 = vcombine.low %v896_v9, %v908_v49 }
 0x2a1   :  { %v9604_v17 = vcombine.high %v897_v12, %v909_v13  ;;  %v9603_v3 = vcombine.low %v897_v12, %v909_v13 }
 0x2a2   :  { %5332 = vmatpush1.bf16.msra.mxu0 %v9457_v18  ;;  %v154_v18 = vld [vmem:[#allocation7 + $0x40] sm:$0xff] }
 0x2a3   :  { %5418 = vmatpush1.bf16.msra.mxu1 %v9459_v19  ;;  %5333 = vmatprep.subr.bf16.mxu0 %v9482_v20  ;;  %v166_v19 = vld [vmem:[#allocation7 + $0xa0] sm:$0xff]  ;;  %v155_v20 = vld [vmem:[#allocation7 + $0x48] sm:$0xff] }
 0x2a4   :  { %5419 = vmatprep.subr.bf16.mxu1 %v9484_v21  ;;  %v167_v21 = vld [vmem:[#allocation7 + $0xa8] sm:$0xff]  ;;  %v8862_v26 = vcombine.high %v154_v18, %v166_v19 }
 0x2a5   :  { %v8864_v27 = vcombine.high %v155_v20, %v167_v21  ;;  %v8863_v33 = vcombine.low %v155_v20, %v167_v21 }
 0x2a6   :  { %5334 = vmatpush1.bf16.msra.mxu0 %v9481_v28  ;;  %v178_v28 = vld [vmem:[#allocation7 + $0x100] sm:$0xff] }
 0x2a7   :  { %5420 = vmatpush1.bf16.msra.mxu1 %v9483_v29  ;;  %5335 = vmatprep.subr.bf16.mxu0 %v9506_v30  ;;  %v190_v29 = vld [vmem:[#allocation7 + $0x160] sm:$0xff]  ;;  %v8861_v30 = vcombine.low %v154_v18, %v166_v19 }
 0x2a8   :  { %5421 = vmatprep.subr.bf16.mxu1 %v9508_v31  ;;  %v179_v31 = vld [vmem:[#allocation7 + $0x108] sm:$0xff]  ;;  %v8886_v34 = vcombine.high %v178_v28, %v190_v29  ;;  %v8885_v47 = vcombine.low %v178_v28, %v190_v29 }
 0x2a9   :  { %v8887_v51 = vcombine.low %v179_v31, %v191_v32 }
 0x2aa   :  { %5336 = vmatpush1.bf16.msra.mxu0 %v9505_v37  ;;  %v214_v37 = vld [vmem:[#allocation7 + $0x220] sm:$0xff] }
 0x2ab   :  { %5422 = vmatpush1.bf16.msra.mxu1 %v9507_v38  ;;  %5337 = vmatprep.subr.bf16.mxu0 %v9530_v2  ;;  %v8888_v38 = vcombine.high %v179_v31, %v191_v32  ;;  %v203_v2 = vld [vmem:[#allocation7 + $0x1c8] sm:$0xff]  ;;  %v8910_v52 = vcombine.high %v202_v36, %v214_v37  ;;  %v8909_v59 = vcombine.low %v202_v36, %v214_v37  ;;  %v322_v32 = vld [vmem:[#allocation7 + $0x580] sm:$0xff] }
 0x2ac   :  { %5423 = vmatprep.subr.bf16.mxu1 %v9532_v40  ;;  %v215_v40 = vld [vmem:[#allocation7 + $0x228] sm:$0xff] }
 0x2ad   :  { %v8912_v54 = vcombine.high %v203_v2, %v215_v40  ;;  %v8911_v60 = vcombine.low %v203_v2, %v215_v40  ;;  %v335_v36 = vld [vmem:[#allocation7 + $0x5e8] sm:$0xff] }
 0x2ae   :  { %5338 = vmatpush1.bf16.msra.mxu0 %v9529_v55  ;;  %v226_v55 = vld [vmem:[#allocation7 + $0x280] sm:$0xff] }
 0x2af   :  { %5424 = vmatpush1.bf16.msra.mxu1 %v9531_v56  ;;  %5339 = vmatprep.subr.bf16.mxu0 %v9554_v57  ;;  %v238_v56 = vld [vmem:[#allocation7 + $0x2e0] sm:$0xff]  ;;  %v227_v57 = vld [vmem:[#allocation7 + $0x288] sm:$0xff] }
 0x2b0   :  { %5425 = vmatprep.subr.bf16.mxu1 %v9556_v58  ;;  %v239_v58 = vld [vmem:[#allocation7 + $0x2e8] sm:$0xff]  ;;  %v8934_v61 = vcombine.high %v226_v55, %v238_v56  ;;  %v8933_v9 = vcombine.low %v226_v55, %v238_v56 }
 0x2b1   :  { %v8936_v1 = vcombine.high %v227_v57, %v239_v58  ;;  %v8935_v49 = vcombine.low %v227_v57, %v239_v58 }
 0x2b2   :  { %5340 = vmatpush1.bf16.msra.mxu0 %v9553_v5  ;;  %v250_v5 = vld [vmem:[#allocation7 + $0x340] sm:$0xff] }
 0x2b3   :  { %5426 = vmatpush1.bf16.msra.mxu1 %v9555_v6  ;;  %5341 = vmatprep.subr.bf16.mxu0 %v9578_v7  ;;  %v262_v6 = vld [vmem:[#allocation7 + $0x3a0] sm:$0xff]  ;;  %v251_v7 = vld [vmem:[#allocation7 + $0x348] sm:$0xff] }
 0x2b4   :  { %5427 = vmatprep.subr.bf16.mxu1 %v9580_v8  ;;  %v263_v8 = vld [vmem:[#allocation7 + $0x3a8] sm:$0xff]  ;;  %v8958_v12 = vcombine.high %v250_v5, %v262_v6  ;;  %v8957_v18 = vcombine.low %v250_v5, %v262_v6 }
 0x2b5   :  { %v8960_v13 = vcombine.high %v251_v7, %v263_v8  ;;  %v8959_v19 = vcombine.low %v251_v7, %v263_v8 }
 0x2b6   :  { %5342 = vmatpush1.bf16.msra.mxu0 %v9577_v14  ;;  %v274_v14 = vld [vmem:[#allocation7 + $0x400] sm:$0xff] }
 0x2b7   :  { %5428 = vmatpush1.bf16.msra.mxu1 %v9579_v15  ;;  %5343 = vmatprep.subr.bf16.mxu0 %v9602_v16  ;;  %v286_v15 = vld [vmem:[#allocation7 + $0x460] sm:$0xff]  ;;  %v275_v16 = vld [vmem:[#allocation7 + $0x408] sm:$0xff] }
 0x2b8   :  { %5429 = vmatprep.subr.bf16.mxu1 %v9604_v17  ;;  %v287_v17 = vld [vmem:[#allocation7 + $0x468] sm:$0xff]  ;;  %v8982_v20 = vcombine.high %v274_v14, %v286_v15  ;;  %v8981_v28 = vcombine.low %v274_v14, %v286_v15 }
 0x2b9   :  { %v8984_v21 = vcombine.high %v275_v16, %v287_v17  ;;  %v8983_v29 = vcombine.low %v275_v16, %v287_v17 }
 0x2ba   :  { %5344 = vmatpush1.bf16.msra.mxu0 %v9601_v22  ;;  %v298_v22 = vld [vmem:[#allocation7 + $0x4c0] sm:$0xff] }
 0x2bb   :  { %5430 = vmatpush1.bf16.msra.mxu1 %v9603_v3  ;;  %5442 = vmatprep.subr.bf16.mxu0 %v8862_v26  ;;  %v310_v3 = vld [vmem:[#allocation7 + $0x520] sm:$0xff]  ;;  %v299_v26 = vld [vmem:[#allocation7 + $0x4c8] sm:$0xff] }
 0x2bc   :  { %5528 = vmatprep.subr.bf16.mxu1 %v8864_v27  ;;  %v311_v27 = vld [vmem:[#allocation7 + $0x528] sm:$0xff]  ;;  %v9005_v37 = vcombine.low %v298_v22, %v310_v3 }
 0x2bd   :  { %5346 = vmatmul.mubr.bf16.vlgmr.msra.gmra.mrb[12].mxu0 %v11060_v25  ;;  %v9008_v31 = vcombine.high %v299_v26, %v311_v27 }
 0x2be   :  { %5432 = vmatmul.mubr.bf16.vlgmr.msra.gmra.mrb[12].mxu1 %v11060_v25  ;;  %5443 = vmatpush1.bf16.msra.mxu0 %v8861_v30  ;;  %v9006_v30 = vcombine.high %v298_v22, %v310_v3 }
 0x2bf   :  { %5474 = vmatprep.mubr.bf16.mxu0 %v11058_v24  ;;  %5529 = vmatpush1.bf16.msra.mxu1 %v8863_v33  ;;  %v334_v33 = vld [vmem:[#allocation7 + $0x5e0] sm:$0xff] }
 0x2c0   :  { %5560 = vmatprep.mubr.bf16.mxu1 %v11058_v24  ;;  %5444 = vmatprep.subr.bf16.mxu0 %v8886_v34  ;;  %v323_v34 = vld [vmem:[#allocation7 + $0x588] sm:$0xff]  ;;  %v9030_v2 = vcombine.high %v322_v32, %v334_v33  ;;  %v9029_v55 = vcombine.low %v322_v32, %v334_v33 }
 0x2c1   :  { %5530 = vmatprep.subr.bf16.mxu1 %v8888_v38  ;;  %v9007_v38 = vcombine.low %v299_v26, %v311_v27  ;;  %v9032_v40 = vcombine.high %v323_v34, %v335_v36  ;;  %v9031_v56 = vcombine.low %v323_v34, %v335_v36 }
 0x2c2   :  { %5445 = vmatpush1.bf16.msra.mxu0 %v8885_v47  ;;  %v346_v47 = vld [vmem:[#allocation7 + $0x640] sm:$0xff] }
 0x2c3   :  { %5531 = vmatpush1.bf16.msra.mxu1 %v8887_v51  ;;  %5446 = vmatprep.subr.bf16.mxu0 %v8910_v52  ;;  %v358_v51 = vld [vmem:[#allocation7 + $0x6a0] sm:$0xff]  ;;  %v347_v52 = vld [vmem:[#allocation7 + $0x648] sm:$0xff] }
 0x2c4   :  { %5532 = vmatprep.subr.bf16.mxu1 %v8912_v54  ;;  %v359_v54 = vld [vmem:[#allocation7 + $0x6a8] sm:$0xff]  ;;  %v9054_v57 = vcombine.high %v346_v47, %v358_v51  ;;  %v9053_v5 = vcombine.low %v346_v47, %v358_v51 }
 0x2c5   :  { %v9056_v58 = vcombine.high %v347_v52, %v359_v54  ;;  %v9055_v6 = vcombine.low %v347_v52, %v359_v54 }
 0x2c6   :  { %5447 = vmatpush1.bf16.msra.mxu0 %v8909_v59  ;;  %v370_v59 = vld [vmem:[#allocation7 + $0x700] sm:$0xff] }
 0x2c7   :  { %5533 = vmatpush1.bf16.msra.mxu1 %v8911_v60  ;;  %5448 = vmatprep.subr.bf16.mxu0 %v8934_v61  ;;  %v382_v60 = vld [vmem:[#allocation7 + $0x760] sm:$0xff]  ;;  %v371_v61 = vld [vmem:[#allocation7 + $0x708] sm:$0xff] }
 0x2c8   :  { %5534 = vmatprep.subr.bf16.mxu1 %v8936_v1  ;;  %v383_v1 = vld [vmem:[#allocation7 + $0x768] sm:$0xff]  ;;  %v9078_v7 = vcombine.high %v370_v59, %v382_v60  ;;  %v9077_v14 = vcombine.low %v370_v59, %v382_v60 }
 0x2c9   :  { %v9080_v8 = vcombine.high %v371_v61, %v383_v1  ;;  %v9079_v15 = vcombine.low %v371_v61, %v383_v1 }
 0x2ca   :  { %5449 = vmatpush1.bf16.msra.mxu0 %v8933_v9  ;;  %v394_v9 = vld [vmem:[#allocation7 + $0x7c0] sm:$0xff] }
 0x2cb   :  { %5535 = vmatpush1.bf16.msra.mxu1 %v8935_v49  ;;  %5450 = vmatprep.subr.bf16.mxu0 %v8958_v12  ;;  %v406_v49 = vld [vmem:[#allocation7 + $0x820] sm:$0xff]  ;;  %v395_v12 = vld [vmem:[#allocation7 + $0x7c8] sm:$0xff] }
 0x2cc   :  { %5536 = vmatprep.subr.bf16.mxu1 %v8960_v13  ;;  %v407_v13 = vld [vmem:[#allocation7 + $0x828] sm:$0xff]  ;;  %v9102_v16 = vcombine.high %v394_v9, %v406_v49  ;;  %v9101_v22 = vcombine.low %v394_v9, %v406_v49 }
 0x2cd   :  { %v9104_v17 = vcombine.high %v395_v12, %v407_v13  ;;  %v9103_v3 = vcombine.low %v395_v12, %v407_v13 }
 0x2ce   :  { %5451 = vmatpush1.bf16.msra.mxu0 %v8957_v18  ;;  %v418_v18 = vld [vmem:[#allocation7 + $0x880] sm:$0xff] }
 0x2cf   :  { %5537 = vmatpush1.bf16.msra.mxu1 %v8959_v19  ;;  %5452 = vmatprep.subr.bf16.mxu0 %v8982_v20  ;;  %v430_v19 = vld [vmem:[#allocation7 + $0x8e0] sm:$0xff]  ;;  %v419_v20 = vld [vmem:[#allocation7 + $0x888] sm:$0xff] }
 0x2d0   :  { %5538 = vmatprep.subr.bf16.mxu1 %v8984_v21  ;;  %v431_v21 = vld [vmem:[#allocation7 + $0x8e8] sm:$0xff]  ;;  %v9126_v26 = vcombine.high %v418_v18, %v430_v19  ;;  %v9125_v32 = vcombine.low %v418_v18, %v430_v19 }
 0x2d1   :  { %v9128_v27 = vcombine.high %v419_v20, %v431_v21  ;;  %v9127_v33 = vcombine.low %v419_v20, %v431_v21 }
 0x2d2   :  { %5453 = vmatpush1.bf16.msra.mxu0 %v8981_v28  ;;  %v442_v28 = vld [vmem:[#allocation7 + $0x940] sm:$0xff] }
 0x2d3   :  { %5539 = vmatpush1.bf16.msra.mxu1 %v8983_v29  ;;  %5454 = vmatprep.subr.bf16.mxu0 %v9006_v30  ;;  %v454_v29 = vld [vmem:[#allocation7 + $0x9a0] sm:$0xff]  ;;  %v443_v30 = vld [vmem:[#allocation7 + $0x948] sm:$0xff] }
 0x2d4   :  { %5540 = vmatprep.subr.bf16.mxu1 %v9008_v31  ;;  %v455_v31 = vld [vmem:[#allocation7 + $0x9a8] sm:$0xff]  ;;  %v9150_v34 = vcombine.high %v442_v28, %v454_v29  ;;  %v9149_v47 = vcombine.low %v442_v28, %v454_v29 }
 0x2d5   :  { %v9152_v36 = vcombine.high %v443_v30, %v455_v31  ;;  %v9151_v51 = vcombine.low %v443_v30, %v455_v31  ;;  %v575_v28 = vld [vmem:[#allocation7 + $0xd68] sm:$0xff]  ;;  %v586_v31 = vld [vmem:[#allocation7 + $0xdc0] sm:$0xff] }
 0x2d6   :  { %5455 = vmatpush1.bf16.msra.mxu0 %v9005_v37  ;;  %v466_v37 = vld [vmem:[#allocation7 + $0xa00] sm:$0xff] }
 0x2d7   :  { %5541 = vmatpush1.bf16.msra.mxu1 %v9007_v38  ;;  %5456 = vmatprep.subr.bf16.mxu0 %v9030_v2  ;;  %v478_v38 = vld [vmem:[#allocation7 + $0xa60] sm:$0xff]  ;;  %v467_v2 = vld [vmem:[#allocation7 + $0xa08] sm:$0xff] }
 0x2d8   :  { %5542 = vmatprep.subr.bf16.mxu1 %v9032_v40  ;;  %v479_v40 = vld [vmem:[#allocation7 + $0xa68] sm:$0xff]  ;;  %v9174_v52 = vcombine.high %v466_v37, %v478_v38  ;;  %v9173_v59 = vcombine.low %v466_v37, %v478_v38 }
 0x2d9   :  { %v9176_v54 = vcombine.high %v467_v2, %v479_v40  ;;  %v9175_v60 = vcombine.low %v467_v2, %v479_v40 }
 0x2da   :  { %5457 = vmatpush1.bf16.msra.mxu0 %v9029_v55  ;;  %v490_v55 = vld [vmem:[#allocation7 + $0xac0] sm:$0xff] }
 0x2db   :  { %5543 = vmatpush1.bf16.msra.mxu1 %v9031_v56  ;;  %5458 = vmatprep.subr.bf16.mxu0 %v9054_v57  ;;  %v502_v56 = vld [vmem:[#allocation7 + $0xb20] sm:$0xff]  ;;  %v491_v57 = vld [vmem:[#allocation7 + $0xac8] sm:$0xff] }
 0x2dc   :  { %5544 = vmatprep.subr.bf16.mxu1 %v9056_v58  ;;  %v503_v58 = vld [vmem:[#allocation7 + $0xb28] sm:$0xff]  ;;  %v9198_v61 = vcombine.high %v490_v55, %v502_v56  ;;  %v9197_v9 = vcombine.low %v490_v55, %v502_v56 }
 0x2dd   :  { %v9200_v1 = vcombine.high %v491_v57, %v503_v58  ;;  %v9199_v49 = vcombine.low %v491_v57, %v503_v58 }
 0x2de   :  { %5459 = vmatpush1.bf16.msra.mxu0 %v9053_v5  ;;  %v514_v5 = vld [vmem:[#allocation7 + $0xb80] sm:$0xff] }
 0x2df   :  { %5545 = vmatpush1.bf16.msra.mxu1 %v9055_v6  ;;  %5460 = vmatprep.subr.bf16.mxu0 %v9078_v7  ;;  %v526_v6 = vld [vmem:[#allocation7 + $0xbe0] sm:$0xff]  ;;  %v515_v7 = vld [vmem:[#allocation7 + $0xb88] sm:$0xff] }
 0x2e0   :  { %5546 = vmatprep.subr.bf16.mxu1 %v9080_v8  ;;  %v527_v8 = vld [vmem:[#allocation7 + $0xbe8] sm:$0xff]  ;;  %v9222_v12 = vcombine.high %v514_v5, %v526_v6  ;;  %v9221_v18 = vcombine.low %v514_v5, %v526_v6 }
 0x2e1   :  { %v9224_v13 = vcombine.high %v515_v7, %v527_v8  ;;  %v9223_v19 = vcombine.low %v515_v7, %v527_v8 }
 0x2e2   :  { %5461 = vmatpush1.bf16.msra.mxu0 %v9077_v14  ;;  %v538_v14 = vld [vmem:[#allocation7 + $0xc40] sm:$0xff] }
 0x2e3   :  { %5547 = vmatpush1.bf16.msra.mxu1 %v9079_v15  ;;  %5462 = vmatprep.subr.bf16.mxu0 %v9102_v16  ;;  %v550_v15 = vld [vmem:[#allocation7 + $0xca0] sm:$0xff]  ;;  %v539_v16 = vld [vmem:[#allocation7 + $0xc48] sm:$0xff] }
 0x2e4   :  { %5548 = vmatprep.subr.bf16.mxu1 %v9104_v17  ;;  %v551_v17 = vld [vmem:[#allocation7 + $0xca8] sm:$0xff]  ;;  %v9246_v20 = vcombine.high %v538_v14, %v550_v15 }
 0x2e5   :  { %v9248_v21 = vcombine.high %v539_v16, %v551_v17  ;;  %v9247_v29 = vcombine.low %v539_v16, %v551_v17 }
 0x2e6   :  { %5463 = vmatpush1.bf16.msra.mxu0 %v9101_v22  ;;  %v562_v22 = vld [vmem:[#allocation7 + $0xd00] sm:$0xff] }
 0x2e7   :  { %5549 = vmatpush1.bf16.msra.mxu1 %v9103_v3  ;;  %5464 = vmatprep.subr.bf16.mxu0 %v9126_v26  ;;  %v574_v3 = vld [vmem:[#allocation7 + $0xd60] sm:$0xff]  ;;  %v9245_v26 = vcombine.low %v538_v14, %v550_v15 }
 0x2e8   :  { %5550 = vmatprep.subr.bf16.mxu1 %v9128_v27  ;;  %v563_v27 = vld [vmem:[#allocation7 + $0xd08] sm:$0xff]  ;;  %v9270_v30 = vcombine.high %v562_v22, %v574_v3  ;;  %v9269_v37 = vcombine.low %v562_v22, %v574_v3 }
 0x2e9   :  { %v9271_v38 = vcombine.low %v563_v27, %v575_v28 }
 0x2ea   :  { %5465 = vmatpush1.bf16.msra.mxu0 %v9125_v32  ;;  %v598_v32 = vld [vmem:[#allocation7 + $0xe20] sm:$0xff] }
 0x2eb   :  { %5551 = vmatpush1.bf16.msra.mxu1 %v9127_v33  ;;  %5466 = vmatprep.subr.bf16.mxu0 %v9150_v34  ;;  %v9272_v33 = vcombine.high %v563_v27, %v575_v28  ;;  %v587_v34 = vld [vmem:[#allocation7 + $0xdc8] sm:$0xff]  ;;  %v9294_v2 = vcombine.high %v586_v31, %v598_v32  ;;  %v9293_v55 = vcombine.low %v586_v31, %v598_v32 }
 0x2ec   :  { %5552 = vmatprep.subr.bf16.mxu1 %v9152_v36  ;;  %v599_v36 = vld [vmem:[#allocation7 + $0xe28] sm:$0xff] }
 0x2ed   :  { %v9296_v40 = vcombine.high %v587_v34, %v599_v36  ;;  %v9295_v56 = vcombine.low %v587_v34, %v599_v36  ;;  %v719_v34 = vld [vmem:[#allocation7 + $0x11e8] sm:$0xff] }
 0x2ee   :  { %5467 = vmatpush1.bf16.msra.mxu0 %v9149_v47  ;;  %v610_v47 = vld [vmem:[#allocation7 + $0xe80] sm:$0xff] }
 0x2ef   :  { %5553 = vmatpush1.bf16.msra.mxu1 %v9151_v51  ;;  %5468 = vmatprep.subr.bf16.mxu0 %v9174_v52  ;;  %v622_v51 = vld [vmem:[#allocation7 + $0xee0] sm:$0xff]  ;;  %v611_v52 = vld [vmem:[#allocation7 + $0xe88] sm:$0xff] }
 0x2f0   :  { %5554 = vmatprep.subr.bf16.mxu1 %v9176_v54  ;;  %v623_v54 = vld [vmem:[#allocation7 + $0xee8] sm:$0xff]  ;;  %v9318_v57 = vcombine.high %v610_v47, %v622_v51  ;;  %v9317_v5 = vcombine.low %v610_v47, %v622_v51 }
 0x2f1   :  { %v9320_v58 = vcombine.high %v611_v52, %v623_v54  ;;  %v9319_v6 = vcombine.low %v611_v52, %v623_v54 }
 0x2f2   :  { %5469 = vmatpush1.bf16.msra.mxu0 %v9173_v59  ;;  %v634_v59 = vld [vmem:[#allocation7 + $0xf40] sm:$0xff] }
 0x2f3   :  { %5555 = vmatpush1.bf16.msra.mxu1 %v9175_v60  ;;  %5470 = vmatprep.subr.bf16.mxu0 %v9198_v61  ;;  %v646_v60 = vld [vmem:[#allocation7 + $0xfa0] sm:$0xff]  ;;  %v635_v61 = vld [vmem:[#allocation7 + $0xf48] sm:$0xff] }
 0x2f4   :  { %5556 = vmatprep.subr.bf16.mxu1 %v9200_v1  ;;  %v647_v1 = vld [vmem:[#allocation7 + $0xfa8] sm:$0xff]  ;;  %v9342_v7 = vcombine.high %v634_v59, %v646_v60  ;;  %v9341_v14 = vcombine.low %v634_v59, %v646_v60 }
 0x2f5   :  { %v9344_v8 = vcombine.high %v635_v61, %v647_v1  ;;  %v9343_v15 = vcombine.low %v635_v61, %v647_v1 }
 0x2f6   :  { %5471 = vmatpush1.bf16.msra.mxu0 %v9197_v9  ;;  %v658_v9 = vld [vmem:[#allocation7 + $0x1000] sm:$0xff] }
 0x2f7   :  { %5557 = vmatpush1.bf16.msra.mxu1 %v9199_v49  ;;  %5472 = vmatprep.subr.bf16.mxu0 %v9222_v12  ;;  %v670_v49 = vld [vmem:[#allocation7 + $0x1060] sm:$0xff]  ;;  %v659_v12 = vld [vmem:[#allocation7 + $0x1008] sm:$0xff] }
 0x2f8   :  { %5558 = vmatprep.subr.bf16.mxu1 %v9224_v13  ;;  %v671_v13 = vld [vmem:[#allocation7 + $0x1068] sm:$0xff]  ;;  %v9366_v16 = vcombine.high %v658_v9, %v670_v49  ;;  %v9365_v22 = vcombine.low %v658_v9, %v670_v49 }
 0x2f9   :  { %v9368_v17 = vcombine.high %v659_v12, %v671_v13  ;;  %v9367_v3 = vcombine.low %v659_v12, %v671_v13 }
 0x2fa   :  { %5473 = vmatpush1.bf16.msra.mxu0 %v9221_v18  ;;  %v682_v18 = vld [vmem:[#allocation7 + $0x10c0] sm:$0xff] }
 0x2fb   :  { %5559 = vmatpush1.bf16.msra.mxu1 %v9223_v19  ;;  %5485 = vmatprep.subr.bf16.mxu0 %v9246_v20  ;;  %v694_v19 = vld [vmem:[#allocation7 + $0x1120] sm:$0xff]  ;;  %v683_v20 = vld [vmem:[#allocation7 + $0x10c8] sm:$0xff] }
 0x2fc   :  { %5571 = vmatprep.subr.bf16.mxu1 %v9248_v21  ;;  %v695_v21 = vld [vmem:[#allocation7 + $0x1128] sm:$0xff] }
 0x2fd   :  { %5475 = vmatmul.mubr.bf16.vlgmr.msra.gmra.mrb[16].mxu0 %v11056_v23  ;;  %v9392_v28 = vcombine.high %v683_v20, %v695_v21  ;;  %v9391_v47 = vcombine.low %v683_v20, %v695_v21 }
 0x2fe   :  { %5561 = vmatmul.mubr.bf16.vlgmr.msra.gmra.mrb[16].mxu1 %v11056_v23  ;;  %5486 = vmatpush1.bf16.msra.mxu0 %v9245_v26  ;;  %v9390_v26 = vcombine.high %v682_v18, %v694_v19 }
 0x2ff   :  { %5517 = vmatprep.mubr.bf16.mxu0 %v11064_v4  ;;  %5572 = vmatpush1.bf16.msra.mxu1 %v9247_v29  ;;  %v706_v29 = vld [vmem:[#allocation7 + $0x1180] sm:$0xff] }
 0x300   :  { %5603 = vmatprep.mubr.bf16.mxu1 %v11064_v4  ;;  %5487 = vmatprep.subr.bf16.mxu0 %v9270_v30  ;;  %v718_v30 = vld [vmem:[#allocation7 + $0x11e0] sm:$0xff] }
 0x301   :  { %5573 = vmatprep.subr.bf16.mxu1 %v9272_v33  ;;  %v707_v33 = vld [vmem:[#allocation7 + $0x1188] sm:$0xff]  ;;  %v9414_v51 = vcombine.high %v706_v29, %v718_v30  ;;  %v9413_v59 = vcombine.low %v706_v29, %v718_v30 }
 0x302   :  { %5488 = vmatpush1.bf16.msra.mxu0 %v9269_v37  ;;  %v9416_v54 = vcombine.high %v707_v33, %v719_v34  ;;  %v9415_v60 = vcombine.low %v707_v33, %v719_v34 }
 0x303   :  { %5574 = vmatpush1.bf16.msra.mxu1 %v9271_v38  ;;  %5489 = vmatprep.subr.bf16.mxu0 %v9294_v2  ;;  %v9389_v38 = vcombine.low %v682_v18, %v694_v19 }
 0x304   :  { %5575 = vmatprep.subr.bf16.mxu1 %v9296_v40 }
 0x306   :  { %5490 = vmatpush1.bf16.msra.mxu0 %v9293_v55  ;;  %v730_v55 = vld [vmem:[#allocation7 + $0x1240] sm:$0xff] }
 0x307   :  { %5576 = vmatpush1.bf16.msra.mxu1 %v9295_v56  ;;  %5491 = vmatprep.subr.bf16.mxu0 %v9318_v57  ;;  %v742_v56 = vld [vmem:[#allocation7 + $0x12a0] sm:$0xff]  ;;  %v731_v57 = vld [vmem:[#allocation7 + $0x1248] sm:$0xff] }
 0x308   :  { %5577 = vmatprep.subr.bf16.mxu1 %v9320_v58  ;;  %v743_v58 = vld [vmem:[#allocation7 + $0x12a8] sm:$0xff]  ;;  %v9438_v61 = vcombine.high %v730_v55, %v742_v56  ;;  %v9437_v9 = vcombine.low %v730_v55, %v742_v56 }
 0x309   :  { %v9440_v1 = vcombine.high %v731_v57, %v743_v58  ;;  %v9439_v49 = vcombine.low %v731_v57, %v743_v58 }
 0x30a   :  { %5492 = vmatpush1.bf16.msra.mxu0 %v9317_v5  ;;  %v754_v5 = vld [vmem:[#allocation7 + $0x1300] sm:$0xff] }
 0x30b   :  { %5578 = vmatpush1.bf16.msra.mxu1 %v9319_v6  ;;  %5493 = vmatprep.subr.bf16.mxu0 %v9342_v7  ;;  %v766_v6 = vld [vmem:[#allocation7 + $0x1360] sm:$0xff]  ;;  %v755_v7 = vld [vmem:[#allocation7 + $0x1308] sm:$0xff] }
 0x30c   :  { %5579 = vmatprep.subr.bf16.mxu1 %v9344_v8  ;;  %v767_v8 = vld [vmem:[#allocation7 + $0x1368] sm:$0xff]  ;;  %v9462_v12 = vcombine.high %v754_v5, %v766_v6  ;;  %v9461_v18 = vcombine.low %v754_v5, %v766_v6 }
 0x30d   :  { %v9464_v13 = vcombine.high %v755_v7, %v767_v8  ;;  %v9463_v19 = vcombine.low %v755_v7, %v767_v8 }
 0x30e   :  { %5494 = vmatpush1.bf16.msra.mxu0 %v9341_v14  ;;  %v778_v14 = vld [vmem:[#allocation7 + $0x13c0] sm:$0xff] }
 0x30f   :  { %5580 = vmatpush1.bf16.msra.mxu1 %v9343_v15  ;;  %5495 = vmatprep.subr.bf16.mxu0 %v9366_v16  ;;  %v790_v15 = vld [vmem:[#allocation7 + $0x1420] sm:$0xff]  ;;  %v779_v16 = vld [vmem:[#allocation7 + $0x13c8] sm:$0xff] }
 0x310   :  { %v11140_v27 = vpop.f32.mrb[8].mxu0  ;;  %5581 = vmatprep.subr.bf16.mxu1 %v9368_v17  ;;  %v791_v17 = vld [vmem:[#allocation7 + $0x1428] sm:$0xff]  ;;  %v9486_v20 = vcombine.high %v778_v14, %v790_v15  ;;  %v9485_v29 = vcombine.low %v778_v14, %v790_v15 }
 0x311   :  { %v11142_v31 = vpop.f32.mrb[8].mxu1  ;;  %v11144_v32 = vpop.f32.mrb[9].mxu0  ;;  %v9488_v21 = vcombine.high %v779_v16, %v791_v17  ;;  %v9487_v30 = vcombine.low %v779_v16, %v791_v17 }
 0x312   :  { %v11146_v36 = vpop.f32.mrb[9].mxu1  ;;  %v11148_v37 = vpop.f32.mrb[10].mxu0  ;;  %5496 = vmatpush1.bf16.msra.mxu0 %v9365_v22  ;;  %v802_v22 = vld [vmem:[#allocation7 + $0x1480] sm:$0xff] }
 0x313   :  { %v11150_v2 = vpop.f32.mrb[10].mxu1  ;;  %5582 = vmatpush1.bf16.msra.mxu1 %v9367_v3  ;;  %v11152_v40 = vpop.f32.mrb[11].mxu0  ;;  %5497 = vmatprep.subr.bf16.mxu0 %v9390_v26  ;;  %v814_v3 = vld [vmem:[#allocation7 + $0x14e0] sm:$0xff]  ;;  %v803_v26 = vld [vmem:[#allocation7 + $0x1488] sm:$0xff] }
 0x314   :  { %v11154_v52 = vpop.f32.mrb[11].mxu1  ;;  %5583 = vmatprep.subr.bf16.mxu1 %v9392_v28  ;;  %v815_v28 = vld [vmem:[#allocation7 + $0x14e8] sm:$0xff]  ;;  %v9510_v33 = vcombine.high %v802_v22, %v814_v3  ;;  %v9509_v55 = vcombine.low %v802_v22, %v814_v3 }
 0x315   :  { %v9512_v34 = vcombine.high %v803_v26, %v815_v28  ;;  %v9511_v56 = vcombine.low %v803_v26, %v815_v28 }
 0x316   :  { %5498 = vmatpush1.bf16.msra.mxu0 %v9389_v38  ;;  %v826_v38 = vld [vmem:[#allocation7 + $0x1540] sm:$0xff] }
 0x317   :  { %5584 = vmatpush1.bf16.msra.mxu1 %v9391_v47  ;;  %5499 = vmatprep.subr.bf16.mxu0 %v9414_v51  ;;  %v838_v47 = vld [vmem:[#allocation7 + $0x15a0] sm:$0xff]  ;;  %v827_v51 = vld [vmem:[#allocation7 + $0x1548] sm:$0xff] }
 0x318   :  { %5585 = vmatprep.subr.bf16.mxu1 %v9416_v54  ;;  %v839_v54 = vld [vmem:[#allocation7 + $0x15a8] sm:$0xff]  ;;  %v9534_v57 = vcombine.high %v826_v38, %v838_v47  ;;  %v9533_v5 = vcombine.low %v826_v38, %v838_v47 }
 0x319   :  { %v9536_v58 = vcombine.high %v827_v51, %v839_v54  ;;  %v9535_v6 = vcombine.low %v827_v51, %v839_v54 }
 0x31a   :  { %5500 = vmatpush1.bf16.msra.mxu0 %v9413_v59  ;;  %v850_v59 = vld [vmem:[#allocation7 + $0x1600] sm:$0xff] }
 0x31b   :  { %5586 = vmatpush1.bf16.msra.mxu1 %v9415_v60  ;;  %5501 = vmatprep.subr.bf16.mxu0 %v9438_v61  ;;  %v862_v60 = vld [vmem:[#allocation7 + $0x1660] sm:$0xff]  ;;  %v851_v61 = vld [vmem:[#allocation7 + $0x1608] sm:$0xff] }
 0x31c   :  { %5587 = vmatprep.subr.bf16.mxu1 %v9440_v1  ;;  %v863_v1 = vld [vmem:[#allocation7 + $0x1668] sm:$0xff]  ;;  %v9558_v7 = vcombine.high %v850_v59, %v862_v60  ;;  %v9557_v14 = vcombine.low %v850_v59, %v862_v60  ;;  %v193_v59 = vld [vmem:[#allocation7 + $0x178] sm:$0xff] }
 0x31d   :  { %v9560_v8 = vcombine.high %v851_v61, %v863_v1  ;;  %v9559_v15 = vcombine.low %v851_v61, %v863_v1  ;;  %v204_v1 = vld [vmem:[#allocation7 + $0x1d0] sm:$0xff] }
 0x31e   :  { %5502 = vmatpush1.bf16.msra.mxu0 %v9437_v9  ;;  %v874_v9 = vld [vmem:[#allocation7 + $0x16c0] sm:$0xff] }
 0x31f   :  { %5588 = vmatpush1.bf16.msra.mxu1 %v9439_v49  ;;  %5503 = vmatprep.subr.bf16.mxu0 %v9462_v12  ;;  %v886_v49 = vld [vmem:[#allocation7 + $0x1720] sm:$0xff]  ;;  %v875_v12 = vld [vmem:[#allocation7 + $0x16c8] sm:$0xff] }
 0x320   :  { %5589 = vmatprep.subr.bf16.mxu1 %v9464_v13  ;;  %v887_v13 = vld [vmem:[#allocation7 + $0x1728] sm:$0xff]  ;;  %v9582_v16 = vcombine.high %v874_v9, %v886_v49  ;;  %v9581_v22 = vcombine.low %v874_v9, %v886_v49 }
 0x321   :  { %v9584_v17 = vcombine.high %v875_v12, %v887_v13  ;;  %v9583_v3 = vcombine.low %v875_v12, %v887_v13 }
 0x322   :  { %5504 = vmatpush1.bf16.msra.mxu0 %v9461_v18  ;;  %v898_v18 = vld [vmem:[#allocation7 + $0x1780] sm:$0xff] }
 0x323   :  { %5590 = vmatpush1.bf16.msra.mxu1 %v9463_v19  ;;  %5505 = vmatprep.subr.bf16.mxu0 %v9486_v20  ;;  %v910_v19 = vld [vmem:[#allocation7 + $0x17e0] sm:$0xff]  ;;  %v899_v20 = vld [vmem:[#allocation7 + $0x1788] sm:$0xff] }
 0x324   :  { %5591 = vmatprep.subr.bf16.mxu1 %v9488_v21  ;;  %v911_v21 = vld [vmem:[#allocation7 + $0x17e8] sm:$0xff]  ;;  %v9606_v26 = vcombine.high %v898_v18, %v910_v19  ;;  %v9605_v38 = vcombine.low %v898_v18, %v910_v19 }
 0x325   :  { %v9608_v28 = vcombine.high %v899_v20, %v911_v21  ;;  %v9607_v47 = vcombine.low %v899_v20, %v911_v21 }
 0x326   :  { %5506 = vmatpush1.bf16.msra.mxu0 %v9485_v29  ;;  %v156_v29 = vld [vmem:[#allocation7 + $0x50] sm:$0xff] }
 0x327   :  { %5592 = vmatpush1.bf16.msra.mxu1 %v9487_v30  ;;  %5507 = vmatprep.subr.bf16.mxu0 %v9510_v33  ;;  %v168_v30 = vld [vmem:[#allocation7 + $0xb0] sm:$0xff]  ;;  %v157_v33 = vld [vmem:[#allocation7 + $0x58] sm:$0xff] }
 0x328   :  { %5593 = vmatprep.subr.bf16.mxu1 %v9512_v34  ;;  %v169_v34 = vld [vmem:[#allocation7 + $0xb8] sm:$0xff]  ;;  %v8866_v51 = vcombine.high %v156_v29, %v168_v30 }
 0x329   :  { %v8868_v54 = vcombine.high %v157_v33, %v169_v34  ;;  %v8867_v60 = vcombine.low %v157_v33, %v169_v34  ;;  %v276_v34 = vld [vmem:[#allocation7 + $0x410] sm:$0xff] }
 0x32a   :  { %5508 = vmatpush1.bf16.msra.mxu0 %v9509_v55  ;;  %v180_v55 = vld [vmem:[#allocation7 + $0x110] sm:$0xff] }
 0x32b   :  { %5594 = vmatpush1.bf16.msra.mxu1 %v9511_v56  ;;  %5509 = vmatprep.subr.bf16.mxu0 %v9534_v57  ;;  %v192_v56 = vld [vmem:[#allocation7 + $0x170] sm:$0xff]  ;;  %v8865_v57 = vcombine.low %v156_v29, %v168_v30 }
 0x32c   :  { %5595 = vmatprep.subr.bf16.mxu1 %v9536_v58  ;;  %v181_v58 = vld [vmem:[#allocation7 + $0x118] sm:$0xff]  ;;  %v8890_v61 = vcombine.high %v180_v55, %v192_v56  ;;  %v8889_v9 = vcombine.low %v180_v55, %v192_v56 }
 0x32d   :  { %v8891_v49 = vcombine.low %v181_v58, %v193_v59 }
 0x32e   :  { %5510 = vmatpush1.bf16.msra.mxu0 %v9533_v5  ;;  %v216_v5 = vld [vmem:[#allocation7 + $0x230] sm:$0xff] }
 0x32f   :  { %5596 = vmatpush1.bf16.msra.mxu1 %v9535_v6  ;;  %5511 = vmatprep.subr.bf16.mxu0 %v9558_v7  ;;  %v8892_v6 = vcombine.high %v181_v58, %v193_v59  ;;  %v205_v7 = vld [vmem:[#allocation7 + $0x1d8] sm:$0xff]  ;;  %v8914_v12 = vcombine.high %v204_v1, %v216_v5  ;;  %v8913_v18 = vcombine.low %v204_v1, %v216_v5  ;;  %v300_v58 = vld [vmem:[#allocation7 + $0x4d0] sm:$0xff] }
 0x330   :  { %5597 = vmatprep.subr.bf16.mxu1 %v9560_v8  ;;  %v217_v8 = vld [vmem:[#allocation7 + $0x238] sm:$0xff]  ;;  %v312_v59 = vld [vmem:[#allocation7 + $0x530] sm:$0xff] }
 0x331   :  { %v8916_v13 = vcombine.high %v205_v7, %v217_v8  ;;  %v8915_v19 = vcombine.low %v205_v7, %v217_v8  ;;  %v324_v8 = vld [vmem:[#allocation7 + $0x590] sm:$0xff] }
 0x332   :  { %5512 = vmatpush1.bf16.msra.mxu0 %v9557_v14  ;;  %v228_v14 = vld [vmem:[#allocation7 + $0x290] sm:$0xff] }
 0x333   :  { %5598 = vmatpush1.bf16.msra.mxu1 %v9559_v15  ;;  %5513 = vmatprep.subr.bf16.mxu0 %v9582_v16  ;;  %v240_v15 = vld [vmem:[#allocation7 + $0x2f0] sm:$0xff]  ;;  %v229_v16 = vld [vmem:[#allocation7 + $0x298] sm:$0xff] }
 0x334   :  { %5599 = vmatprep.subr.bf16.mxu1 %v9584_v17  ;;  %v241_v17 = vld [vmem:[#allocation7 + $0x2f8] sm:$0xff]  ;;  %v8938_v20 = vcombine.high %v228_v14, %v240_v15 }
 0x335   :  { %v8940_v21 = vcombine.high %v229_v16, %v241_v17  ;;  %v8939_v29 = vcombine.low %v229_v16, %v241_v17  ;;  %v348_v17 = vld [vmem:[#allocation7 + $0x650] sm:$0xff] }
 0x336   :  { %5514 = vmatpush1.bf16.msra.mxu0 %v9581_v22  ;;  %v252_v22 = vld [vmem:[#allocation7 + $0x350] sm:$0xff] }
 0x337   :  { %5600 = vmatpush1.bf16.msra.mxu1 %v9583_v3  ;;  %5515 = vmatprep.subr.bf16.mxu0 %v9606_v26  ;;  %v264_v3 = vld [vmem:[#allocation7 + $0x3b0] sm:$0xff]  ;;  %v253_v26 = vld [vmem:[#allocation7 + $0x358] sm:$0xff] }
 0x338   :  { %5601 = vmatprep.subr.bf16.mxu1 %v9608_v28  ;;  %v265_v28 = vld [vmem:[#allocation7 + $0x3b8] sm:$0xff]  ;;  %v8962_v30 = vcombine.high %v252_v22, %v264_v3 }
 0x339   :  { %v8964_v33 = vcombine.high %v253_v26, %v265_v28  ;;  %v8963_v55 = vcombine.low %v253_v26, %v265_v28  ;;  %v372_v28 = vld [vmem:[#allocation7 + $0x710] sm:$0xff] }
 0x33a   :  { %5516 = vmatpush1.bf16.msra.mxu0 %v9605_v38  ;;  %v288_v38 = vld [vmem:[#allocation7 + $0x470] sm:$0xff] }
 0x33b   :  { %5602 = vmatpush1.bf16.msra.mxu1 %v9607_v47  ;;  %5614 = vmatprep.subr.bf16.mxu0 %v8866_v51  ;;  %v277_v47 = vld [vmem:[#allocation7 + $0x418] sm:$0xff]  ;;  %v8986_v56 = vcombine.high %v276_v34, %v288_v38  ;;  %v8985_v1 = vcombine.low %v276_v34, %v288_v38 }
 0x33c   :  { %5700 = vmatprep.subr.bf16.mxu1 %v8868_v54  ;;  %v289_v51 = vld [vmem:[#allocation7 + $0x478] sm:$0xff]  ;;  %v8961_v54 = vcombine.low %v252_v22, %v264_v3 }
 0x33d   :  { %5518 = vmatmul.mubr.bf16.vlgmr.msra.gmra.mrb[16].mxu0 %v11060_v25  ;;  %v8987_v5 = vcombine.low %v277_v47, %v289_v51 }
 0x33e   :  { %5604 = vmatmul.mubr.bf16.vlgmr.msra.gmra.mrb[16].mxu1 %v11060_v25  ;;  %5615 = vmatpush1.bf16.msra.mxu0 %v8865_v57  ;;  %v8988_v57 = vcombine.high %v277_v47, %v289_v51  ;;  %v396_v51 = vld [vmem:[#allocation7 + $0x7d0] sm:$0xff] }
 0x33f   :  { %5646 = vmatprep.mubr.bf16.mxu0 %v11058_v24  ;;  %5701 = vmatpush1.bf16.msra.mxu1 %v8867_v60  ;;  %v301_v60 = vld [vmem:[#allocation7 + $0x4d8] sm:$0xff] }
 0x340   :  { %5732 = vmatprep.mubr.bf16.mxu1 %v11058_v24  ;;  %5616 = vmatprep.subr.bf16.mxu0 %v8890_v61  ;;  %v8937_v24 = vcombine.low %v228_v14, %v240_v15  ;;  %v313_v61 = vld [vmem:[#allocation7 + $0x538] sm:$0xff] }
 0x341   :  { %5702 = vmatprep.subr.bf16.mxu1 %v8892_v6  ;;  %v9010_v6 = vcombine.high %v300_v58, %v312_v59  ;;  %v9012_v7 = vcombine.high %v301_v60, %v313_v61  ;;  %v9011_v14 = vcombine.low %v301_v60, %v313_v61  ;;  %v420_v61 = vld [vmem:[#allocation7 + $0x890] sm:$0xff] }
 0x342   :  { %5617 = vmatpush1.bf16.msra.mxu0 %v8889_v9  ;;  %v336_v9 = vld [vmem:[#allocation7 + $0x5f0] sm:$0xff] }
 0x343   :  { %5703 = vmatpush1.bf16.msra.mxu1 %v8891_v49  ;;  %5618 = vmatprep.subr.bf16.mxu0 %v8914_v12  ;;  %v325_v49 = vld [vmem:[#allocation7 + $0x598] sm:$0xff]  ;;  %v9034_v15 = vcombine.high %v324_v8, %v336_v9 }
 0x344   :  { %5704 = vmatprep.subr.bf16.mxu1 %v8916_v13  ;;  %v337_v12 = vld [vmem:[#allocation7 + $0x5f8] sm:$0xff]  ;;  %v9009_v13 = vcombine.low %v300_v58, %v312_v59 }
 0x345   :  { %v9036_v16 = vcombine.high %v325_v49, %v337_v12  ;;  %v9035_v22 = vcombine.low %v325_v49, %v337_v12  ;;  %v444_v12 = vld [vmem:[#allocation7 + $0x950] sm:$0xff] }
 0x346   :  { %5619 = vmatpush1.bf16.msra.mxu0 %v8913_v18  ;;  %v360_v18 = vld [vmem:[#allocation7 + $0x6b0] sm:$0xff] }
 0x347   :  { %5705 = vmatpush1.bf16.msra.mxu1 %v8915_v19  ;;  %5620 = vmatprep.subr.bf16.mxu0 %v8938_v20  ;;  %v349_v19 = vld [vmem:[#allocation7 + $0x658] sm:$0xff]  ;;  %v9058_v3 = vcombine.high %v348_v17, %v360_v18 }
 0x348   :  { %5706 = vmatprep.subr.bf16.mxu1 %v8940_v21  ;;  %v361_v20 = vld [vmem:[#allocation7 + $0x6b8] sm:$0xff]  ;;  %v9033_v21 = vcombine.low %v324_v8, %v336_v9 }
 0x349   :  { %v9060_v26 = vcombine.high %v349_v19, %v361_v20  ;;  %v9059_v34 = vcombine.low %v349_v19, %v361_v20  ;;  %v9613_v19 = vmul.f32 -1.442695, %v11092_v39 }
 0x34a   :  { %5621 = vmatpush1.bf16.msra.mxu0 %v8937_v24  ;;  %v384_v24 = vld [vmem:[#allocation7 + $0x770] sm:$0xff] }
 0x34b   :  { %5707 = vmatpush1.bf16.msra.mxu1 %v8939_v29  ;;  %5622 = vmatprep.subr.bf16.mxu0 %v8962_v30  ;;  %v373_v29 = vld [vmem:[#allocation7 + $0x718] sm:$0xff]  ;;  %v9082_v38 = vcombine.high %v372_v28, %v384_v24  ;;  %10700 = vpow2.f32 %v9613_v19 }
 0x34c   :  { %5708 = vmatprep.subr.bf16.mxu1 %v8964_v33  ;;  %v385_v30 = vld [vmem:[#allocation7 + $0x778] sm:$0xff]  ;;  %v9057_v33 = vcombine.low %v348_v17, %v360_v18 }
 0x34d   :  { %v9084_v47 = vcombine.high %v373_v29, %v385_v30  ;;  %v9083_v58 = vcombine.low %v373_v29, %v385_v30  ;;  %v9616_v30 = vmul.f32 -1.442695, %v11098_v11 }
 0x34e   :  { %5623 = vmatpush1.bf16.msra.mxu0 %v8961_v54  ;;  %v408_v54 = vld [vmem:[#allocation7 + $0x830] sm:$0xff] }
 0x34f   :  { %5709 = vmatpush1.bf16.msra.mxu1 %v8963_v55  ;;  %5624 = vmatprep.subr.bf16.mxu0 %v8986_v56  ;;  %v397_v55 = vld [vmem:[#allocation7 + $0x7d8] sm:$0xff]  ;;  %v9106_v59 = vcombine.high %v396_v51, %v408_v54 }
 0x350   :  { %5710 = vmatprep.subr.bf16.mxu1 %v8988_v57  ;;  %v409_v56 = vld [vmem:[#allocation7 + $0x838] sm:$0xff]  ;;  %v9081_v57 = vcombine.low %v372_v28, %v384_v24  ;;  %v9614_v24 = vmul.f32 -1.442695, %v11096_v10 }
 0x351   :  { %v9108_v60 = vcombine.high %v397_v55, %v409_v56  ;;  %v9107_v8 = vcombine.low %v397_v55, %v409_v56  ;;  %v481_v28 = vld [vmem:[#allocation7 + $0xa78] sm:$0xff]  ;;  %v9627_v55 = vmul.f32 -1.442695, %v11102_v43 }
 0x352   :  { %5625 = vmatpush1.bf16.msra.mxu0 %v8985_v1  ;;  %v432_v1 = vld [vmem:[#allocation7 + $0x8f0] sm:$0xff]  ;;  %v493_v56 = vld [vmem:[#allocation7 + $0xad8] sm:$0xff] }
 0x353   :  { %5711 = vmatpush1.bf16.msra.mxu1 %v8987_v5  ;;  %5626 = vmatprep.subr.bf16.mxu0 %v9010_v6  ;;  %v421_v5 = vld [vmem:[#allocation7 + $0x898] sm:$0xff]  ;;  %v9130_v9 = vcombine.high %v420_v61, %v432_v1 }
 0x354   :  { %5712 = vmatprep.subr.bf16.mxu1 %v9012_v7  ;;  %v433_v6 = vld [vmem:[#allocation7 + $0x8f8] sm:$0xff]  ;;  %v9105_v7 = vcombine.low %v396_v51, %v408_v54  ;;  %v492_v51 = vld [vmem:[#allocation7 + $0xad0] sm:$0xff] }
 0x355   :  { %v9132_v49 = vcombine.high %v421_v5, %v433_v6  ;;  %v9131_v17 = vcombine.low %v421_v5, %v433_v6  ;;  %v504_v54 = vld [vmem:[#allocation7 + $0xb30] sm:$0xff]  ;;  %v10701_v19 = vpop.eup %10700 }
 0x356   :  { %5627 = vmatpush1.bf16.msra.mxu0 %v9009_v13  ;;  %v456_v13 = vld [vmem:[#allocation7 + $0x9b0] sm:$0xff] }
 0x357   :  { %5713 = vmatpush1.bf16.msra.mxu1 %v9011_v14  ;;  %5628 = vmatprep.subr.bf16.mxu0 %v9034_v15  ;;  %v445_v14 = vld [vmem:[#allocation7 + $0x958] sm:$0xff]  ;;  %v9154_v18 = vcombine.high %v444_v12, %v456_v13  ;;  %v9153_v29 = vcombine.low %v444_v12, %v456_v13  ;;  %v516_v6 = vld [vmem:[#allocation7 + $0xb90] sm:$0xff] }
 0x358   :  { %5714 = vmatprep.subr.bf16.mxu1 %v9036_v16  ;;  %v457_v15 = vld [vmem:[#allocation7 + $0x9b8] sm:$0xff]  ;;  %v9129_v16 = vcombine.low %v420_v61, %v432_v1  ;;  %v9202_v1 = vcombine.high %v492_v51, %v504_v54 }
 0x359   :  { %v9156_v20 = vcombine.high %v445_v14, %v457_v15 }
 0x35a   :  { %5629 = vmatpush1.bf16.msra.mxu0 %v9033_v21  ;;  %v468_v21 = vld [vmem:[#allocation7 + $0xa10] sm:$0xff] }
 0x35b   :  { %5715 = vmatpush1.bf16.msra.mxu1 %v9035_v22  ;;  %5630 = vmatprep.subr.bf16.mxu0 %v9058_v3  ;;  %v480_v22 = vld [vmem:[#allocation7 + $0xa70] sm:$0xff]  ;;  %v9615_v3 = vmul.f32 -1.442695, %v11094_v62 }
 0x35c   :  { %5716 = vmatprep.subr.bf16.mxu1 %v9060_v26  ;;  %v469_v26 = vld [vmem:[#allocation7 + $0xa18] sm:$0xff] }
 0x35d   :  { %10702 = vpow2.f32 %v9615_v3  ;;  %v9179_v61 = vcombine.low %v469_v26, %v481_v28 }
 0x35e   :  { %5631 = vmatpush1.bf16.msra.mxu0 %v9057_v33  ;;  %v9155_v33 = vcombine.low %v445_v14, %v457_v15  ;;  %10704 = vpow2.f32 %v9614_v24  ;;  %v540_v15 = vld [vmem:[#allocation7 + $0xc50] sm:$0xff] }
 0x35f   :  { %5717 = vmatpush1.bf16.msra.mxu1 %v9059_v34  ;;  %5632 = vmatprep.subr.bf16.mxu0 %v9082_v38  ;;  %v9178_v34 = vcombine.high %v468_v21, %v480_v22  ;;  %v9625_v38 = vmul.f32 -1.442695, %v11100_v42  ;;  %10706 = vpow2.f32 %v9616_v30  ;;  %v564_v30 = vld [vmem:[#allocation7 + $0xd10] sm:$0xff] }
 0x360   :  { %5718 = vmatprep.subr.bf16.mxu1 %v9084_v47  ;;  %v9180_v47 = vcombine.high %v469_v26, %v481_v28 }
 0x361   :  { %10708 = vpow2.f32 %v9625_v38 }
 0x362   :  { %5633 = vmatpush1.bf16.msra.mxu0 %v9081_v57  ;;  %v505_v57 = vld [vmem:[#allocation7 + $0xb38] sm:$0xff]  ;;  %10710 = vpow2.f32 %v9627_v55 }
 0x363   :  { %5719 = vmatpush1.bf16.msra.mxu1 %v9083_v58  ;;  %5634 = vmatprep.subr.bf16.mxu0 %v9106_v59  ;;  %v9626_v58 = vmul.f32 -1.442695, %v11104_v45  ;;  %v9177_v59 = vcombine.low %v468_v21, %v480_v22  ;;  %v9204_v5 = vcombine.high %v493_v56, %v505_v57  ;;  %v9203_v12 = vcombine.low %v493_v56, %v505_v57 }
 0x364   :  { %5720 = vmatprep.subr.bf16.mxu1 %v9108_v60  ;;  %v9628_v60 = vmul.f32 -1.442695, %v11106_v46 }
 0x365   :  { %10712 = vpow2.f32 %v9626_v58 }
 0x366   :  { %5635 = vmatpush1.bf16.msra.mxu0 %v9105_v7  ;;  %v528_v7 = vld [vmem:[#allocation7 + $0xbf0] sm:$0xff]  ;;  %10714 = vpow2.f32 %v9628_v60 }
 0x367   :  { %5721 = vmatpush1.bf16.msra.mxu1 %v9107_v8  ;;  %5636 = vmatprep.subr.bf16.mxu0 %v9130_v9  ;;  %v517_v8 = vld [vmem:[#allocation7 + $0xb98] sm:$0xff]  ;;  %v9226_v13 = vcombine.high %v516_v6, %v528_v7  ;;  %v10703_v21 = vpop.eup %10702 }
 0x368   :  { %5722 = vmatprep.subr.bf16.mxu1 %v9132_v49  ;;  %v529_v9 = vld [vmem:[#allocation7 + $0xbf8] sm:$0xff]  ;;  %v9201_v49 = vcombine.low %v492_v51, %v504_v54  ;;  %v10705_v26 = vpop.eup %10704  ;;  %v5860_v38 = vadd.f32 1.0, %v10703_v21 }
 0x369   :  { %v9228_v14 = vcombine.high %v517_v8, %v529_v9  ;;  %v9227_v22 = vcombine.low %v517_v8, %v529_v9  ;;  %v10707_v24 = vpop.eup %10706  ;;  %v565_v51 = vld [vmem:[#allocation7 + $0xd18] sm:$0xff]  ;;  %v5859_v56 = vadd.f32 1.0, %v10705_v26 }
 0x36a   :  { %5637 = vmatpush1.bf16.msra.mxu0 %v9129_v16  ;;  %v552_v16 = vld [vmem:[#allocation7 + $0xcb0] sm:$0xff]  ;;  %v577_v54 = vld [vmem:[#allocation7 + $0xd78] sm:$0xff] }
 0x36b   :  { %5723 = vmatpush1.bf16.msra.mxu1 %v9131_v17  ;;  %5638 = vmatprep.subr.bf16.mxu0 %v9154_v18  ;;  %v541_v17 = vld [vmem:[#allocation7 + $0xc58] sm:$0xff]  ;;  %v9250_v3 = vcombine.high %v540_v15, %v552_v16 }
 0x36c   :  { %5724 = vmatprep.subr.bf16.mxu1 %v9156_v20  ;;  %v553_v18 = vld [vmem:[#allocation7 + $0xcb8] sm:$0xff]  ;;  %v9225_v20 = vcombine.low %v516_v6, %v528_v7  ;;  %v9276_v7 = vcombine.high %v565_v51, %v577_v54 }
 0x36d   :  { %v9252_v28 = vcombine.high %v541_v17, %v553_v18  ;;  %v9251_v57 = vcombine.low %v541_v17, %v553_v18  ;;  %v589_v8 = vld [vmem:[#allocation7 + $0xdd8] sm:$0xff]  ;;  %v612_v18 = vld [vmem:[#allocation7 + $0xe90] sm:$0xff] }
 0x36e   :  { %5639 = vmatpush1.bf16.msra.mxu0 %v9153_v29  ;;  %v5858_v29 = vadd.f32 1.0, %v10701_v19  ;;  %v601_v9 = vld [vmem:[#allocation7 + $0xe38] sm:$0xff]  ;;  %v624_v19 = vld [vmem:[#allocation7 + $0xef0] sm:$0xff] }
 0x36f   :  { %5725 = vmatpush1.bf16.msra.mxu1 %v9155_v33  ;;  %5640 = vmatprep.subr.bf16.mxu0 %v9178_v34  ;;  %v576_v33 = vld [vmem:[#allocation7 + $0xd70] sm:$0xff]  ;;  %v10709_v34 = vpop.eup %10708  ;;  %v9300_v17 = vcombine.high %v589_v8, %v601_v9 }
 0x370   :  { %5726 = vmatprep.subr.bf16.mxu1 %v9180_v47  ;;  %v9249_v47 = vcombine.low %v540_v15, %v552_v16  ;;  %v10711_v55 = vpop.eup %10710  ;;  %v9274_v60 = vcombine.high %v564_v30, %v576_v33  ;;  %10716 = vrcp.f32 %v5858_v29  ;;  %v5870_v6 = vadd.f32 1.0, %v10709_v34  ;;  %v649_v29 = vld [vmem:[#allocation7 + $0xfb8] sm:$0xff] }
 0x371   :  { %v10713_v58 = vpop.eup %10712  ;;  %10718 = vrcp.f32 %v5860_v38 }
 0x372   :  { %5641 = vmatpush1.bf16.msra.mxu0 %v9177_v59  ;;  %v5861_v59 = vadd.f32 1.0, %v10707_v24  ;;  %10720 = vrcp.f32 %v5859_v56  ;;  %v637_v24 = vld [vmem:[#allocation7 + $0xf58] sm:$0xff] }
 0x373   :  { %5727 = vmatpush1.bf16.msra.mxu1 %v9179_v61  ;;  %5642 = vmatprep.subr.bf16.mxu0 %v9202_v1  ;;  %v588_v61 = vld [vmem:[#allocation7 + $0xdd0] sm:$0xff] }
 0x374   :  { %5728 = vmatprep.subr.bf16.mxu1 %v9204_v5  ;;  %v600_v1 = vld [vmem:[#allocation7 + $0xe30] sm:$0xff]  ;;  %v10715_v5 = vpop.eup %10714  ;;  %10722 = vrcp.f32 %v5861_v59 }
 0x375   :  { %v9298_v15 = vcombine.high %v588_v61, %v600_v1  ;;  %v5873_v16 = vadd.f32 1.0, %v10715_v5  ;;  %10724 = vrcp.f32 %v5870_v6  ;;  %v9297_v21 = vcombine.low %v588_v61, %v600_v1 }
 0x376   :  { %5643 = vmatpush1.bf16.msra.mxu0 %v9201_v49  ;;  %v5872_v49 = vadd.f32 1.0, %v10711_v55  ;;  %v672_v55 = vld [vmem:[#allocation7 + $0x1070] sm:$0xff]  ;;  %v9347_v1 = vcombine.low %v637_v24, %v649_v29 }
 0x377   :  { %5729 = vmatpush1.bf16.msra.mxu1 %v9203_v12  ;;  %5644 = vmatprep.subr.bf16.mxu0 %v9226_v13  ;;  %v9273_v12 = vcombine.low %v564_v30, %v576_v33  ;;  %v5871_v13 = vadd.f32 1.0, %v10713_v58  ;;  %v9321_v30 = vcombine.low %v612_v18, %v624_v19  ;;  %v673_v58 = vld [vmem:[#allocation7 + $0x1078] sm:$0xff] }
 0x378   :  { %5730 = vmatprep.subr.bf16.mxu1 %v9228_v14  ;;  %v9275_v14 = vcombine.low %v565_v51, %v577_v54  ;;  %10726 = vrcp.f32 %v5872_v49  ;;  %v9348_v51 = vcombine.high %v637_v24, %v649_v29  ;;  %v660_v54 = vld [vmem:[#allocation7 + $0x1010] sm:$0xff] }
 0x379   :  { %10728 = vrcp.f32 %v5871_v13  ;;  %v9370_v5 = vcombine.high %v660_v54, %v672_v55  ;;  %v697_v13 = vld [vmem:[#allocation7 + $0x1138] sm:$0xff] }
 0x37a   :  { %5645 = vmatpush1.bf16.msra.mxu0 %v9225_v20  ;;  %v625_v20 = vld [vmem:[#allocation7 + $0xef8] sm:$0xff]  ;;  %10730 = vrcp.f32 %v5873_v16  ;;  %v10717_v33 = vpop.eup %10716  ;;  %v9369_v16 = vcombine.low %v660_v54, %v672_v55 }
 0x37b   :  { %5731 = vmatpush1.bf16.msra.mxu1 %v9227_v22  ;;  %5657 = vmatprep.subr.bf16.mxu0 %v9250_v3  ;;  %v9299_v22 = vcombine.low %v589_v8, %v601_v9  ;;  %v9322_v3 = vcombine.high %v612_v18, %v624_v19  ;;  %v684_v8 = vld [vmem:[#allocation7 + $0x10d0] sm:$0xff] }
 0x37c   :  { %5743 = vmatprep.subr.bf16.mxu1 %v9252_v28  ;;  %v648_v28 = vld [vmem:[#allocation7 + $0xfb0] sm:$0xff] }
 0x37d   :  { %5647 = vmatmul.mubr.bf16.vlgmr.msra.gmra.mrb[20].mxu0 %v11056_v23  ;;  %v696_v9 = vld [vmem:[#allocation7 + $0x1130] sm:$0xff] }
 0x37e   :  { %5733 = vmatmul.mubr.bf16.vlgmr.msra.gmra.mrb[20].mxu1 %v11056_v23  ;;  %5658 = vmatpush1.bf16.msra.mxu0 %v9249_v47  ;;  %v613_v23 = vld [vmem:[#allocation7 + $0xe98] sm:$0xff]  ;;  %v10719_v47 = vpop.eup %10718  ;;  %v9394_v19 = vcombine.high %v684_v8, %v696_v9 }
 0x37f   :  { %5689 = vmatprep.mubr.bf16.mxu0 %v11064_v4  ;;  %5744 = vmatpush1.bf16.msra.mxu1 %v9251_v57  ;;  %v9324_v26 = vcombine.high %v613_v23, %v625_v20  ;;  %v9323_v34 = vcombine.low %v613_v23, %v625_v20  ;;  %v10721_v56 = vpop.eup %10720  ;;  %v661_v57 = vld [vmem:[#allocation7 + $0x1018] sm:$0xff] }
 0x380   :  { %5775 = vmatprep.mubr.bf16.mxu1 %v11064_v4  ;;  %5659 = vmatprep.subr.bf16.mxu0 %v9274_v60  ;;  %v636_v4 = vld [vmem:[#allocation7 + $0xf50] sm:$0xff]  ;;  %v10723_v59 = vpop.eup %10722  ;;  %v9371_v18 = vcombine.low %v661_v57, %v673_v58  ;;  %v5931_v23 = vmul.f32 %v10721_v56, %v11096_v10  ;;  %v721_v10 = vld [vmem:[#allocation7 + $0x11f8] sm:$0xff] }
 0x381   :  { %5745 = vmatprep.subr.bf16.mxu1 %v9276_v7  ;;  %v9346_v38 = vcombine.high %v636_v4, %v648_v28  ;;  %v9345_v60 = vcombine.low %v636_v4, %v648_v28  ;;  %v10725_v61 = vpop.eup %10724  ;;  %v9372_v7 = vcombine.high %v661_v57, %v673_v58  ;;  %v5933_v20 = vmul.f32 %v10723_v59, %v11098_v11  ;;  %v720_v4 = vld [vmem:[#allocation7 + $0x11f0] sm:$0xff] }
 0x382   :  { %5660 = vmatpush1.bf16.msra.mxu0 %v9273_v12  ;;  %v10727_v6 = vpop.eup %10726  ;;  %v685_v12 = vld [vmem:[#allocation7 + $0x10d8] sm:$0xff] }
 0x383   :  { %5746 = vmatpush1.bf16.msra.mxu1 %v9275_v14  ;;  %5661 = vmatprep.subr.bf16.mxu0 %v9298_v15  ;;  %v10729_v49 = vpop.eup %10728  ;;  %v5930_v15 = vmul.f32 %v10717_v33, %v11092_v39  ;;  %v5944_v39 = vmul.f32 %v10727_v6, %v11102_v43  ;;  %v709_v33 = vld [vmem:[#allocation7 + $0x1198] sm:$0xff] }
 0x384   :  { %5747 = vmatprep.subr.bf16.mxu1 %v9300_v17  ;;  %v10731_v14 = vpop.eup %10730  ;;  %v5932_v17 = vmul.f32 %v10719_v47, %v11094_v62  ;;  %v5943_v28 = vmul.f32 %v10729_v49, %v11104_v45  ;;  %v9393_v47 = vcombine.low %v684_v8, %v696_v9  ;;  %v9420_v59 = vcombine.high %v709_v33, %v721_v10  ;;  %v733_v6 = vld [vmem:[#allocation7 + $0x1258] sm:$0xff] }
 0x385   :  { %v5945_v62 = vmul.f32 %v10731_v14, %v11106_v46 }
 0x386   :  { %5662 = vmatpush1.bf16.msra.mxu0 %v9297_v21  ;;  %v5942_v21 = vmul.f32 %v10725_v61, %v11100_v42  ;;  %v744_v61 = vld [vmem:[#allocation7 + $0x12b0] sm:$0xff] }
 0x387   :  { %5748 = vmatpush1.bf16.msra.mxu1 %v9299_v22  ;;  %5663 = vmatprep.subr.bf16.mxu0 %v9322_v3  ;;  %v9396_v3 = vcombine.high %v685_v12, %v697_v13 }
 0x388   :  { %5749 = vmatprep.subr.bf16.mxu1 %v9324_v26  ;;  %v708_v26 = vld [vmem:[#allocation7 + $0x1190] sm:$0xff] }
 0x389   :  { %v9418_v45 = vcombine.high %v708_v26, %v720_v4  ;;  %v9417_v49 = vcombine.low %v708_v26, %v720_v4  ;;  %v792_v26 = vld [vmem:[#allocation7 + $0x1430] sm:$0xff]  ;;  %v781_v4 = vld [vmem:[#allocation7 + $0x13d8] sm:$0xff] }
 0x38a   :  { %5664 = vmatpush1.bf16.msra.mxu0 %v9321_v30 }
 0x38b   :  { %5750 = vmatpush1.bf16.msra.mxu1 %v9323_v34  ;;  %5665 = vmatprep.subr.bf16.mxu0 %v9346_v38 }
 0x38c   :  { %5751 = vmatprep.subr.bf16.mxu1 %v9348_v51  ;;  %v9395_v51 = vcombine.low %v685_v12, %v697_v13  ;;  %v9419_v13 = vcombine.low %v709_v33, %v721_v10  ;;  %v816_v33 = vld [vmem:[#allocation7 + $0x14f0] sm:$0xff]  ;;  %v805_v10 = vld [vmem:[#allocation7 + $0x1498] sm:$0xff] }
 0x38e   :  { %5666 = vmatpush1.bf16.msra.mxu0 %v9345_v60  ;;  %v732_v60 = vld [vmem:[#allocation7 + $0x1250] sm:$0xff] }
 0x38f   :  { %5752 = vmatpush1.bf16.msra.mxu1 %v9347_v1  ;;  %5667 = vmatprep.subr.bf16.mxu0 %v9370_v5  ;;  %v9442_v14 = vcombine.high %v732_v60, %v744_v61 }
 0x390   :  { %v5347_v22 = vpop.f32.mrb[12].mxu0  ;;  %5753 = vmatprep.subr.bf16.mxu1 %v9372_v7  ;;  %v745_v7 = vld [vmem:[#allocation7 + $0x12b8] sm:$0xff] }
 0x391   :  { %v5954_v24 = vmul.f32 %v5930_v15, %v5347_v22  ;;  %v5433_v29 = vpop.f32.mrb[12].mxu1  ;;  %v5349_v30 = vpop.f32.mrb[13].mxu0  ;;  %v9444_v15 = vcombine.high %v733_v6, %v745_v7 }
 0x392   :  { %v5956_v34 = vmul.f32 %v5932_v17, %v5433_v29  ;;  %v5955_v11 = vmul.f32 %v5931_v23, %v5349_v30  ;;  %v5435_v38 = vpop.f32.mrb[13].mxu1  ;;  %v5351_v42 = vpop.f32.mrb[14].mxu0  ;;  %5668 = vmatpush1.bf16.msra.mxu0 %v9369_v16  ;;  %v756_v16 = vld [vmem:[#allocation7 + $0x1310] sm:$0xff]  ;;  %v9441_v23 = vcombine.low %v732_v60, %v744_v61  ;;  %v853_v60 = vld [vmem:[#allocation7 + $0x1618] sm:$0xff] }
 0x393   :  { %v5957_v54 = vmul.f32 %v5933_v20, %v5435_v38  ;;  %v5966_v55 = vmul.f32 %v5942_v21, %v5351_v42  ;;  %v5437_v56 = vpop.f32.mrb[14].mxu1  ;;  %5754 = vmatpush1.bf16.msra.mxu1 %v9371_v18  ;;  %v5353_v43 = vpop.f32.mrb[15].mxu0  ;;  %5669 = vmatprep.subr.bf16.mxu0 %v9394_v19  ;;  %v768_v17 = vld [vmem:[#allocation7 + $0x1370] sm:$0xff]  ;;  %v757_v18 = vld [vmem:[#allocation7 + $0x1318] sm:$0xff]  ;;  %v9443_v20 = vcombine.low %v733_v6, %v745_v7 }
 0x394   :  { %v5968_v46 = vmul.f32 %v5944_v39, %v5437_v56  ;;  %v5967_v57 = vmul.f32 %v5943_v28, %v5353_v43  ;;  %v5439_v58 = vpop.f32.mrb[15].mxu1  ;;  %5755 = vmatprep.subr.bf16.mxu1 %v9396_v3  ;;  %v769_v19 = vld [vmem:[#allocation7 + $0x1378] sm:$0xff]  ;;  %v9466_v21 = vcombine.high %v756_v16, %v768_v17  ;;  %v780_v3 = vld [vmem:[#allocation7 + $0x13d0] sm:$0xff]  ;;  %v9465_v28 = vcombine.low %v756_v16, %v768_v17 }
 0x395   :  { %v11180_v1 = vpack.c.bf16 %v5966_v55, %v5954_v24  ;;  %v5969_v5 = vmul.f32 %v5945_v62, %v5439_v58  ;;  %v9468_v22 = vcombine.high %v757_v18, %v769_v19  ;;  %v793_v39 = vld [vmem:[#allocation7 + $0x1438] sm:$0xff]  ;;  %v9467_v62 = vcombine.low %v757_v18, %v769_v19  ;;  %v804_v30 = vld [vmem:[#allocation7 + $0x1490] sm:$0xff] }
 0x396   :  { %v11182_v8 = vpack.c.bf16 %v5968_v46, %v5956_v34  ;;  %v11184_v9 = vpack.c.bf16 %v5967_v57, %v5955_v11  ;;  %5670 = vmatpush1.bf16.msra.mxu0 %v9393_v47  ;;  %v9490_v24 = vcombine.high %v780_v3, %v792_v26  ;;  %v9492_v29 = vcombine.high %v781_v4, %v793_v39  ;;  %v817_v34 = vld [vmem:[#allocation7 + $0x14f8] sm:$0xff]  ;;  %v852_v58 = vld [vmem:[#allocation7 + $0x1610] sm:$0xff] }
 0x397   :  { %v11186_v12 = vpack.c.bf16 %v5969_v5, %v5957_v54  ;;  %5756 = vmatpush1.bf16.msra.mxu1 %v9395_v51  ;;  %5671 = vmatprep.subr.bf16.mxu0 %v9418_v45  ;;  %v9489_v11 = vcombine.low %v780_v3, %v792_v26  ;;  %v9491_v38 = vcombine.low %v781_v4, %v793_v39  ;;  %v828_v51 = vld [vmem:[#allocation7 + $0x1550] sm:$0xff]  ;;  %v829_v55 = vld [vmem:[#allocation7 + $0x1558] sm:$0xff] }
 0x398   :  { %5757 = vmatprep.subr.bf16.mxu1 %v9420_v59  ;;  %v9514_v42 = vcombine.high %v804_v30, %v816_v33  ;;  %v9516_v47 = vcombine.high %v805_v10, %v817_v34  ;;  %v840_v54 = vld [vmem:[#allocation7 + $0x15b0] sm:$0xff]  ;;  %v841_v56 = vld [vmem:[#allocation7 + $0x15b8] sm:$0xff]  ;;  %v9513_v43 = vcombine.low %v804_v30, %v816_v33  ;;  %v9515_v45 = vcombine.low %v805_v10, %v817_v34 }
 0x399   :  { %v9538_v46 = vcombine.high %v828_v51, %v840_v54  ;;  %v9540_v57 = vcombine.high %v829_v55, %v841_v56  ;;  %v864_v59 = vld [vmem:[#allocation7 + $0x1670] sm:$0xff]  ;;  %v865_v61 = vld [vmem:[#allocation7 + $0x1678] sm:$0xff]  ;;  %v9537_v5 = vcombine.low %v828_v51, %v840_v54  ;;  %v9539_v6 = vcombine.low %v829_v55, %v841_v56 }
 0x39a   :  { %5672 = vmatpush1.bf16.msra.mxu0 %v9417_v49  ;;  %v9562_v7 = vcombine.high %v852_v58, %v864_v59  ;;  %v9564_v49 = vcombine.high %v853_v60, %v865_v61  ;;  %v889_v16 = vld [vmem:[#allocation7 + $0x1738] sm:$0xff]  ;;  %v9561_v17 = vcombine.low %v852_v58, %v864_v59  ;;  %v9563_v18 = vcombine.low %v853_v60, %v865_v61  ;;  %v10120_v33 = vld [vmem:[#allocation8] ss:$16 sps:$4 sm:$0xff]   ;;  %v10128_v34 = vld [vmem:[#allocation8 + $0x24] ss:$16 sps:$4 sm:$0xff]  }
 0x39b   :  { %5758 = vmatpush1.bf16.msra.mxu1 %v9419_v13  ;;  %5673 = vmatprep.subr.bf16.mxu0 %v9442_v14  ;;  %v876_v13 = vld [vmem:[#allocation7 + $0x16d0] sm:$0xff]  ;;  %v913_v3 = vld [vmem:[#allocation7 + $0x17f8] sm:$0xff] }
 0x39c   :  { %5759 = vmatprep.subr.bf16.mxu1 %v9444_v15  ;;  %v888_v14 = vld [vmem:[#allocation7 + $0x1730] sm:$0xff]  ;;  %v877_v15 = vld [vmem:[#allocation7 + $0x16d8] sm:$0xff] }
 0x39d   :  { %v9586_v19 = vcombine.high %v876_v13, %v888_v14  ;;  %v9585_v26 = vcombine.low %v876_v13, %v888_v14  ;;  %v9587_v4 = vcombine.low %v877_v15, %v889_v16  ;;  %v10125_v30 = vld [vmem:[#allocation8 + $0xc] ss:$16 sps:$4 sm:$0xff]   ;;  %v10123_v10 = vld [vmem:[#allocation8 + $0x8] ss:$16 sps:$4 sm:$0xff]   ;;  %v10132_v54 = vld [vmem:[#allocation8 + $0x40] ss:$16 sps:$4 sm:$0xff]  }
 0x39e   :  { %5674 = vmatpush1.bf16.msra.mxu0 %v9441_v23  ;;  %v9588_v23 = vcombine.high %v877_v15, %v889_v16  ;;  %v10137_v51 = vld [vmem:[#allocation8 + $0x4c] ss:$16 sps:$4 sm:$0xff]   ;;  %v10135_v55 = vld [vmem:[#allocation8 + $0x48] ss:$16 sps:$4 sm:$0xff]   ;;  %v10140_v56 = vld [vmem:[#allocation8 + $0x64] ss:$16 sps:$4 sm:$0xff]  }
 0x39f   :  { %5760 = vmatpush1.bf16.msra.mxu1 %v9443_v20  ;;  %5675 = vmatprep.subr.bf16.mxu0 %v9466_v21  ;;  %v900_v20 = vld [vmem:[#allocation7 + $0x1790] sm:$0xff]  ;;  %v10147_v58 = vld [vmem:[#allocation8 + $0x88] ss:$16 sps:$4 sm:$0xff]   ;;  %v10155_v60 = vld [vmem:[#allocation8 + $0xac] ss:$16 sps:$4 sm:$0xff]  }
 0x3a0   :  { %5761 = vmatprep.subr.bf16.mxu1 %v9468_v22  ;;  %v912_v21 = vld [vmem:[#allocation7 + $0x17f0] sm:$0xff]  ;;  %v901_v22 = vld [vmem:[#allocation7 + $0x1798] sm:$0xff] }
 0x3a1   :  { %v9610_v39 = vcombine.high %v900_v20, %v912_v21  ;;  %v10152_v59 = vld [vmem:[#allocation8 + $0xa4] ss:$16 sps:$4 sm:$0xff]   ;;  %v10150_v61 = vld [vmem:[#allocation8 + $0xa0] ss:$16 sps:$4 sm:$0xff]   ;;  %v10159_v13 = vld [vmem:[#allocation8 + $0xc8] ss:$16 sps:$4 sm:$0xff]  }
 0x3a2   :  { %5676 = vmatpush1.bf16.msra.mxu0 %v9465_v28  ;;  %v9612_v28 = vcombine.high %v901_v22, %v913_v3  ;;  %v10164_v14 = vld [vmem:[#allocation8 + $0xe4] ss:$16 sps:$4 sm:$0xff]   ;;  %v10167_v15 = vld [vmem:[#allocation8 + $0xec] ss:$16 sps:$4 sm:$0xff]   ;;  %v10162_v16 = vld [vmem:[#allocation8 + $0xe0] ss:$16 sps:$4 sm:$0xff]  }
 0x3a3   :  { %5762 = vmatpush1.bf16.msra.mxu1 %v9467_v62  ;;  %5677 = vmatprep.subr.bf16.mxu0 %v9490_v24  ;;  %v9609_v62 = vcombine.low %v900_v20, %v912_v21  ;;  %v9611_v24 = vcombine.low %v901_v22, %v913_v3  ;;  %v10171_v20 = vld [vmem:[#allocation8 + $0x108] ss:$16 sps:$4 sm:$0xff]   ;;  %v10176_v21 = vld [vmem:[#allocation8 + $0x124] ss:$16 sps:$4 sm:$0xff]   ;;  %v10179_v22 = vld [vmem:[#allocation8 + $0x12c] ss:$16 sps:$4 sm:$0xff]  }
 0x3a4   :  { %5763 = vmatprep.subr.bf16.mxu1 %v9492_v29  ;;  %v10122_v29 = vld [vmem:[#allocation8 + $0x4] ss:$16 sps:$4 sm:$0xff]   ;;  %v10174_v3 = vld [vmem:[#allocation8 + $0x120] ss:$16 sps:$4 sm:$0xff]  }
 0x3a6   :  { %5678 = vmatpush1.bf16.msra.mxu0 %v9489_v11  ;;  %v10131_v11 = vld [vmem:[#allocation8 + $0x2c] ss:$16 sps:$4 sm:$0xff]  }
 0x3a7   :  { %5764 = vmatpush1.bf16.msra.mxu1 %v9491_v38  ;;  %5679 = vmatprep.subr.bf16.mxu0 %v9514_v42  ;;  %v10126_v38 = vld [vmem:[#allocation8 + $0x20] ss:$16 sps:$4 sm:$0xff]   ;;  %v10129_v42 = vld [vmem:[#allocation8 + $0x28] ss:$16 sps:$4 sm:$0xff]  }
 0x3a8   :  { %5765 = vmatprep.subr.bf16.mxu1 %v9516_v47  ;;  %v10134_v47 = vld [vmem:[#allocation8 + $0x44] ss:$16 sps:$4 sm:$0xff]  }
 0x3aa   :  { %5680 = vmatpush1.bf16.msra.mxu0 %v9513_v43  ;;  %v10138_v43 = vld [vmem:[#allocation8 + $0x60] ss:$16 sps:$4 sm:$0xff]  }
 0x3ab   :  { %5766 = vmatpush1.bf16.msra.mxu1 %v9515_v45  ;;  %5681 = vmatprep.subr.bf16.mxu0 %v9538_v46  ;;  %v10141_v45 = vld [vmem:[#allocation8 + $0x68] ss:$16 sps:$4 sm:$0xff]   ;;  %v10146_v46 = vld [vmem:[#allocation8 + $0x84] ss:$16 sps:$4 sm:$0xff]  }
 0x3ac   :  { %5767 = vmatprep.subr.bf16.mxu1 %v9540_v57  ;;  %v10149_v57 = vld [vmem:[#allocation8 + $0x8c] ss:$16 sps:$4 sm:$0xff]  }
 0x3ae   :  { %5682 = vmatpush1.bf16.msra.mxu0 %v9537_v5  ;;  %v10153_v5 = vld [vmem:[#allocation8 + $0xa8] ss:$16 sps:$4 sm:$0xff]  }
 0x3af   :  { %5768 = vmatpush1.bf16.msra.mxu1 %v9539_v6  ;;  %5683 = vmatprep.subr.bf16.mxu0 %v9562_v7  ;;  %v10158_v6 = vld [vmem:[#allocation8 + $0xc4] ss:$16 sps:$4 sm:$0xff]   ;;  %v10161_v7 = vld [vmem:[#allocation8 + $0xcc] ss:$16 sps:$4 sm:$0xff]  }
 0x3b0   :  { %5769 = vmatprep.subr.bf16.mxu1 %v9564_v49  ;;  %v10156_v49 = vld [vmem:[#allocation8 + $0xc0] ss:$16 sps:$4 sm:$0xff]  }
 0x3b2   :  { %5684 = vmatpush1.bf16.msra.mxu0 %v9561_v17  ;;  %v10165_v17 = vld [vmem:[#allocation8 + $0xe8] ss:$16 sps:$4 sm:$0xff]  }
 0x3b3   :  { %5770 = vmatpush1.bf16.msra.mxu1 %v9563_v18  ;;  %5685 = vmatprep.subr.bf16.mxu0 %v9586_v19  ;;  %v10170_v18 = vld [vmem:[#allocation8 + $0x104] ss:$16 sps:$4 sm:$0xff]   ;;  %v10173_v19 = vld [vmem:[#allocation8 + $0x10c] ss:$16 sps:$4 sm:$0xff]  }
 0x3b4   :  { %5771 = vmatprep.subr.bf16.mxu1 %v9588_v23  ;;  %v10168_v23 = vld [vmem:[#allocation8 + $0x100] ss:$16 sps:$4 sm:$0xff]  }
 0x3b6   :  { %5686 = vmatpush1.bf16.msra.mxu0 %v9585_v26  ;;  %v10177_v26 = vld [vmem:[#allocation8 + $0x128] ss:$16 sps:$4 sm:$0xff]  }
 0x3b7   :  { %5772 = vmatpush1.bf16.msra.mxu1 %v9587_v4  ;;  %5687 = vmatprep.subr.bf16.mxu0 %v9610_v39  ;;  %v10182_v4 = vld [vmem:[#allocation8 + $0x144] ss:$16 sps:$4 sm:$0xff]   ;;  %v10185_v39 = vld [vmem:[#allocation8 + $0x14c] ss:$16 sps:$4 sm:$0xff]  }
 0x3b8   :  { %5773 = vmatprep.subr.bf16.mxu1 %v9612_v28  ;;  %v10180_v28 = vld [vmem:[#allocation8 + $0x140] ss:$16 sps:$4 sm:$0xff]  }
 0x3ba   :  { %5688 = vmatpush1.bf16.msra.mxu0 %v9609_v62  ;;  %v10183_v62 = vld [vmem:[#allocation8 + $0x148] ss:$16 sps:$4 sm:$0xff]  }
 0x3bb   :  { %5774 = vmatpush1.bf16.msra.mxu1 %v9611_v24  ;;  %8294 = vmatprep.subr.bf16.mxu0 %v10122_v29  ;;  %v10188_v24 = vld [vmem:[#allocation8 + $0x164] ss:$16 sps:$4 sm:$0xff]   ;;  %v10191_v29 = vld [vmem:[#allocation8 + $0x16c] ss:$16 sps:$4 sm:$0xff]  }
 0x3bc   :  { %8552 = vmatprep.subr.bf16.mxu1 %v10125_v30  ;;  %v10186_v30 = vld [vmem:[#allocation8 + $0x160] ss:$16 sps:$4 sm:$0xff]  }
 0x3bd   :  { %5690 = vmatmul.mubr.bf16.vlgmr.msra.gmra.mrb[20].mxu0 %v11060_v25 }
 0x3be   :  { %5776 = vmatmul.mubr.bf16.vlgmr.msra.gmra.mrb[20].mxu1 %v11060_v25  ;;  %8295 = vmatpush1.bf16.msra.mxu0 %v10120_v33  ;;  %v10143_v25 = vld [vmem:[#allocation8 + $0x6c] ss:$16 sps:$4 sm:$0xff]   ;;  %v10189_v33 = vld [vmem:[#allocation8 + $0x168] ss:$16 sps:$4 sm:$0xff]  }
 0x3bf   :  { %8326 = vmatprep.mubr.bf16.mxu0 %v11184_v9  ;;  %8553 = vmatpush1.bf16.msra.mxu1 %v10123_v10  ;;  %v10194_v10 = vld [vmem:[#allocation8 + $0x184] ss:$16 sps:$4 sm:$0xff]  }
 0x3c0   :  { %8584 = vmatprep.mubr.bf16.mxu1 %v11184_v9  ;;  %8296 = vmatprep.subr.bf16.mxu0 %v10128_v34  ;;  %v10144_v9 = vld [vmem:[#allocation8 + $0x80] ss:$16 sps:$4 sm:$0xff]   ;;  %v10197_v34 = vld [vmem:[#allocation8 + $0x18c] ss:$16 sps:$4 sm:$0xff]  }
 0x3c1   :  { %8554 = vmatprep.subr.bf16.mxu1 %v10131_v11  ;;  %v9617_v11 = vmul.f32 -1.442695, %v11116_v35 }
 0x3c2   :  { %8297 = vmatpush1.bf16.msra.mxu0 %v10126_v38  ;;  %v10192_v38 = vld [vmem:[#allocation8 + $0x180] ss:$16 sps:$4 sm:$0xff]  }
 0x3c3   :  { %8555 = vmatpush1.bf16.msra.mxu1 %v10129_v42  ;;  %8298 = vmatprep.subr.bf16.mxu0 %v10134_v47  ;;  %v9619_v42 = vmul.f32 -1.442695, %v11118_v63  ;;  %v10195_v47 = vld [vmem:[#allocation8 + $0x188] ss:$16 sps:$4 sm:$0xff]   ;;  %10732 = vpow2.f32 %v9617_v11  ;;  %v10233_v11 = vld [vmem:[#allocation8 + $0x24c] ss:$16 sps:$4 sm:$0xff]  }
 0x3c4   :  { %8556 = vmatprep.subr.bf16.mxu1 %v10137_v51  ;;  %v10200_v51 = vld [vmem:[#allocation8 + $0x1a4] ss:$16 sps:$4 sm:$0xff]  }
 0x3c5   :  { %10734 = vpow2.f32 %v9619_v42  ;;  %v10228_v42 = vld [vmem:[#allocation8 + $0x240] ss:$16 sps:$4 sm:$0xff]  }
 0x3c6   :  { %8299 = vmatpush1.bf16.msra.mxu0 %v10132_v54  ;;  %v9618_v54 = vmul.f32 -1.442695, %v11120_v0 }
 0x3c7   :  { %8557 = vmatpush1.bf16.msra.mxu1 %v10135_v55  ;;  %8300 = vmatprep.subr.bf16.mxu0 %v10140_v56  ;;  %v10203_v55 = vld [vmem:[#allocation8 + $0x1ac] ss:$16 sps:$4 sm:$0xff]   ;;  %v9620_v56 = vmul.f32 -1.442695, %v11122_v41 }
 0x3c8   :  { %8558 = vmatprep.subr.bf16.mxu1 %v10143_v25  ;;  %v9629_v25 = vmul.f32 -1.442695, %v11124_v44  ;;  %10736 = vpow2.f32 %v9618_v54  ;;  %v10239_v54 = vld [vmem:[#allocation8 + $0x26c] ss:$16 sps:$4 sm:$0xff]  }
 0x3c9   :  { %10738 = vpow2.f32 %v9620_v56  ;;  %v10242_v56 = vld [vmem:[#allocation8 + $0x284] ss:$16 sps:$4 sm:$0xff]  }
 0x3ca   :  { %8301 = vmatpush1.bf16.msra.mxu0 %v10138_v43  ;;  %v10198_v43 = vld [vmem:[#allocation8 + $0x1a0] ss:$16 sps:$4 sm:$0xff]   ;;  %10740 = vpow2.f32 %v9629_v25  ;;  %v10245_v25 = vld [vmem:[#allocation8 + $0x28c] ss:$16 sps:$4 sm:$0xff]  }
 0x3cb   :  { %8559 = vmatpush1.bf16.msra.mxu1 %v10141_v45  ;;  %8302 = vmatprep.subr.bf16.mxu0 %v10146_v46  ;;  %v9631_v45 = vmul.f32 -1.442695, %v11126_v48  ;;  %v10201_v46 = vld [vmem:[#allocation8 + $0x1a8] ss:$16 sps:$4 sm:$0xff]  }
 0x3cc   :  { %8560 = vmatprep.subr.bf16.mxu1 %v10149_v57  ;;  %v10206_v57 = vld [vmem:[#allocation8 + $0x1c4] ss:$16 sps:$4 sm:$0xff]  }
 0x3cd   :  { %10742 = vpow2.f32 %v9631_v45 }
 0x3ce   :  { %8303 = vmatpush1.bf16.msra.mxu0 %v10144_v9  ;;  %v9630_v9 = vmul.f32 -1.442695, %v11128_v50 }
 0x3cf   :  { %8561 = vmatpush1.bf16.msra.mxu1 %v10147_v58  ;;  %8304 = vmatprep.subr.bf16.mxu0 %v10152_v59  ;;  %v10209_v58 = vld [vmem:[#allocation8 + $0x1cc] ss:$16 sps:$4 sm:$0xff]   ;;  %v9632_v59 = vmul.f32 -1.442695, %v11130_v53 }
 0x3d0   :  { %8562 = vmatprep.subr.bf16.mxu1 %v10155_v60  ;;  %v10204_v60 = vld [vmem:[#allocation8 + $0x1c0] ss:$16 sps:$4 sm:$0xff]   ;;  %10744 = vpow2.f32 %v9630_v9  ;;  %v10243_v9 = vld [vmem:[#allocation8 + $0x288] ss:$16 sps:$4 sm:$0xff]  }
 0x3d1   :  { %10746 = vpow2.f32 %v9632_v59 }
 0x3d2   :  { %8305 = vmatpush1.bf16.msra.mxu0 %v10150_v61  ;;  %v10207_v61 = vld [vmem:[#allocation8 + $0x1c8] ss:$16 sps:$4 sm:$0xff]  }
 0x3d3   :  { %8563 = vmatpush1.bf16.msra.mxu1 %v10153_v5  ;;  %8306 = vmatprep.subr.bf16.mxu0 %v10158_v6  ;;  %v10212_v5 = vld [vmem:[#allocation8 + $0x1e4] ss:$16 sps:$4 sm:$0xff]   ;;  %v10215_v6 = vld [vmem:[#allocation8 + $0x1ec] ss:$16 sps:$4 sm:$0xff]  }
 0x3d4   :  { %8564 = vmatprep.subr.bf16.mxu1 %v10161_v7  ;;  %v10210_v7 = vld [vmem:[#allocation8 + $0x1e0] ss:$16 sps:$4 sm:$0xff]  }
 0x3d6   :  { %8307 = vmatpush1.bf16.msra.mxu0 %v10156_v49  ;;  %v10213_v49 = vld [vmem:[#allocation8 + $0x1e8] ss:$16 sps:$4 sm:$0xff]  }
 0x3d7   :  { %8565 = vmatpush1.bf16.msra.mxu1 %v10159_v13  ;;  %8308 = vmatprep.subr.bf16.mxu0 %v10164_v14  ;;  %v10218_v13 = vld [vmem:[#allocation8 + $0x204] ss:$16 sps:$4 sm:$0xff]   ;;  %v10733_v14 = vpop.eup %10732 }
 0x3d8   :  { %8566 = vmatprep.subr.bf16.mxu1 %v10167_v15  ;;  %v10221_v15 = vld [vmem:[#allocation8 + $0x20c] ss:$16 sps:$4 sm:$0xff]  }
 0x3da   :  { %8309 = vmatpush1.bf16.msra.mxu0 %v10162_v16  ;;  %v10735_v16 = vpop.eup %10734 }
 0x3db   :  { %8567 = vmatpush1.bf16.msra.mxu1 %v10165_v17  ;;  %8310 = vmatprep.subr.bf16.mxu0 %v10170_v18  ;;  %v10737_v17 = vpop.eup %10736  ;;  %v10216_v18 = vld [vmem:[#allocation8 + $0x200] ss:$16 sps:$4 sm:$0xff]  }
 0x3dc   :  { %8568 = vmatprep.subr.bf16.mxu1 %v10173_v19  ;;  %v10739_v19 = vpop.eup %10738 }
 0x3de   :  { %8311 = vmatpush1.bf16.msra.mxu0 %v10168_v23  ;;  %v5862_v23 = vadd.f32 1.0, %v10733_v14  ;;  %v10254_v14 = vld [vmem:[#allocation8 + $0x2c4] ss:$16 sps:$4 sm:$0xff]  }
 0x3df   :  { %8569 = vmatpush1.bf16.msra.mxu1 %v10171_v20  ;;  %8312 = vmatprep.subr.bf16.mxu0 %v10176_v21  ;;  %v10219_v20 = vld [vmem:[#allocation8 + $0x208] ss:$16 sps:$4 sm:$0xff]   ;;  %v10741_v21 = vpop.eup %10740 }
 0x3e0   :  { %8570 = vmatprep.subr.bf16.mxu1 %v10179_v22  ;;  %v5864_v22 = vadd.f32 1.0, %v10735_v16  ;;  %10748 = vrcp.f32 %v5862_v23 }
 0x3e2   :  { %8313 = vmatpush1.bf16.msra.mxu0 %v10174_v3  ;;  %v10224_v3 = vld [vmem:[#allocation8 + $0x224] ss:$16 sps:$4 sm:$0xff]   ;;  %10750 = vrcp.f32 %v5864_v22 }
 0x3e3   :  { %8571 = vmatpush1.bf16.msra.mxu1 %v10177_v26  ;;  %8314 = vmatprep.subr.bf16.mxu0 %v10182_v4  ;;  %v10743_v26 = vpop.eup %10742  ;;  %v5863_v4 = vadd.f32 1.0, %v10737_v17 }
 0x3e4   :  { %8572 = vmatprep.subr.bf16.mxu1 %v10185_v39  ;;  %v10227_v39 = vld [vmem:[#allocation8 + $0x22c] ss:$16 sps:$4 sm:$0xff]  }
 0x3e5   :  { %10752 = vrcp.f32 %v5863_v4 }
 0x3e6   :  { %8315 = vmatpush1.bf16.msra.mxu0 %v10180_v28  ;;  %v10745_v28 = vpop.eup %10744 }
 0x3e7   :  { %8573 = vmatpush1.bf16.msra.mxu1 %v10183_v62  ;;  %8316 = vmatprep.subr.bf16.mxu0 %v10188_v24  ;;  %v5865_v62 = vadd.f32 1.0, %v10739_v19  ;;  %v10222_v24 = vld [vmem:[#allocation8 + $0x220] ss:$16 sps:$4 sm:$0xff]   ;;  %v10257_v19 = vld [vmem:[#allocation8 + $0x2cc] ss:$16 sps:$4 sm:$0xff]  }
 0x3e8   :  { %8574 = vmatprep.subr.bf16.mxu1 %v10191_v29  ;;  %v10747_v29 = vpop.eup %10746 }
 0x3e9   :  { %10754 = vrcp.f32 %v5865_v62 }
 0x3ea   :  { %8317 = vmatpush1.bf16.msra.mxu0 %v10186_v30  ;;  %v5874_v30 = vadd.f32 1.0, %v10741_v21 }
 0x3eb   :  { %8575 = vmatpush1.bf16.msra.mxu1 %v10189_v33  ;;  %8318 = vmatprep.subr.bf16.mxu0 %v10194_v10  ;;  %v10225_v33 = vld [vmem:[#allocation8 + $0x228] ss:$16 sps:$4 sm:$0xff]   ;;  %v10230_v10 = vld [vmem:[#allocation8 + $0x244] ss:$16 sps:$4 sm:$0xff]  }
 0x3ec   :  { %8576 = vmatprep.subr.bf16.mxu1 %v10197_v34  ;;  %v5876_v34 = vadd.f32 1.0, %v10743_v26  ;;  %10756 = vrcp.f32 %v5874_v30  ;;  %v10255_v30 = vld [vmem:[#allocation8 + $0x2c8] ss:$16 sps:$4 sm:$0xff]  }
 0x3ee   :  { %8319 = vmatpush1.bf16.msra.mxu0 %v10192_v38  ;;  %v5875_v38 = vadd.f32 1.0, %v10745_v28  ;;  %10758 = vrcp.f32 %v5876_v34 }
 0x3ef   :  { %8577 = vmatpush1.bf16.msra.mxu1 %v10195_v47  ;;  %8320 = vmatprep.subr.bf16.mxu0 %v10200_v51  ;;  %v10231_v47 = vld [vmem:[#allocation8 + $0x248] ss:$16 sps:$4 sm:$0xff]   ;;  %v10236_v51 = vld [vmem:[#allocation8 + $0x264] ss:$16 sps:$4 sm:$0xff]  }
 0x3f0   :  { %8578 = vmatprep.subr.bf16.mxu1 %v10203_v55  ;;  %10760 = vrcp.f32 %v5875_v38  ;;  %v10237_v55 = vld [vmem:[#allocation8 + $0x268] ss:$16 sps:$4 sm:$0xff]  }
 0x3f2   :  { %8321 = vmatpush1.bf16.msra.mxu0 %v10198_v43  ;;  %v10749_v43 = vpop.eup %10748 }
 0x3f3   :  { %8579 = vmatpush1.bf16.msra.mxu1 %v10201_v46  ;;  %8322 = vmatprep.subr.bf16.mxu0 %v10206_v57  ;;  %v10751_v45 = vpop.eup %10750  ;;  %v10240_v46 = vld [vmem:[#allocation8 + $0x280] ss:$16 sps:$4 sm:$0xff]  }
 0x3f4   :  { %8580 = vmatprep.subr.bf16.mxu1 %v10209_v58  ;;  %v10753_v57 = vpop.eup %10752  ;;  %v10248_v58 = vld [vmem:[#allocation8 + $0x2a4] ss:$16 sps:$4 sm:$0xff]   ;;  %v5936_v16 = vmul.f32 %v10751_v45, %v11118_v63  ;;  %v10270_v45 = vld [vmem:[#allocation8 + $0x320] ss:$16 sps:$4 sm:$0xff]  }
 0x3f5   :  { %v10755_v59 = vpop.eup %10754  ;;  %v5935_v17 = vmul.f32 %v10753_v57, %v11120_v0  ;;  %v10252_v0 = vld [vmem:[#allocation8 + $0x2c0] ss:$16 sps:$4 sm:$0xff]   ;;  %v10278_v57 = vld [vmem:[#allocation8 + $0x344] ss:$16 sps:$4 sm:$0xff]  }
 0x3f6   :  { %8323 = vmatpush1.bf16.msra.mxu0 %v10204_v60  ;;  %v10251_v60 = vld [vmem:[#allocation8 + $0x2ac] ss:$16 sps:$4 sm:$0xff]   ;;  %v5937_v23 = vmul.f32 %v10755_v59, %v11122_v41  ;;  %v10279_v59 = vld [vmem:[#allocation8 + $0x348] ss:$16 sps:$4 sm:$0xff]  }
 0x3f7   :  { %8581 = vmatpush1.bf16.msra.mxu1 %v10207_v61  ;;  %8324 = vmatprep.subr.bf16.mxu0 %v10212_v5  ;;  %v10757_v61 = vpop.eup %10756 }
 0x3f8   :  { %8582 = vmatprep.subr.bf16.mxu1 %v10215_v6  ;;  %v10759_v5 = vpop.eup %10758  ;;  %v10246_v6 = vld [vmem:[#allocation8 + $0x2a0] ss:$16 sps:$4 sm:$0xff]  }
 0x3fa   :  { %8325 = vmatpush1.bf16.msra.mxu0 %v10210_v7  ;;  %v10761_v7 = vpop.eup %10760 }
 0x3fb   :  { %8583 = vmatpush1.bf16.msra.mxu1 %v10213_v49  ;;  %8337 = vmatprep.subr.bf16.mxu0 %v10218_v13  ;;  %v5934_v49 = vmul.f32 %v10749_v43, %v11116_v35  ;;  %v10249_v13 = vld [vmem:[#allocation8 + $0x2a8] ss:$16 sps:$4 sm:$0xff]   ;;  %v5948_v35 = vmul.f32 %v10759_v5, %v11126_v48  ;;  %v5947_v26 = vmul.f32 %v10761_v7, %v11128_v50  ;;  %v10263_v50 = vld [vmem:[#allocation8 + $0x2ec] ss:$16 sps:$4 sm:$0xff]   ;;  %v10282_v5 = vld [vmem:[#allocation8 + $0x360] ss:$16 sps:$4 sm:$0xff]  }
 0x3fc   :  { %8595 = vmatprep.subr.bf16.mxu1 %v10221_v15  ;;  %v10275_v43 = vld [vmem:[#allocation8 + $0x32c] ss:$16 sps:$4 sm:$0xff]   ;;  %v10290_v7 = vld [vmem:[#allocation8 + $0x384] ss:$16 sps:$4 sm:$0xff]  }
 0x3fd   :  { %8327 = vmatmul.mubr.bf16.vlgmr.msra.gmra.mrb[24].mxu0 %v11180_v1 }
 0x3fe   :  { %8585 = vmatmul.mubr.bf16.vlgmr.msra.gmra.mrb[24].mxu1 %v11180_v1  ;;  %8338 = vmatpush1.bf16.msra.mxu0 %v10216_v18  ;;  %v5877_v1 = vadd.f32 1.0, %v10747_v29 }
 0x3ff   :  { %8369 = vmatprep.mubr.bf16.mxu0 %v11186_v12  ;;  %8596 = vmatpush1.bf16.msra.mxu1 %v10219_v20  ;;  %v5946_v20 = vmul.f32 %v10757_v61, %v11124_v44  ;;  %v10287_v61 = vld [vmem:[#allocation8 + $0x36c] ss:$16 sps:$4 sm:$0xff]  }
 0x400   :  { %8627 = vmatprep.mubr.bf16.mxu1 %v11186_v12  ;;  %8339 = vmatprep.subr.bf16.mxu0 %v10224_v3  ;;  %10762 = vrcp.f32 %v5877_v1  ;;  %v10234_v12 = vld [vmem:[#allocation8 + $0x260] ss:$16 sps:$4 sm:$0xff]  }
 0x401   :  { %8597 = vmatprep.subr.bf16.mxu1 %v10227_v39 }
 0x402   :  { %8340 = vmatpush1.bf16.msra.mxu0 %v10222_v24 }
 0x403   :  { %8598 = vmatpush1.bf16.msra.mxu1 %v10225_v33  ;;  %8341 = vmatprep.subr.bf16.mxu0 %v10230_v10  ;;  %v10260_v33 = vld [vmem:[#allocation8 + $0x2e4] ss:$16 sps:$4 sm:$0xff]  }
 0x404   :  { %8599 = vmatprep.subr.bf16.mxu1 %v10233_v11 }
 0x406   :  { %8342 = vmatpush1.bf16.msra.mxu0 %v10228_v42 }
 0x407   :  { %8600 = vmatpush1.bf16.msra.mxu1 %v10231_v47  ;;  %8343 = vmatprep.subr.bf16.mxu0 %v10236_v51  ;;  %v10261_v51 = vld [vmem:[#allocation8 + $0x2e8] ss:$16 sps:$4 sm:$0xff]  }
 0x408   :  { %8601 = vmatprep.subr.bf16.mxu1 %v10239_v54  ;;  %v10266_v54 = vld [vmem:[#allocation8 + $0x304] ss:$16 sps:$4 sm:$0xff]  }
 0x40a   :  { %8344 = vmatpush1.bf16.msra.mxu0 %v10234_v12  ;;  %v10763_v15 = vpop.eup %10762  ;;  %v10269_v12 = vld [vmem:[#allocation8 + $0x30c] ss:$16 sps:$4 sm:$0xff]  }
 0x40b   :  { %8602 = vmatpush1.bf16.msra.mxu1 %v10237_v55  ;;  %8345 = vmatprep.subr.bf16.mxu0 %v10242_v56  ;;  %v5949_v62 = vmul.f32 %v10763_v15, %v11130_v53  ;;  %v10258_v53 = vld [vmem:[#allocation8 + $0x2e0] ss:$16 sps:$4 sm:$0xff]   ;;  %v10267_v56 = vld [vmem:[#allocation8 + $0x308] ss:$16 sps:$4 sm:$0xff]   ;;  %v10296_v15 = vld [vmem:[#allocation8 + $0x3a4] ss:$16 sps:$4 sm:$0xff]  }
 0x40c   :  { %8603 = vmatprep.subr.bf16.mxu1 %v10245_v25  ;;  %v10264_v55 = vld [vmem:[#allocation8 + $0x300] ss:$16 sps:$4 sm:$0xff]   ;;  %v10272_v25 = vld [vmem:[#allocation8 + $0x324] ss:$16 sps:$4 sm:$0xff]  }
 0x40e   :  { %8346 = vmatpush1.bf16.msra.mxu0 %v10240_v46  ;;  %v10273_v46 = vld [vmem:[#allocation8 + $0x328] ss:$16 sps:$4 sm:$0xff]  }
 0x40f   :  { %8604 = vmatpush1.bf16.msra.mxu1 %v10243_v9  ;;  %8347 = vmatprep.subr.bf16.mxu0 %v10248_v58  ;;  %v10281_v9 = vld [vmem:[#allocation8 + $0x34c] ss:$16 sps:$4 sm:$0xff]   ;;  %v10276_v58 = vld [vmem:[#allocation8 + $0x340] ss:$16 sps:$4 sm:$0xff]  }
 0x410   :  { %v5519_v18 = vpop.f32.mrb[16].mxu0  ;;  %8605 = vmatprep.subr.bf16.mxu1 %v10251_v60  ;;  %v10284_v60 = vld [vmem:[#allocation8 + $0x364] ss:$16 sps:$4 sm:$0xff]  }
 0x411   :  { %v5958_v21 = vmul.f32 %v5934_v49, %v5519_v18  ;;  %v5605_v22 = vpop.f32.mrb[16].mxu1  ;;  %v5521_v3 = vpop.f32.mrb[17].mxu0  ;;  %v10293_v49 = vld [vmem:[#allocation8 + $0x38c] ss:$16 sps:$4 sm:$0xff]   ;;  %v10297_v18 = vld [vmem:[#allocation8 + $0x3a8] ss:$16 sps:$4 sm:$0xff]  }
 0x412   :  { %v5960_v4 = vmul.f32 %v5936_v16, %v5605_v22  ;;  %v5959_v39 = vmul.f32 %v5935_v17, %v5521_v3  ;;  %v5607_v28 = vpop.f32.mrb[17].mxu1  ;;  %v5523_v63 = vpop.f32.mrb[18].mxu0  ;;  %8348 = vmatpush1.bf16.msra.mxu0 %v10246_v6  ;;  %v10285_v6 = vld [vmem:[#allocation8 + $0x368] ss:$16 sps:$4 sm:$0xff]   ;;  %v10299_v16 = vld [vmem:[#allocation8 + $0x3ac] ss:$16 sps:$4 sm:$0xff]  }
 0x413   :  { %v5961_v24 = vmul.f32 %v5937_v23, %v5607_v28  ;;  %v5970_v29 = vmul.f32 %v5946_v20, %v5523_v63  ;;  %v5609_v41 = vpop.f32.mrb[18].mxu1  ;;  %8606 = vmatpush1.bf16.msra.mxu1 %v10249_v13  ;;  %v5525_v44 = vpop.f32.mrb[19].mxu0  ;;  %8349 = vmatprep.subr.bf16.mxu0 %v10254_v14  ;;  %v10288_v13 = vld [vmem:[#allocation8 + $0x380] ss:$16 sps:$4 sm:$0xff]   ;;  %v10291_v14 = vld [vmem:[#allocation8 + $0x388] ss:$16 sps:$4 sm:$0xff]  }
 0x414   :  { %v5972_v10 = vmul.f32 %v5948_v35, %v5609_v41  ;;  %v5971_v48 = vmul.f32 %v5947_v26, %v5525_v44  ;;  %v5611_v34 = vpop.f32.mrb[19].mxu1  ;;  %8607 = vmatprep.subr.bf16.mxu1 %v10257_v19  ;;  %v10294_v17 = vld [vmem:[#allocation8 + $0x3a0] ss:$16 sps:$4 sm:$0xff]   ;;  %v10302_v19 = vld [vmem:[#allocation8 + $0x3c4] ss:$16 sps:$4 sm:$0xff]  }
 0x415   :  { %v11212_v11 = vpack.c.bf16 %v5970_v29, %v5958_v21  ;;  %v5973_v38 = vmul.f32 %v5949_v62, %v5611_v34  ;;  %v10305_v23 = vld [vmem:[#allocation8 + $0x3cc] ss:$16 sps:$4 sm:$0xff]   ;;  %v10300_v20 = vld [vmem:[#allocation8 + $0x3c0] ss:$16 sps:$4 sm:$0xff]   ;;  %v10303_v21 = vld [vmem:[#allocation8 + $0x3c8] ss:$16 sps:$4 sm:$0xff]  }
 0x416   :  { %v11214_v1 = vpack.c.bf16 %v5972_v10, %v5960_v4  ;;  %v11216_v42 = vpack.c.bf16 %v5971_v48, %v5959_v39  ;;  %8350 = vmatpush1.bf16.msra.mxu0 %v10252_v0  ;;  %v10308_v22 = vld [vmem:[#allocation8 + $0x3e4] ss:$16 sps:$4 sm:$0xff]   ;;  %v10311_v3 = vld [vmem:[#allocation8 + $0x3ec] ss:$16 sps:$4 sm:$0xff]   ;;  %v10306_v35 = vld [vmem:[#allocation8 + $0x3e0] ss:$16 sps:$4 sm:$0xff]  }
 0x417   :  { %v11218_v47 = vpack.c.bf16 %v5973_v38, %v5961_v24  ;;  %8608 = vmatpush1.bf16.msra.mxu1 %v10255_v30  ;;  %8351 = vmatprep.subr.bf16.mxu0 %v10260_v33  ;;  %v10309_v26 = vld [vmem:[#allocation8 + $0x3e8] ss:$16 sps:$4 sm:$0xff]   ;;  %v10314_v4 = vld [vmem:[#allocation8 + $0x404] ss:$16 sps:$4 sm:$0xff]   ;;  %v10317_v39 = vld [vmem:[#allocation8 + $0x40c] ss:$16 sps:$4 sm:$0xff]  }
 0x418   :  { %8609 = vmatprep.subr.bf16.mxu1 %v10263_v50  ;;  %v10312_v28 = vld [vmem:[#allocation8 + $0x400] ss:$16 sps:$4 sm:$0xff]   ;;  %v10315_v63 = vld [vmem:[#allocation8 + $0x408] ss:$16 sps:$4 sm:$0xff]   ;;  %v10320_v0 = vld [vmem:[#allocation8 + $0x424] ss:$16 sps:$4 sm:$0xff]  }
 0x419   :  { %v10323_v62 = vld [vmem:[#allocation8 + $0x42c] ss:$16 sps:$4 sm:$0xff]   ;;  %v10318_v24 = vld [vmem:[#allocation8 + $0x420] ss:$16 sps:$4 sm:$0xff]   ;;  %v10321_v29 = vld [vmem:[#allocation8 + $0x428] ss:$16 sps:$4 sm:$0xff]  }
 0x41a   :  { %8352 = vmatpush1.bf16.msra.mxu0 %v10258_v53  ;;  %v10326_v41 = vld [vmem:[#allocation8 + $0x444] ss:$16 sps:$4 sm:$0xff]   ;;  %v10329_v44 = vld [vmem:[#allocation8 + $0x44c] ss:$16 sps:$4 sm:$0xff]   ;;  %v10324_v30 = vld [vmem:[#allocation8 + $0x440] ss:$16 sps:$4 sm:$0xff]  }
 0x41b   :  { %8610 = vmatpush1.bf16.msra.mxu1 %v10261_v51  ;;  %8353 = vmatprep.subr.bf16.mxu0 %v10266_v54  ;;  %v10327_v33 = vld [vmem:[#allocation8 + $0x448] ss:$16 sps:$4 sm:$0xff]   ;;  %v10332_v10 = vld [vmem:[#allocation8 + $0x464] ss:$16 sps:$4 sm:$0xff]   ;;  %v10330_v48 = vld [vmem:[#allocation8 + $0x460] ss:$16 sps:$4 sm:$0xff]  }
 0x41c   :  { %8611 = vmatprep.subr.bf16.mxu1 %v10269_v12  ;;  %v10333_v34 = vld [vmem:[#allocation8 + $0x468] ss:$16 sps:$4 sm:$0xff]   ;;  %v10338_v50 = vld [vmem:[#allocation8 + $0x484] ss:$16 sps:$4 sm:$0xff]   ;;  %v10341_v38 = vld [vmem:[#allocation8 + $0x48c] ss:$16 sps:$4 sm:$0xff]  }
 0x41d   :  { %v10339_v53 = vld [vmem:[#allocation8 + $0x488] ss:$16 sps:$4 sm:$0xff]   ;;  %v10344_v51 = vld [vmem:[#allocation8 + $0x4a4] ss:$16 sps:$4 sm:$0xff]   ;;  %v10347_v54 = vld [vmem:[#allocation8 + $0x4ac] ss:$16 sps:$4 sm:$0xff]  }
 0x41e   :  { %8354 = vmatpush1.bf16.msra.mxu0 %v10264_v55  ;;  %v10342_v12 = vld [vmem:[#allocation8 + $0x4a0] ss:$16 sps:$4 sm:$0xff]   ;;  %v10345_v55 = vld [vmem:[#allocation8 + $0x4a8] ss:$16 sps:$4 sm:$0xff]  }
 0x41f   :  { %8612 = vmatpush1.bf16.msra.mxu1 %v10267_v56  ;;  %8355 = vmatprep.subr.bf16.mxu0 %v10272_v25  ;;  %v10350_v56 = vld [vmem:[#allocation8 + $0x4c4] ss:$16 sps:$4 sm:$0xff]   ;;  %v10353_v25 = vld [vmem:[#allocation8 + $0x4cc] ss:$16 sps:$4 sm:$0xff]  }
 0x420   :  { %8613 = vmatprep.subr.bf16.mxu1 %v10275_v43  ;;  %v10348_v43 = vld [vmem:[#allocation8 + $0x4c0] ss:$16 sps:$4 sm:$0xff]  }
 0x422   :  { %8356 = vmatpush1.bf16.msra.mxu0 %v10270_v45  ;;  %v10351_v45 = vld [vmem:[#allocation8 + $0x4c8] ss:$16 sps:$4 sm:$0xff]  }
 0x423   :  { %8614 = vmatpush1.bf16.msra.mxu1 %v10273_v46  ;;  %8357 = vmatprep.subr.bf16.mxu0 %v10278_v57  ;;  %v10356_v46 = vld [vmem:[#allocation8 + $0x4e4] ss:$16 sps:$4 sm:$0xff]   ;;  %v10359_v57 = vld [vmem:[#allocation8 + $0x4ec] ss:$16 sps:$4 sm:$0xff]  }
 0x424   :  { %8615 = vmatprep.subr.bf16.mxu1 %v10281_v9  ;;  %v10354_v9 = vld [vmem:[#allocation8 + $0x4e0] ss:$16 sps:$4 sm:$0xff]  }
 0x426   :  { %8358 = vmatpush1.bf16.msra.mxu0 %v10276_v58  ;;  %v10357_v58 = vld [vmem:[#allocation8 + $0x4e8] ss:$16 sps:$4 sm:$0xff]  }
 0x427   :  { %8616 = vmatpush1.bf16.msra.mxu1 %v10279_v59  ;;  %8359 = vmatprep.subr.bf16.mxu0 %v10284_v60  ;;  %v10362_v59 = vld [vmem:[#allocation8 + $0x504] ss:$16 sps:$4 sm:$0xff]   ;;  %v10365_v60 = vld [vmem:[#allocation8 + $0x50c] ss:$16 sps:$4 sm:$0xff]  }
 0x428   :  { %8617 = vmatprep.subr.bf16.mxu1 %v10287_v61  ;;  %v10360_v61 = vld [vmem:[#allocation8 + $0x500] ss:$16 sps:$4 sm:$0xff]  }
 0x42a   :  { %8360 = vmatpush1.bf16.msra.mxu0 %v10282_v5  ;;  %v10363_v5 = vld [vmem:[#allocation8 + $0x508] ss:$16 sps:$4 sm:$0xff]  }
 0x42b   :  { %8618 = vmatpush1.bf16.msra.mxu1 %v10285_v6  ;;  %8361 = vmatprep.subr.bf16.mxu0 %v10290_v7  ;;  %v10368_v6 = vld [vmem:[#allocation8 + $0x524] ss:$16 sps:$4 sm:$0xff]   ;;  %v10371_v7 = vld [vmem:[#allocation8 + $0x52c] ss:$16 sps:$4 sm:$0xff]  }
 0x42c   :  { %8619 = vmatprep.subr.bf16.mxu1 %v10293_v49  ;;  %v10366_v49 = vld [vmem:[#allocation8 + $0x520] ss:$16 sps:$4 sm:$0xff]  }
 0x42e   :  { %8362 = vmatpush1.bf16.msra.mxu0 %v10288_v13  ;;  %v10369_v13 = vld [vmem:[#allocation8 + $0x528] ss:$16 sps:$4 sm:$0xff]  }
 0x42f   :  { %8620 = vmatpush1.bf16.msra.mxu1 %v10291_v14  ;;  %8363 = vmatprep.subr.bf16.mxu0 %v10296_v15  ;;  %v10374_v14 = vld [vmem:[#allocation8 + $0x544] ss:$16 sps:$4 sm:$0xff]   ;;  %v10377_v15 = vld [vmem:[#allocation8 + $0x54c] ss:$16 sps:$4 sm:$0xff]  }
 0x430   :  { %8621 = vmatprep.subr.bf16.mxu1 %v10299_v16  ;;  %v10372_v16 = vld [vmem:[#allocation8 + $0x540] ss:$16 sps:$4 sm:$0xff]  }
 0x432   :  { %8364 = vmatpush1.bf16.msra.mxu0 %v10294_v17  ;;  %v10375_v17 = vld [vmem:[#allocation8 + $0x548] ss:$16 sps:$4 sm:$0xff]  }
 0x433   :  { %8622 = vmatpush1.bf16.msra.mxu1 %v10297_v18  ;;  %8365 = vmatprep.subr.bf16.mxu0 %v10302_v19  ;;  %v10380_v18 = vld [vmem:[#allocation8 + $0x564] ss:$16 sps:$4 sm:$0xff]   ;;  %v10383_v19 = vld [vmem:[#allocation8 + $0x56c] ss:$16 sps:$4 sm:$0xff]  }
 0x434   :  { %8623 = vmatprep.subr.bf16.mxu1 %v10305_v23  ;;  %v10378_v23 = vld [vmem:[#allocation8 + $0x560] ss:$16 sps:$4 sm:$0xff]  }
 0x436   :  { %8366 = vmatpush1.bf16.msra.mxu0 %v10300_v20  ;;  %v10381_v20 = vld [vmem:[#allocation8 + $0x568] ss:$16 sps:$4 sm:$0xff]  }
 0x437   :  { %8624 = vmatpush1.bf16.msra.mxu1 %v10303_v21  ;;  %8367 = vmatprep.subr.bf16.mxu0 %v10308_v22  ;;  %v10386_v21 = vld [vmem:[#allocation8 + $0x584] ss:$16 sps:$4 sm:$0xff]   ;;  %v10389_v22 = vld [vmem:[#allocation8 + $0x58c] ss:$16 sps:$4 sm:$0xff]  }
 0x438   :  { %8625 = vmatprep.subr.bf16.mxu1 %v10311_v3  ;;  %v9621_v3 = vmul.f32 -1.442695, %v11140_v27 }
 0x43a   :  { %8368 = vmatpush1.bf16.msra.mxu0 %v10306_v35  ;;  %v10384_v35 = vld [vmem:[#allocation8 + $0x580] ss:$16 sps:$4 sm:$0xff]   ;;  %10764 = vpow2.f32 %v9621_v3  ;;  %v10437_v3 = vld [vmem:[#allocation8 + $0x68c] ss:$16 sps:$4 sm:$0xff]  }
 0x43b   :  { %8626 = vmatpush1.bf16.msra.mxu1 %v10309_v26  ;;  %8380 = vmatprep.subr.bf16.mxu0 %v10314_v4  ;;  %v9623_v26 = vmul.f32 -1.442695, %v11142_v31  ;;  %v10387_v4 = vld [vmem:[#allocation8 + $0x588] ss:$16 sps:$4 sm:$0xff]  }
 0x43c   :  { %8638 = vmatprep.subr.bf16.mxu1 %v10317_v39  ;;  %v10392_v39 = vld [vmem:[#allocation8 + $0x5a4] ss:$16 sps:$4 sm:$0xff]  }
 0x43d   :  { %8370 = vmatmul.mubr.bf16.vlgmr.msra.gmra.mrb[24].mxu0 %v11182_v8  ;;  %10766 = vpow2.f32 %v9623_v26 }
 0x43e   :  { %8628 = vmatmul.mubr.bf16.vlgmr.msra.gmra.mrb[24].mxu1 %v11182_v8  ;;  %8381 = vmatpush1.bf16.msra.mxu0 %v10312_v28  ;;  %v10335_v8 = vld [vmem:[#allocation8 + $0x46c] ss:$16 sps:$4 sm:$0xff]   ;;  %v9622_v28 = vmul.f32 -1.442695, %v11144_v32 }
 0x43f   :  { %8412 = vmatprep.mubr.bf16.mxu0 %v11216_v42  ;;  %8639 = vmatpush1.bf16.msra.mxu1 %v10315_v63  ;;  %v10395_v63 = vld [vmem:[#allocation8 + $0x5ac] ss:$16 sps:$4 sm:$0xff]  }
 0x440   :  { %8670 = vmatprep.mubr.bf16.mxu1 %v11216_v42  ;;  %8382 = vmatprep.subr.bf16.mxu0 %v10320_v0  ;;  %v10336_v42 = vld [vmem:[#allocation8 + $0x480] ss:$16 sps:$4 sm:$0xff]   ;;  %v9624_v0 = vmul.f32 -1.442695, %v11146_v36  ;;  %10768 = vpow2.f32 %v9622_v28  ;;  %v10435_v28 = vld [vmem:[#allocation8 + $0x688] ss:$16 sps:$4 sm:$0xff]  }
 0x441   :  { %8640 = vmatprep.subr.bf16.mxu1 %v10323_v62  ;;  %v9633_v62 = vmul.f32 -1.442695, %v11148_v37 }
 0x442   :  { %8383 = vmatpush1.bf16.msra.mxu0 %v10318_v24  ;;  %v10390_v24 = vld [vmem:[#allocation8 + $0x5a0] ss:$16 sps:$4 sm:$0xff]   ;;  %10770 = vpow2.f32 %v9624_v0 }
 0x443   :  { %8641 = vmatpush1.bf16.msra.mxu1 %v10321_v29  ;;  %8384 = vmatprep.subr.bf16.mxu0 %v10326_v41  ;;  %v9635_v29 = vmul.f32 -1.442695, %v11150_v2  ;;  %v10393_v41 = vld [vmem:[#allocation8 + $0x5a8] ss:$16 sps:$4 sm:$0xff]   ;;  %10772 = vpow2.f32 %v9633_v62  ;;  %v10443_v62 = vld [vmem:[#allocation8 + $0x6ac] ss:$16 sps:$4 sm:$0xff]  }
 0x444   :  { %8642 = vmatprep.subr.bf16.mxu1 %v10329_v44  ;;  %v10398_v44 = vld [vmem:[#allocation8 + $0x5c4] ss:$16 sps:$4 sm:$0xff]  }
 0x445   :  { %10774 = vpow2.f32 %v9635_v29 }
 0x446   :  { %8385 = vmatpush1.bf16.msra.mxu0 %v10324_v30  ;;  %v9634_v30 = vmul.f32 -1.442695, %v11152_v40 }
 0x447   :  { %8643 = vmatpush1.bf16.msra.mxu1 %v10327_v33  ;;  %8386 = vmatprep.subr.bf16.mxu0 %v10332_v10  ;;  %v10401_v33 = vld [vmem:[#allocation8 + $0x5cc] ss:$16 sps:$4 sm:$0xff]   ;;  %v9636_v10 = vmul.f32 -1.442695, %v11154_v52 }
 0x448   :  { %8644 = vmatprep.subr.bf16.mxu1 %v10335_v8  ;;  %v10396_v8 = vld [vmem:[#allocation8 + $0x5c0] ss:$16 sps:$4 sm:$0xff]   ;;  %10776 = vpow2.f32 %v9634_v30 }
 0x449   :  { %10778 = vpow2.f32 %v9636_v10  ;;  %v10446_v10 = vld [vmem:[#allocation8 + $0x6c4] ss:$16 sps:$4 sm:$0xff]  }
 0x44a   :  { %8387 = vmatpush1.bf16.msra.mxu0 %v10330_v48  ;;  %v10399_v48 = vld [vmem:[#allocation8 + $0x5c8] ss:$16 sps:$4 sm:$0xff]  }
 0x44b   :  { %8645 = vmatpush1.bf16.msra.mxu1 %v10333_v34  ;;  %8388 = vmatprep.subr.bf16.mxu0 %v10338_v50  ;;  %v10404_v34 = vld [vmem:[#allocation8 + $0x5e4] ss:$16 sps:$4 sm:$0xff]   ;;  %v10407_v50 = vld [vmem:[#allocation8 + $0x5ec] ss:$16 sps:$4 sm:$0xff]  }
 0x44c   :  { %8646 = vmatprep.subr.bf16.mxu1 %v10341_v38  ;;  %v10402_v38 = vld [vmem:[#allocation8 + $0x5e0] ss:$16 sps:$4 sm:$0xff]  }
 0x44e   :  { %8389 = vmatpush1.bf16.msra.mxu0 %v10336_v42  ;;  %v10405_v42 = vld [vmem:[#allocation8 + $0x5e8] ss:$16 sps:$4 sm:$0xff]  }
 0x44f   :  { %8647 = vmatpush1.bf16.msra.mxu1 %v10339_v53  ;;  %8390 = vmatprep.subr.bf16.mxu0 %v10344_v51  ;;  %v10410_v53 = vld [vmem:[#allocation8 + $0x604] ss:$16 sps:$4 sm:$0xff]   ;;  %v10765_v51 = vpop.eup %10764 }
 0x450   :  { %8648 = vmatprep.subr.bf16.mxu1 %v10347_v54  ;;  %v10413_v54 = vld [vmem:[#allocation8 + $0x60c] ss:$16 sps:$4 sm:$0xff]  }
 0x452   :  { %8391 = vmatpush1.bf16.msra.mxu0 %v10342_v12  ;;  %v10767_v12 = vpop.eup %10766 }
 0x453   :  { %8649 = vmatpush1.bf16.msra.mxu1 %v10345_v55  ;;  %8392 = vmatprep.subr.bf16.mxu0 %v10350_v56  ;;  %v10769_v55 = vpop.eup %10768  ;;  %v10408_v56 = vld [vmem:[#allocation8 + $0x600] ss:$16 sps:$4 sm:$0xff]  }
 0x454   :  { %8650 = vmatprep.subr.bf16.mxu1 %v10353_v25  ;;  %v10771_v25 = vpop.eup %10770 }
 0x456   :  { %8393 = vmatpush1.bf16.msra.mxu0 %v10348_v43  ;;  %v5866_v43 = vadd.f32 1.0, %v10765_v51 }
 0x457   :  { %8651 = vmatpush1.bf16.msra.mxu1 %v10351_v45  ;;  %8394 = vmatprep.subr.bf16.mxu0 %v10356_v46  ;;  %v10411_v45 = vld [vmem:[#allocation8 + $0x608] ss:$16 sps:$4 sm:$0xff]   ;;  %v10773_v46 = vpop.eup %10772 }
 0x458   :  { %8652 = vmatprep.subr.bf16.mxu1 %v10359_v57  ;;  %v5868_v57 = vadd.f32 1.0, %v10767_v12  ;;  %10780 = vrcp.f32 %v5866_v43 }
 0x45a   :  { %8395 = vmatpush1.bf16.msra.mxu0 %v10354_v9  ;;  %v10416_v9 = vld [vmem:[#allocation8 + $0x624] ss:$16 sps:$4 sm:$0xff]   ;;  %10782 = vrcp.f32 %v5868_v57 }
 0x45b   :  { %8653 = vmatpush1.bf16.msra.mxu1 %v10357_v58  ;;  %8396 = vmatprep.subr.bf16.mxu0 %v10362_v59  ;;  %v10775_v58 = vpop.eup %10774  ;;  %v5867_v59 = vadd.f32 1.0, %v10769_v55 }
 0x45c   :  { %8654 = vmatprep.subr.bf16.mxu1 %v10365_v60  ;;  %v10419_v60 = vld [vmem:[#allocation8 + $0x62c] ss:$16 sps:$4 sm:$0xff]  }
 0x45d   :  { %10784 = vrcp.f32 %v5867_v59 }
 0x45e   :  { %8397 = vmatpush1.bf16.msra.mxu0 %v10360_v61  ;;  %v10777_v61 = vpop.eup %10776 }
 0x45f   :  { %8655 = vmatpush1.bf16.msra.mxu1 %v10363_v5  ;;  %8398 = vmatprep.subr.bf16.mxu0 %v10368_v6  ;;  %v5869_v5 = vadd.f32 1.0, %v10771_v25  ;;  %v10414_v6 = vld [vmem:[#allocation8 + $0x620] ss:$16 sps:$4 sm:$0xff]  }
 0x460   :  { %8656 = vmatprep.subr.bf16.mxu1 %v10371_v7  ;;  %v10779_v7 = vpop.eup %10778 }
 0x461   :  { %10786 = vrcp.f32 %v5869_v5 }
 0x462   :  { %8399 = vmatpush1.bf16.msra.mxu0 %v10366_v49  ;;  %v5878_v49 = vadd.f32 1.0, %v10773_v46 }
 0x463   :  { %8657 = vmatpush1.bf16.msra.mxu1 %v10369_v13  ;;  %8400 = vmatprep.subr.bf16.mxu0 %v10374_v14  ;;  %v10417_v13 = vld [vmem:[#allocation8 + $0x628] ss:$16 sps:$4 sm:$0xff]   ;;  %v10422_v14 = vld [vmem:[#allocation8 + $0x644] ss:$16 sps:$4 sm:$0xff]  }
 0x464   :  { %8658 = vmatprep.subr.bf16.mxu1 %v10377_v15  ;;  %v5880_v15 = vadd.f32 1.0, %v10775_v58  ;;  %10788 = vrcp.f32 %v5878_v49  ;;  %v10452_v58 = vld [vmem:[#allocation8 + $0x6e4] ss:$16 sps:$4 sm:$0xff]  }
 0x466   :  { %8401 = vmatpush1.bf16.msra.mxu0 %v10372_v16  ;;  %v10425_v16 = vld [vmem:[#allocation8 + $0x64c] ss:$16 sps:$4 sm:$0xff]   ;;  %10790 = vrcp.f32 %v5880_v15 }
 0x467   :  { %8659 = vmatpush1.bf16.msra.mxu1 %v10375_v17  ;;  %8402 = vmatprep.subr.bf16.mxu0 %v10380_v18  ;;  %v5879_v17 = vadd.f32 1.0, %v10777_v61  ;;  %v10420_v18 = vld [vmem:[#allocation8 + $0x640] ss:$16 sps:$4 sm:$0xff]   ;;  %v10461_v15 = vld [vmem:[#allocation8 + $0x70c] ss:$16 sps:$4 sm:$0xff]  }
 0x468   :  { %8660 = vmatprep.subr.bf16.mxu1 %v10383_v19  ;;  %v10423_v19 = vld [vmem:[#allocation8 + $0x648] ss:$16 sps:$4 sm:$0xff]  }
 0x469   :  { %10792 = vrcp.f32 %v5879_v17  ;;  %v10459_v17 = vld [vmem:[#allocation8 + $0x708] ss:$16 sps:$4 sm:$0xff]  }
 0x46a   :  { %8403 = vmatpush1.bf16.msra.mxu0 %v10378_v23  ;;  %v10428_v23 = vld [vmem:[#allocation8 + $0x664] ss:$16 sps:$4 sm:$0xff]  }
 0x46b   :  { %8661 = vmatpush1.bf16.msra.mxu1 %v10381_v20  ;;  %8404 = vmatprep.subr.bf16.mxu0 %v10386_v21  ;;  %v10431_v20 = vld [vmem:[#allocation8 + $0x66c] ss:$16 sps:$4 sm:$0xff]   ;;  %v10429_v21 = vld [vmem:[#allocation8 + $0x668] ss:$16 sps:$4 sm:$0xff]  }
 0x46c   :  { %8662 = vmatprep.subr.bf16.mxu1 %v10389_v22  ;;  %v10434_v22 = vld [vmem:[#allocation8 + $0x684] ss:$16 sps:$4 sm:$0xff]  }
 0x46e   :  { %8405 = vmatpush1.bf16.msra.mxu0 %v10384_v35  ;;  %v10781_v35 = vpop.eup %10780 }
 0x46f   :  { %8663 = vmatpush1.bf16.msra.mxu1 %v10387_v4  ;;  %8406 = vmatprep.subr.bf16.mxu0 %v10392_v39  ;;  %v10783_v26 = vpop.eup %10782  ;;  %v10432_v4 = vld [vmem:[#allocation8 + $0x680] ss:$16 sps:$4 sm:$0xff]   ;;  %v5938_v30 = vmul.f32 %v10781_v35, %v11140_v27  ;;  %v10479_v35 = vld [vmem:[#allocation8 + $0x76c] ss:$16 sps:$4 sm:$0xff]  }
 0x470   :  { %8664 = vmatprep.subr.bf16.mxu1 %v10395_v63  ;;  %v10785_v39 = vpop.eup %10784  ;;  %v10440_v63 = vld [vmem:[#allocation8 + $0x6a4] ss:$16 sps:$4 sm:$0xff]  }
 0x471   :  { %v10787_v0 = vpop.eup %10786 }
 0x472   :  { %8407 = vmatpush1.bf16.msra.mxu0 %v10390_v24  ;;  %v10789_v24 = vpop.eup %10788 }
 0x473   :  { %8665 = vmatpush1.bf16.msra.mxu1 %v10393_v41  ;;  %8408 = vmatprep.subr.bf16.mxu0 %v10398_v44  ;;  %v10791_v29 = vpop.eup %10790  ;;  %v10438_v41 = vld [vmem:[#allocation8 + $0x6a0] ss:$16 sps:$4 sm:$0xff]  }
 0x474   :  { %8666 = vmatprep.subr.bf16.mxu1 %v10401_v33  ;;  %v10793_v44 = vpop.eup %10792  ;;  %v10441_v33 = vld [vmem:[#allocation8 + $0x6a8] ss:$16 sps:$4 sm:$0xff]   ;;  %v5952_v27 = vmul.f32 %v10791_v29, %v11150_v2  ;;  %v10486_v29 = vld [vmem:[#allocation8 + $0x7a0] ss:$16 sps:$4 sm:$0xff]  }
 0x475   :  { %v5951_v55 = vmul.f32 %v10793_v44, %v11152_v40  ;;  %v10455_v40 = vld [vmem:[#allocation8 + $0x6ec] ss:$16 sps:$4 sm:$0xff]   ;;  %v10494_v44 = vld [vmem:[#allocation8 + $0x7c4] ss:$16 sps:$4 sm:$0xff]  }
 0x476   :  { %8409 = vmatpush1.bf16.msra.mxu0 %v10396_v8 }
 0x477   :  { %8667 = vmatpush1.bf16.msra.mxu1 %v10399_v48  ;;  %8410 = vmatprep.subr.bf16.mxu0 %v10404_v34  ;;  %v5940_v48 = vmul.f32 %v10783_v26, %v11142_v31  ;;  %v5939_v34 = vmul.f32 %v10785_v39, %v11144_v32  ;;  %v10444_v32 = vld [vmem:[#allocation8 + $0x6c0] ss:$16 sps:$4 sm:$0xff]   ;;  %v10482_v39 = vld [vmem:[#allocation8 + $0x784] ss:$16 sps:$4 sm:$0xff]  }
 0x478   :  { %8668 = vmatprep.subr.bf16.mxu1 %v10407_v50  ;;  %v10474_v26 = vld [vmem:[#allocation8 + $0x760] ss:$16 sps:$4 sm:$0xff]  }
 0x47a   :  { %8411 = vmatpush1.bf16.msra.mxu0 %v10402_v38  ;;  %v10449_v38 = vld [vmem:[#allocation8 + $0x6cc] ss:$16 sps:$4 sm:$0xff]  }
 0x47b   :  { %8669 = vmatpush1.bf16.msra.mxu1 %v10405_v42  ;;  %8423 = vmatprep.subr.bf16.mxu0 %v10410_v53  ;;  %v5941_v42 = vmul.f32 %v10787_v0, %v11146_v36  ;;  %v5950_v53 = vmul.f32 %v10789_v24, %v11148_v37  ;;  %v10483_v0 = vld [vmem:[#allocation8 + $0x788] ss:$16 sps:$4 sm:$0xff]   ;;  %v10491_v24 = vld [vmem:[#allocation8 + $0x7ac] ss:$16 sps:$4 sm:$0xff]  }
 0x47c   :  { %8681 = vmatprep.subr.bf16.mxu1 %v10413_v54 }
 0x47d   :  { %8413 = vmatmul.mubr.bf16.vlgmr.msra.gmra.mrb[24].mxu0 %v11212_v11 }
 0x47e   :  { %8671 = vmatmul.mubr.bf16.vlgmr.msra.gmra.mrb[24].mxu1 %v11212_v11  ;;  %8424 = vmatpush1.bf16.msra.mxu0 %v10408_v56  ;;  %v5881_v11 = vadd.f32 1.0, %v10779_v7 }
 0x47f   :  { %8455 = vmatprep.mubr.bf16.mxu0 %v11218_v47  ;;  %8682 = vmatpush1.bf16.msra.mxu1 %v10411_v45 }
 0x480   :  { %8713 = vmatprep.mubr.bf16.mxu1 %v11218_v47  ;;  %8425 = vmatprep.subr.bf16.mxu0 %v10416_v9  ;;  %10794 = vrcp.f32 %v5881_v11  ;;  %v10426_v47 = vld [vmem:[#allocation8 + $0x660] ss:$16 sps:$4 sm:$0xff]   ;;  %v10447_v9 = vld [vmem:[#allocation8 + $0x6c8] ss:$16 sps:$4 sm:$0xff]   ;;  %v10464_v11 = vld [vmem:[#allocation8 + $0x724] ss:$16 sps:$4 sm:$0xff]  }
 0x481   :  { %8683 = vmatprep.subr.bf16.mxu1 %v10419_v60 }
 0x482   :  { %8426 = vmatpush1.bf16.msra.mxu0 %v10414_v6 }
 0x483   :  { %8684 = vmatpush1.bf16.msra.mxu1 %v10417_v13  ;;  %8427 = vmatprep.subr.bf16.mxu0 %v10422_v14  ;;  %v10453_v13 = vld [vmem:[#allocation8 + $0x6e8] ss:$16 sps:$4 sm:$0xff]   ;;  %v10458_v14 = vld [vmem:[#allocation8 + $0x704] ss:$16 sps:$4 sm:$0xff]  }
 0x484   :  { %8685 = vmatprep.subr.bf16.mxu1 %v10425_v16  ;;  %v10456_v16 = vld [vmem:[#allocation8 + $0x700] ss:$16 sps:$4 sm:$0xff]  }
 0x486   :  { %8428 = vmatpush1.bf16.msra.mxu0 %v10420_v18  ;;  %v10467_v18 = vld [vmem:[#allocation8 + $0x72c] ss:$16 sps:$4 sm:$0xff]  }
 0x487   :  { %8686 = vmatpush1.bf16.msra.mxu1 %v10423_v19  ;;  %8429 = vmatprep.subr.bf16.mxu0 %v10428_v23  ;;  %v10462_v19 = vld [vmem:[#allocation8 + $0x720] ss:$16 sps:$4 sm:$0xff]   ;;  %v10465_v23 = vld [vmem:[#allocation8 + $0x728] ss:$16 sps:$4 sm:$0xff]  }
 0x488   :  { %8687 = vmatprep.subr.bf16.mxu1 %v10431_v20  ;;  %v10470_v20 = vld [vmem:[#allocation8 + $0x744] ss:$16 sps:$4 sm:$0xff]  }
 0x48a   :  { %8430 = vmatpush1.bf16.msra.mxu0 %v10426_v47  ;;  %v10795_v8 = vpop.eup %10794  ;;  %v10473_v47 = vld [vmem:[#allocation8 + $0x74c] ss:$16 sps:$4 sm:$0xff]  }
 0x48b   :  { %8688 = vmatpush1.bf16.msra.mxu1 %v10429_v21  ;;  %8431 = vmatprep.subr.bf16.mxu0 %v10434_v22  ;;  %v5953_v45 = vmul.f32 %v10795_v8, %v11154_v52  ;;  %v10450_v52 = vld [vmem:[#allocation8 + $0x6e0] ss:$16 sps:$4 sm:$0xff]   ;;  %v10471_v22 = vld [vmem:[#allocation8 + $0x748] ss:$16 sps:$4 sm:$0xff]   ;;  %v10500_v8 = vld [vmem:[#allocation8 + $0x7e4] ss:$16 sps:$4 sm:$0xff]  }
 0x48c   :  { %8689 = vmatprep.subr.bf16.mxu1 %v10437_v3  ;;  %v10468_v21 = vld [vmem:[#allocation8 + $0x740] ss:$16 sps:$4 sm:$0xff]   ;;  %v10476_v3 = vld [vmem:[#allocation8 + $0x764] ss:$16 sps:$4 sm:$0xff]  }
 0x48e   :  { %8432 = vmatpush1.bf16.msra.mxu0 %v10432_v4  ;;  %v10477_v4 = vld [vmem:[#allocation8 + $0x768] ss:$16 sps:$4 sm:$0xff]  }
 0x48f   :  { %8690 = vmatpush1.bf16.msra.mxu1 %v10435_v28  ;;  %8433 = vmatprep.subr.bf16.mxu0 %v10440_v63  ;;  %v10485_v28 = vld [vmem:[#allocation8 + $0x78c] ss:$16 sps:$4 sm:$0xff]   ;;  %v10480_v63 = vld [vmem:[#allocation8 + $0x780] ss:$16 sps:$4 sm:$0xff]  }
 0x490   :  { %v5691_v50 = vpop.f32.mrb[20].mxu0  ;;  %8691 = vmatprep.subr.bf16.mxu1 %v10443_v62  ;;  %v10488_v62 = vld [vmem:[#allocation8 + $0x7a4] ss:$16 sps:$4 sm:$0xff]  }
 0x491   :  { %v5962_v51 = vmul.f32 %v5938_v30, %v5691_v50  ;;  %v5777_v54 = vpop.f32.mrb[20].mxu1  ;;  %v5693_v12 = vpop.f32.mrb[21].mxu0  ;;  %v10497_v30 = vld [vmem:[#allocation8 + $0x7cc] ss:$16 sps:$4 sm:$0xff]   ;;  %v10501_v50 = vld [vmem:[#allocation8 + $0x7e8] ss:$16 sps:$4 sm:$0xff]  }
 0x492   :  { %v5964_v56 = vmul.f32 %v5940_v48, %v5777_v54  ;;  %v5963_v25 = vmul.f32 %v5939_v34, %v5693_v12  ;;  %v5779_v43 = vpop.f32.mrb[21].mxu1  ;;  %v5695_v31 = vpop.f32.mrb[22].mxu0  ;;  %8434 = vmatpush1.bf16.msra.mxu0 %v10438_v41  ;;  %v10489_v41 = vld [vmem:[#allocation8 + $0x7a8] ss:$16 sps:$4 sm:$0xff]   ;;  %v10503_v48 = vld [vmem:[#allocation8 + $0x7ec] ss:$16 sps:$4 sm:$0xff]  }
 0x493   :  { %v5965_v46 = vmul.f32 %v5941_v42, %v5779_v43  ;;  %v5974_v57 = vmul.f32 %v5950_v53, %v5695_v31  ;;  %v5781_v36 = vpop.f32.mrb[22].mxu1  ;;  %8692 = vmatpush1.bf16.msra.mxu1 %v10441_v33  ;;  %v5697_v37 = vpop.f32.mrb[23].mxu0  ;;  %8435 = vmatprep.subr.bf16.mxu0 %v10446_v10  ;;  %v10492_v33 = vld [vmem:[#allocation8 + $0x7c0] ss:$16 sps:$4 sm:$0xff]   ;;  %v10495_v10 = vld [vmem:[#allocation8 + $0x7c8] ss:$16 sps:$4 sm:$0xff]  }
 0x494   :  { %v5976_v59 = vmul.f32 %v5952_v27, %v5781_v36  ;;  %v5975_v2 = vmul.f32 %v5951_v55, %v5697_v37  ;;  %v5783_v60 = vpop.f32.mrb[23].mxu1  ;;  %8693 = vmatprep.subr.bf16.mxu1 %v10449_v38  ;;  %v10498_v34 = vld [vmem:[#allocation8 + $0x7e0] ss:$16 sps:$4 sm:$0xff]   ;;  %v10506_v38 = vld [vmem:[#allocation8 + $0x804] ss:$16 sps:$4 sm:$0xff]  }
 0x495   :  { %v11244_v61 = vpack.c.bf16 %v5974_v57, %v5962_v51  ;;  %v5977_v5 = vmul.f32 %v5953_v45, %v5783_v60  ;;  %v10509_v42 = vld [vmem:[#allocation8 + $0x80c] ss:$16 sps:$4 sm:$0xff]   ;;  %v10504_v53 = vld [vmem:[#allocation8 + $0x800] ss:$16 sps:$4 sm:$0xff]   ;;  %v10507_v51 = vld [vmem:[#allocation8 + $0x808] ss:$16 sps:$4 sm:$0xff]  }
 0x496   :  { %v11246_v6 = vpack.c.bf16 %v5976_v59, %v5964_v56  ;;  %v11248_v7 = vpack.c.bf16 %v5975_v2, %v5963_v25  ;;  %8436 = vmatpush1.bf16.msra.mxu0 %v10444_v32  ;;  %v10512_v54 = vld [vmem:[#allocation8 + $0x824] ss:$16 sps:$4 sm:$0xff]   ;;  %v10515_v12 = vld [vmem:[#allocation8 + $0x82c] ss:$16 sps:$4 sm:$0xff]   ;;  %v10510_v27 = vld [vmem:[#allocation8 + $0x820] ss:$16 sps:$4 sm:$0xff]  }
 0x497   :  { %v11250_v49 = vpack.c.bf16 %v5977_v5, %v5965_v46  ;;  %8694 = vmatpush1.bf16.msra.mxu1 %v10447_v9  ;;  %8437 = vmatprep.subr.bf16.mxu0 %v10452_v58  ;;  %v10513_v55 = vld [vmem:[#allocation8 + $0x828] ss:$16 sps:$4 sm:$0xff]   ;;  %v10518_v56 = vld [vmem:[#allocation8 + $0x844] ss:$16 sps:$4 sm:$0xff]   ;;  %v10521_v25 = vld [vmem:[#allocation8 + $0x84c] ss:$16 sps:$4 sm:$0xff]  }
 0x498   :  { %8695 = vmatprep.subr.bf16.mxu1 %v10455_v40  ;;  %v10516_v43 = vld [vmem:[#allocation8 + $0x840] ss:$16 sps:$4 sm:$0xff]   ;;  %v10519_v31 = vld [vmem:[#allocation8 + $0x848] ss:$16 sps:$4 sm:$0xff]   ;;  %v10524_v32 = vld [vmem:[#allocation8 + $0x864] ss:$16 sps:$4 sm:$0xff]  }
 0x499   :  { %v10522_v45 = vld [vmem:[#allocation8 + $0x860] ss:$16 sps:$4 sm:$0xff]   ;;  %v10525_v46 = vld [vmem:[#allocation8 + $0x868] ss:$16 sps:$4 sm:$0xff]   ;;  %v10530_v57 = vld [vmem:[#allocation8 + $0x884] ss:$16 sps:$4 sm:$0xff]  }
 0x49a   :  { %8438 = vmatpush1.bf16.msra.mxu0 %v10450_v52  ;;  %v10533_v36 = vld [vmem:[#allocation8 + $0x88c] ss:$16 sps:$4 sm:$0xff]   ;;  %v10528_v37 = vld [vmem:[#allocation8 + $0x880] ss:$16 sps:$4 sm:$0xff]   ;;  %v10531_v9 = vld [vmem:[#allocation8 + $0x888] ss:$16 sps:$4 sm:$0xff]  }
 0x49b   :  { %8696 = vmatpush1.bf16.msra.mxu1 %v10453_v13  ;;  %8439 = vmatprep.subr.bf16.mxu0 %v10458_v14  ;;  %v10536_v58 = vld [vmem:[#allocation8 + $0x8a4] ss:$16 sps:$4 sm:$0xff]   ;;  %v10539_v59 = vld [vmem:[#allocation8 + $0x8ac] ss:$16 sps:$4 sm:$0xff]   ;;  %v10534_v2 = vld [vmem:[#allocation8 + $0x8a0] ss:$16 sps:$4 sm:$0xff]  }
 0x49c   :  { %8697 = vmatprep.subr.bf16.mxu1 %v10461_v15  ;;  %v10537_v60 = vld [vmem:[#allocation8 + $0x8a8] ss:$16 sps:$4 sm:$0xff]   ;;  %v10542_v40 = vld [vmem:[#allocation8 + $0x8c4] ss:$16 sps:$4 sm:$0xff]   ;;  %v10545_v5 = vld [vmem:[#allocation8 + $0x8cc] ss:$16 sps:$4 sm:$0xff]  }
 0x49d   :  { %v10543_v52 = vld [vmem:[#allocation8 + $0x8c8] ss:$16 sps:$4 sm:$0xff]   ;;  %v10548_v13 = vld [vmem:[#allocation8 + $0x8e4] ss:$16 sps:$4 sm:$0xff]   ;;  %v10551_v14 = vld [vmem:[#allocation8 + $0x8ec] ss:$16 sps:$4 sm:$0xff]  }
 0x49e   :  { %8440 = vmatpush1.bf16.msra.mxu0 %v10456_v16  ;;  %v10546_v15 = vld [vmem:[#allocation8 + $0x8e0] ss:$16 sps:$4 sm:$0xff]   ;;  %v10549_v16 = vld [vmem:[#allocation8 + $0x8e8] ss:$16 sps:$4 sm:$0xff]  }
 0x49f   :  { %8698 = vmatpush1.bf16.msra.mxu1 %v10459_v17  ;;  %8441 = vmatprep.subr.bf16.mxu0 %v10464_v11  ;;  %v10554_v17 = vld [vmem:[#allocation8 + $0x904] ss:$16 sps:$4 sm:$0xff]   ;;  %v10557_v11 = vld [vmem:[#allocation8 + $0x90c] ss:$16 sps:$4 sm:$0xff]  }
 0x4a0   :  { %8699 = vmatprep.subr.bf16.mxu1 %v10467_v18  ;;  %v10552_v18 = vld [vmem:[#allocation8 + $0x900] ss:$16 sps:$4 sm:$0xff]  }
 0x4a2   :  { %8442 = vmatpush1.bf16.msra.mxu0 %v10462_v19  ;;  %v10555_v19 = vld [vmem:[#allocation8 + $0x908] ss:$16 sps:$4 sm:$0xff]  }
 0x4a3   :  { %8700 = vmatpush1.bf16.msra.mxu1 %v10465_v23  ;;  %8443 = vmatprep.subr.bf16.mxu0 %v10470_v20  ;;  %v10560_v23 = vld [vmem:[#allocation8 + $0x924] ss:$16 sps:$4 sm:$0xff]   ;;  %v10563_v20 = vld [vmem:[#allocation8 + $0x92c] ss:$16 sps:$4 sm:$0xff]  }
 0x4a4   :  { %8701 = vmatprep.subr.bf16.mxu1 %v10473_v47  ;;  %v10558_v47 = vld [vmem:[#allocation8 + $0x920] ss:$16 sps:$4 sm:$0xff]  }
 0x4a6   :  { %8444 = vmatpush1.bf16.msra.mxu0 %v10468_v21  ;;  %v10561_v21 = vld [vmem:[#allocation8 + $0x928] ss:$16 sps:$4 sm:$0xff]  }
 0x4a7   :  { %8702 = vmatpush1.bf16.msra.mxu1 %v10471_v22  ;;  %8445 = vmatprep.subr.bf16.mxu0 %v10476_v3  ;;  %v10566_v22 = vld [vmem:[#allocation8 + $0x944] ss:$16 sps:$4 sm:$0xff]   ;;  %v10569_v3 = vld [vmem:[#allocation8 + $0x94c] ss:$16 sps:$4 sm:$0xff]  }
 0x4a8   :  { %8703 = vmatprep.subr.bf16.mxu1 %v10479_v35  ;;  %v10564_v35 = vld [vmem:[#allocation8 + $0x940] ss:$16 sps:$4 sm:$0xff]  }
 0x4aa   :  { %8446 = vmatpush1.bf16.msra.mxu0 %v10474_v26  ;;  %v10567_v26 = vld [vmem:[#allocation8 + $0x948] ss:$16 sps:$4 sm:$0xff]  }
 0x4ab   :  { %8704 = vmatpush1.bf16.msra.mxu1 %v10477_v4  ;;  %8447 = vmatprep.subr.bf16.mxu0 %v10482_v39  ;;  %v10572_v4 = vld [vmem:[#allocation8 + $0x964] ss:$16 sps:$4 sm:$0xff]   ;;  %v10575_v39 = vld [vmem:[#allocation8 + $0x96c] ss:$16 sps:$4 sm:$0xff]  }
 0x4ac   :  { %8705 = vmatprep.subr.bf16.mxu1 %v10485_v28  ;;  %v10570_v28 = vld [vmem:[#allocation8 + $0x960] ss:$16 sps:$4 sm:$0xff]  }
 0x4ae   :  { %8448 = vmatpush1.bf16.msra.mxu0 %v10480_v63  ;;  %v10573_v63 = vld [vmem:[#allocation8 + $0x968] ss:$16 sps:$4 sm:$0xff]  }
 0x4af   :  { %8706 = vmatpush1.bf16.msra.mxu1 %v10483_v0  ;;  %8449 = vmatprep.subr.bf16.mxu0 %v10488_v62  ;;  %v10578_v0 = vld [vmem:[#allocation8 + $0x984] ss:$16 sps:$4 sm:$0xff]   ;;  %v10581_v62 = vld [vmem:[#allocation8 + $0x98c] ss:$16 sps:$4 sm:$0xff]  }
 0x4b0   :  { %8707 = vmatprep.subr.bf16.mxu1 %v10491_v24  ;;  %v10576_v24 = vld [vmem:[#allocation8 + $0x980] ss:$16 sps:$4 sm:$0xff]  }
 0x4b2   :  { %8450 = vmatpush1.bf16.msra.mxu0 %v10486_v29  ;;  %v10579_v29 = vld [vmem:[#allocation8 + $0x988] ss:$16 sps:$4 sm:$0xff]  }
 0x4b3   :  { %8708 = vmatpush1.bf16.msra.mxu1 %v10489_v41  ;;  %8451 = vmatprep.subr.bf16.mxu0 %v10494_v44  ;;  %v10584_v41 = vld [vmem:[#allocation8 + $0x9a4] ss:$16 sps:$4 sm:$0xff]   ;;  %v10587_v44 = vld [vmem:[#allocation8 + $0x9ac] ss:$16 sps:$4 sm:$0xff]  }
 0x4b4   :  { %8709 = vmatprep.subr.bf16.mxu1 %v10497_v30  ;;  %v10582_v30 = vld [vmem:[#allocation8 + $0x9a0] ss:$16 sps:$4 sm:$0xff]  }
 0x4b6   :  { %8452 = vmatpush1.bf16.msra.mxu0 %v10492_v33  ;;  %v10585_v33 = vld [vmem:[#allocation8 + $0x9a8] ss:$16 sps:$4 sm:$0xff]  }
 0x4b7   :  { %8710 = vmatpush1.bf16.msra.mxu1 %v10495_v10  ;;  %8453 = vmatprep.subr.bf16.mxu0 %v10500_v8  ;;  %v10590_v10 = vld [vmem:[#allocation8 + $0x9c4] ss:$16 sps:$4 sm:$0xff]   ;;  %v10593_v8 = vld [vmem:[#allocation8 + $0x9cc] ss:$16 sps:$4 sm:$0xff]  }
 0x4b8   :  { %8711 = vmatprep.subr.bf16.mxu1 %v10503_v48  ;;  %v10588_v48 = vld [vmem:[#allocation8 + $0x9c0] ss:$16 sps:$4 sm:$0xff]  }
 0x4ba   :  { %8454 = vmatpush1.bf16.msra.mxu0 %v10498_v34  ;;  %v10591_v34 = vld [vmem:[#allocation8 + $0x9c8] ss:$16 sps:$4 sm:$0xff]  }
 0x4bb   :  { %8712 = vmatpush1.bf16.msra.mxu1 %v10501_v50  ;;  %8466 = vmatprep.subr.bf16.mxu0 %v10506_v38  ;;  %v10596_v50 = vld [vmem:[#allocation8 + $0x9e4] ss:$16 sps:$4 sm:$0xff]   ;;  %v10599_v38 = vld [vmem:[#allocation8 + $0x9ec] ss:$16 sps:$4 sm:$0xff]  }
 0x4bc   :  { %8724 = vmatprep.subr.bf16.mxu1 %v10509_v42  ;;  %v10594_v42 = vld [vmem:[#allocation8 + $0x9e0] ss:$16 sps:$4 sm:$0xff]  }
 0x4bd   :  { %8456 = vmatmul.mubr.bf16.vlgmr.msra.gmra.mrb[24].mxu0 %v11214_v1 }
 0x4be   :  { %8714 = vmatmul.mubr.bf16.vlgmr.msra.gmra.mrb[24].mxu1 %v11214_v1  ;;  %8467 = vmatpush1.bf16.msra.mxu0 %v10504_v53  ;;  %v10527_v1 = vld [vmem:[#allocation8 + $0x86c] ss:$16 sps:$4 sm:$0xff]   ;;  %v10597_v53 = vld [vmem:[#allocation8 + $0x9e8] ss:$16 sps:$4 sm:$0xff]  }
 0x4bf   :  { %8498 = vmatprep.mubr.bf16.mxu0 %v11248_v7  ;;  %8725 = vmatpush1.bf16.msra.mxu1 %v10507_v51  ;;  %v10602_v51 = vld [vmem:[#allocation8 + $0xa04] ss:$16 sps:$4 sm:$0xff]  }
 0x4c0   :  { %8756 = vmatprep.mubr.bf16.mxu1 %v11248_v7  ;;  %8468 = vmatprep.subr.bf16.mxu0 %v10512_v54  ;;  %v10540_v7 = vld [vmem:[#allocation8 + $0x8c0] ss:$16 sps:$4 sm:$0xff]   ;;  %v10605_v54 = vld [vmem:[#allocation8 + $0xa0c] ss:$16 sps:$4 sm:$0xff]  }
 0x4c1   :  { %8726 = vmatprep.subr.bf16.mxu1 %v10515_v12  ;;  %v10600_v12 = vld [vmem:[#allocation8 + $0xa00] ss:$16 sps:$4 sm:$0xff]  }
 0x4c2   :  { %8469 = vmatpush1.bf16.msra.mxu0 %v10510_v27  ;;  %v10603_v27 = vld [vmem:[#allocation8 + $0xa08] ss:$16 sps:$4 sm:$0xff]  }
 0x4c3   :  { %8727 = vmatpush1.bf16.msra.mxu1 %v10513_v55  ;;  %8470 = vmatprep.subr.bf16.mxu0 %v10518_v56  ;;  %v10608_v55 = vld [vmem:[#allocation8 + $0xa24] ss:$16 sps:$4 sm:$0xff]   ;;  %v10611_v56 = vld [vmem:[#allocation8 + $0xa2c] ss:$16 sps:$4 sm:$0xff]  }
 0x4c4   :  { %8728 = vmatprep.subr.bf16.mxu1 %v10521_v25  ;;  %v10606_v25 = vld [vmem:[#allocation8 + $0xa20] ss:$16 sps:$4 sm:$0xff]  }
 0x4c6   :  { %8471 = vmatpush1.bf16.msra.mxu0 %v10516_v43  ;;  %v10609_v43 = vld [vmem:[#allocation8 + $0xa28] ss:$16 sps:$4 sm:$0xff]  }
 0x4c7   :  { %8729 = vmatpush1.bf16.msra.mxu1 %v10519_v31  ;;  %8472 = vmatprep.subr.bf16.mxu0 %v10524_v32  ;;  %v10614_v31 = vld [vmem:[#allocation8 + $0xa44] ss:$16 sps:$4 sm:$0xff]   ;;  %v10617_v32 = vld [vmem:[#allocation8 + $0xa4c] ss:$16 sps:$4 sm:$0xff]  }
 0x4c8   :  { %8730 = vmatprep.subr.bf16.mxu1 %v10527_v1  ;;  %v10612_v1 = vld [vmem:[#allocation8 + $0xa40] ss:$16 sps:$4 sm:$0xff]  }
 0x4ca   :  { %8473 = vmatpush1.bf16.msra.mxu0 %v10522_v45  ;;  %v10615_v45 = vld [vmem:[#allocation8 + $0xa48] ss:$16 sps:$4 sm:$0xff]  }
 0x4cb   :  { %8731 = vmatpush1.bf16.msra.mxu1 %v10525_v46  ;;  %8474 = vmatprep.subr.bf16.mxu0 %v10530_v57  ;;  %v10620_v46 = vld [vmem:[#allocation8 + $0xa64] ss:$16 sps:$4 sm:$0xff]   ;;  %v10618_v57 = vld [vmem:[#allocation8 + $0xa60] ss:$16 sps:$4 sm:$0xff]  }
 0x4cc   :  { %8732 = vmatprep.subr.bf16.mxu1 %v10533_v36  ;;  %v10621_v36 = vld [vmem:[#allocation8 + $0xa68] ss:$16 sps:$4 sm:$0xff]  }
 0x4ce   :  { %8475 = vmatpush1.bf16.msra.mxu0 %v10528_v37  ;;  %v10626_v37 = vld [vmem:[#allocation8 + $0xa84] ss:$16 sps:$4 sm:$0xff]  }
 0x4cf   :  { %8733 = vmatpush1.bf16.msra.mxu1 %v10531_v9  ;;  %8476 = vmatprep.subr.bf16.mxu0 %v10536_v58  ;;  %v10629_v9 = vld [vmem:[#allocation8 + $0xa8c] ss:$16 sps:$4 sm:$0xff]   ;;  %v10627_v58 = vld [vmem:[#allocation8 + $0xa88] ss:$16 sps:$4 sm:$0xff]  }
 0x4d0   :  { %8734 = vmatprep.subr.bf16.mxu1 %v10539_v59  ;;  %v10632_v59 = vld [vmem:[#allocation8 + $0xaa4] ss:$16 sps:$4 sm:$0xff]  }
 0x4d2   :  { %8477 = vmatpush1.bf16.msra.mxu0 %v10534_v2  ;;  %v10635_v2 = vld [vmem:[#allocation8 + $0xaac] ss:$16 sps:$4 sm:$0xff]  }
 0x4d3   :  { %8735 = vmatpush1.bf16.msra.mxu1 %v10537_v60  ;;  %8478 = vmatprep.subr.bf16.mxu0 %v10542_v40  ;;  %v10630_v60 = vld [vmem:[#allocation8 + $0xaa0] ss:$16 sps:$4 sm:$0xff]   ;;  %v10633_v40 = vld [vmem:[#allocation8 + $0xaa8] ss:$16 sps:$4 sm:$0xff]  }
 0x4d4   :  { %8736 = vmatprep.subr.bf16.mxu1 %v10545_v5  ;;  %v10638_v5 = vld [vmem:[#allocation8 + $0xac4] ss:$16 sps:$4 sm:$0xff]  }
 0x4d6   :  { %8479 = vmatpush1.bf16.msra.mxu0 %v10540_v7  ;;  %v10641_v7 = vld [vmem:[#allocation8 + $0xacc] ss:$16 sps:$4 sm:$0xff]  }
 0x4d7   :  { %8737 = vmatpush1.bf16.msra.mxu1 %v10543_v52  ;;  %8480 = vmatprep.subr.bf16.mxu0 %v10548_v13  ;;  %v10636_v52 = vld [vmem:[#allocation8 + $0xac0] ss:$16 sps:$4 sm:$0xff]   ;;  %v10639_v13 = vld [vmem:[#allocation8 + $0xac8] ss:$16 sps:$4 sm:$0xff]  }
 0x4d8   :  { %8738 = vmatprep.subr.bf16.mxu1 %v10551_v14  ;;  %v10644_v14 = vld [vmem:[#allocation8 + $0xae4] ss:$16 sps:$4 sm:$0xff]  }
 0x4da   :  { %8481 = vmatpush1.bf16.msra.mxu0 %v10546_v15  ;;  %v10647_v15 = vld [vmem:[#allocation8 + $0xaec] ss:$16 sps:$4 sm:$0xff]  }
 0x4db   :  { %8739 = vmatpush1.bf16.msra.mxu1 %v10549_v16  ;;  %8482 = vmatprep.subr.bf16.mxu0 %v10554_v17  ;;  %v10642_v16 = vld [vmem:[#allocation8 + $0xae0] ss:$16 sps:$4 sm:$0xff]   ;;  %v10645_v17 = vld [vmem:[#allocation8 + $0xae8] ss:$16 sps:$4 sm:$0xff]  }
 0x4dc   :  { %8740 = vmatprep.subr.bf16.mxu1 %v10557_v11  ;;  %v10650_v11 = vld [vmem:[#allocation8 + $0xb04] ss:$16 sps:$4 sm:$0xff]  }
 0x4de   :  { %8483 = vmatpush1.bf16.msra.mxu0 %v10552_v18  ;;  %v10653_v18 = vld [vmem:[#allocation8 + $0xb0c] ss:$16 sps:$4 sm:$0xff]  }
 0x4df   :  { %8741 = vmatpush1.bf16.msra.mxu1 %v10555_v19  ;;  %8484 = vmatprep.subr.bf16.mxu0 %v10560_v23  ;;  %v10648_v19 = vld [vmem:[#allocation8 + $0xb00] ss:$16 sps:$4 sm:$0xff]   ;;  %v10651_v23 = vld [vmem:[#allocation8 + $0xb08] ss:$16 sps:$4 sm:$0xff]  }
 0x4e0   :  { %8742 = vmatprep.subr.bf16.mxu1 %v10563_v20  ;;  %v10656_v20 = vld [vmem:[#allocation8 + $0xb24] ss:$16 sps:$4 sm:$0xff]  }
 0x4e2   :  { %8485 = vmatpush1.bf16.msra.mxu0 %v10558_v47  ;;  %v10659_v47 = vld [vmem:[#allocation8 + $0xb2c] ss:$16 sps:$4 sm:$0xff]  }
 0x4e3   :  { %8743 = vmatpush1.bf16.msra.mxu1 %v10561_v21  ;;  %8486 = vmatprep.subr.bf16.mxu0 %v10566_v22  ;;  %v10654_v21 = vld [vmem:[#allocation8 + $0xb20] ss:$16 sps:$4 sm:$0xff]   ;;  %v10657_v22 = vld [vmem:[#allocation8 + $0xb28] ss:$16 sps:$4 sm:$0xff]  }
 0x4e4   :  { %8744 = vmatprep.subr.bf16.mxu1 %v10569_v3  ;;  %v10662_v3 = vld [vmem:[#allocation8 + $0xb44] ss:$16 sps:$4 sm:$0xff]  }
 0x4e6   :  { %8487 = vmatpush1.bf16.msra.mxu0 %v10564_v35  ;;  %v10665_v35 = vld [vmem:[#allocation8 + $0xb4c] ss:$16 sps:$4 sm:$0xff]  }
 0x4e7   :  { %8745 = vmatpush1.bf16.msra.mxu1 %v10567_v26  ;;  %8488 = vmatprep.subr.bf16.mxu0 %v10572_v4  ;;  %v10660_v26 = vld [vmem:[#allocation8 + $0xb40] ss:$16 sps:$4 sm:$0xff]   ;;  %v10663_v4 = vld [vmem:[#allocation8 + $0xb48] ss:$16 sps:$4 sm:$0xff]  }
 0x4e8   :  { %8746 = vmatprep.subr.bf16.mxu1 %v10575_v39  ;;  %v10668_v39 = vld [vmem:[#allocation8 + $0xb64] ss:$16 sps:$4 sm:$0xff]  }
 0x4ea   :  { %8489 = vmatpush1.bf16.msra.mxu0 %v10570_v28  ;;  %v10671_v28 = vld [vmem:[#allocation8 + $0xb6c] ss:$16 sps:$4 sm:$0xff]  }
 0x4eb   :  { %8747 = vmatpush1.bf16.msra.mxu1 %v10573_v63  ;;  %8490 = vmatprep.subr.bf16.mxu0 %v10578_v0  ;;  %v10666_v63 = vld [vmem:[#allocation8 + $0xb60] ss:$16 sps:$4 sm:$0xff]   ;;  %v10669_v0 = vld [vmem:[#allocation8 + $0xb68] ss:$16 sps:$4 sm:$0xff]  }
 0x4ec   :  { %8748 = vmatprep.subr.bf16.mxu1 %v10581_v62  ;;  %v10674_v62 = vld [vmem:[#allocation8 + $0xb84] ss:$16 sps:$4 sm:$0xff]  }
 0x4ee   :  { %8491 = vmatpush1.bf16.msra.mxu0 %v10576_v24  ;;  %v10677_v24 = vld [vmem:[#allocation8 + $0xb8c] ss:$16 sps:$4 sm:$0xff]  }
 0x4ef   :  { %8749 = vmatpush1.bf16.msra.mxu1 %v10579_v29  ;;  %8492 = vmatprep.subr.bf16.mxu0 %v10584_v41  ;;  %v10672_v29 = vld [vmem:[#allocation8 + $0xb80] ss:$16 sps:$4 sm:$0xff]   ;;  %v10675_v41 = vld [vmem:[#allocation8 + $0xb88] ss:$16 sps:$4 sm:$0xff]  }
 0x4f0   :  { %8750 = vmatprep.subr.bf16.mxu1 %v10587_v44  ;;  %v10680_v44 = vld [vmem:[#allocation8 + $0xba4] ss:$16 sps:$4 sm:$0xff]  }
 0x4f2   :  { %8493 = vmatpush1.bf16.msra.mxu0 %v10582_v30  ;;  %v10683_v30 = vld [vmem:[#allocation8 + $0xbac] ss:$16 sps:$4 sm:$0xff]  }
 0x4f3   :  { %8751 = vmatpush1.bf16.msra.mxu1 %v10585_v33  ;;  %8494 = vmatprep.subr.bf16.mxu0 %v10590_v10  ;;  %v10678_v33 = vld [vmem:[#allocation8 + $0xba0] ss:$16 sps:$4 sm:$0xff]   ;;  %v10681_v10 = vld [vmem:[#allocation8 + $0xba8] ss:$16 sps:$4 sm:$0xff]  }
 0x4f4   :  { %8752 = vmatprep.subr.bf16.mxu1 %v10593_v8  ;;  %v10686_v8 = vld [vmem:[#allocation8 + $0xbc4] ss:$16 sps:$4 sm:$0xff]  }
 0x4f6   :  { %8495 = vmatpush1.bf16.msra.mxu0 %v10588_v48  ;;  %v10689_v48 = vld [vmem:[#allocation8 + $0xbcc] ss:$16 sps:$4 sm:$0xff]  }
 0x4f7   :  { %8753 = vmatpush1.bf16.msra.mxu1 %v10591_v34  ;;  %8496 = vmatprep.subr.bf16.mxu0 %v10596_v50  ;;  %v10684_v34 = vld [vmem:[#allocation8 + $0xbc0] ss:$16 sps:$4 sm:$0xff]   ;;  %v10687_v50 = vld [vmem:[#allocation8 + $0xbc8] ss:$16 sps:$4 sm:$0xff]  }
 0x4f8   :  { %8754 = vmatprep.subr.bf16.mxu1 %v10599_v38  ;;  %v10692_v38 = vld [vmem:[#allocation8 + $0xbe4] ss:$16 sps:$4 sm:$0xff]  }
 0x4fa   :  { %8497 = vmatpush1.bf16.msra.mxu0 %v10594_v42  ;;  %v10695_v42 = vld [vmem:[#allocation8 + $0xbec] ss:$16 sps:$4 sm:$0xff]  }
 0x4fb   :  { %8755 = vmatpush1.bf16.msra.mxu1 %v10597_v53  ;;  %8509 = vmatprep.subr.bf16.mxu0 %v10602_v51  ;;  %v10690_v53 = vld [vmem:[#allocation8 + $0xbe0] ss:$16 sps:$4 sm:$0xff]   ;;  %v10693_v51 = vld [vmem:[#allocation8 + $0xbe8] ss:$16 sps:$4 sm:$0xff]  }
 0x4fc   :  { %8767 = vmatprep.subr.bf16.mxu1 %v10605_v54 }
 0x4fd   :  { %8499 = vmatmul.mubr.bf16.vlgmr.msra.gmra.mrb[24].mxu0 %v11244_v61 }
 0x4fe   :  { %8757 = vmatmul.mubr.bf16.vlgmr.msra.gmra.mrb[24].mxu1 %v11244_v61  ;;  %8510 = vmatpush1.bf16.msra.mxu0 %v10600_v12  ;;  %v10623_v61 = vld [vmem:[#allocation8 + $0xa6c] ss:$16 sps:$4 sm:$0xff]  }
 0x4ff   :  { %8541 = vmatprep.mubr.bf16.mxu0 %v11250_v49  ;;  %8768 = vmatpush1.bf16.msra.mxu1 %v10603_v27  ;;  %v10804_v12 = vld [vmem:[#allocation2] sm:$0xff] }
 0x500   :  { %8799 = vmatprep.mubr.bf16.mxu1 %v11250_v49  ;;  %8511 = vmatprep.subr.bf16.mxu0 %v10608_v55  ;;  %v10624_v49 = vld [vmem:[#allocation8 + $0xa80] ss:$16 sps:$4 sm:$0xff]  }
 0x501   :  { %8769 = vmatprep.subr.bf16.mxu1 %v10611_v56 }
 0x502   :  { %8512 = vmatpush1.bf16.msra.mxu0 %v10606_v25  ;;  %v10805_v25 = vld [vmem:[#allocation2 + $0x10] sm:$0xff] }
 0x503   :  { %8770 = vmatpush1.bf16.msra.mxu1 %v10609_v43  ;;  %8513 = vmatprep.subr.bf16.mxu0 %v10614_v31  ;;  %v10806_v31 = vld [vmem:[#allocation2 + $0x8] sm:$0xff] }
 0x504   :  { %8771 = vmatprep.subr.bf16.mxu1 %v10617_v32 }
 0x506   :  { %8514 = vmatpush1.bf16.msra.mxu0 %v10612_v1 }
 0x507   :  { %8772 = vmatpush1.bf16.msra.mxu1 %v10615_v45  ;;  %8515 = vmatprep.subr.bf16.mxu0 %v10620_v46  ;;  %v10807_v46 = vld [vmem:[#allocation2 + $0x18] sm:$0xff] }
 0x508   :  { %8773 = vmatprep.subr.bf16.mxu1 %v10623_v61 }
 0x50a   :  { %8516 = vmatpush1.bf16.msra.mxu0 %v10618_v57  ;;  %v10808_v57 = vld [vmem:[#allocation2 + $0x20] sm:$0xff] }
 0x50b   :  { %8774 = vmatpush1.bf16.msra.mxu1 %v10621_v36  ;;  %8517 = vmatprep.subr.bf16.mxu0 %v10626_v37 }
 0x50c   :  { %8775 = vmatprep.subr.bf16.mxu1 %v10629_v9  ;;  %v10809_v9 = vld [vmem:[#allocation2 + $0x30] sm:$0xff] }
 0x50e   :  { %8518 = vmatpush1.bf16.msra.mxu0 %v10624_v49 }
 0x50f   :  { %8776 = vmatpush1.bf16.msra.mxu1 %v10627_v58  ;;  %8519 = vmatprep.subr.bf16.mxu0 %v10632_v59  ;;  %v10810_v58 = vld [vmem:[#allocation2 + $0x28] sm:$0xff] }
 0x510   :  { %8777 = vmatprep.subr.bf16.mxu1 %v10635_v2 }
 0x512   :  { %8520 = vmatpush1.bf16.msra.mxu0 %v10630_v60  ;;  %v10811_v60 = vld [vmem:[#allocation2 + $0x38] sm:$0xff] }
 0x513   :  { %8778 = vmatpush1.bf16.msra.mxu1 %v10633_v40  ;;  %8521 = vmatprep.subr.bf16.mxu0 %v10638_v5 }
 0x514   :  { %8779 = vmatprep.subr.bf16.mxu1 %v10641_v7 }
 0x516   :  { %8522 = vmatpush1.bf16.msra.mxu0 %v10636_v52 }
 0x517   :  { %8780 = vmatpush1.bf16.msra.mxu1 %v10639_v13  ;;  %8523 = vmatprep.subr.bf16.mxu0 %v10644_v14 }
 0x518   :  { %8781 = vmatprep.subr.bf16.mxu1 %v10647_v15 }
 0x51a   :  { %8524 = vmatpush1.bf16.msra.mxu0 %v10642_v16 }
 0x51b   :  { %8782 = vmatpush1.bf16.msra.mxu1 %v10645_v17  ;;  %8525 = vmatprep.subr.bf16.mxu0 %v10650_v11 }
 0x51c   :  { %8783 = vmatprep.subr.bf16.mxu1 %v10653_v18 }
 0x51e   :  { %8526 = vmatpush1.bf16.msra.mxu0 %v10648_v19 }
 0x51f   :  { %8784 = vmatpush1.bf16.msra.mxu1 %v10651_v23  ;;  %8527 = vmatprep.subr.bf16.mxu0 %v10656_v20 }
 0x520   :  { %8785 = vmatprep.subr.bf16.mxu1 %v10659_v47 }
 0x522   :  { %8528 = vmatpush1.bf16.msra.mxu0 %v10654_v21 }
 0x523   :  { %8786 = vmatpush1.bf16.msra.mxu1 %v10657_v22  ;;  %8529 = vmatprep.subr.bf16.mxu0 %v10662_v3 }
 0x524   :  { %8787 = vmatprep.subr.bf16.mxu1 %v10665_v35 }
 0x526   :  { %8530 = vmatpush1.bf16.msra.mxu0 %v10660_v26 }
 0x527   :  { %8788 = vmatpush1.bf16.msra.mxu1 %v10663_v4  ;;  %8531 = vmatprep.subr.bf16.mxu0 %v10668_v39 }
 0x528   :  { %8789 = vmatprep.subr.bf16.mxu1 %v10671_v28 }
 0x52a   :  { %8532 = vmatpush1.bf16.msra.mxu0 %v10666_v63 }
 0x52b   :  { %8790 = vmatpush1.bf16.msra.mxu1 %v10669_v0  ;;  %8533 = vmatprep.subr.bf16.mxu0 %v10674_v62 }
 0x52c   :  { %8791 = vmatprep.subr.bf16.mxu1 %v10677_v24 }
 0x52e   :  { %8534 = vmatpush1.bf16.msra.mxu0 %v10672_v29 }
 0x52f   :  { %8792 = vmatpush1.bf16.msra.mxu1 %v10675_v41  ;;  %8535 = vmatprep.subr.bf16.mxu0 %v10680_v44 }
 0x530   :  { %8793 = vmatprep.subr.bf16.mxu1 %v10683_v30 }
 0x532   :  { %8536 = vmatpush1.bf16.msra.mxu0 %v10678_v33 }
 0x533   :  { %8794 = vmatpush1.bf16.msra.mxu1 %v10681_v10  ;;  %8537 = vmatprep.subr.bf16.mxu0 %v10686_v8 }
 0x534   :  { %8795 = vmatprep.subr.bf16.mxu1 %v10689_v48 }
 0x536   :  { %8538 = vmatpush1.bf16.msra.mxu0 %v10684_v34 }
 0x537   :  { %8796 = vmatpush1.bf16.msra.mxu1 %v10687_v50  ;;  %8539 = vmatprep.subr.bf16.mxu0 %v10692_v38 }
 0x538   :  { %8797 = vmatprep.subr.bf16.mxu1 %v10695_v42 }
 0x53a   :  { %8540 = vmatpush1.bf16.msra.mxu0 %v10690_v53 }
 0x53b   :  { %8798 = vmatpush1.bf16.msra.mxu1 %v10693_v51 }
 0x53d   :  { %8542 = vmatmul.mubr.bf16.vlgmr.msra.gmra.mrb[24].mxu0 %v11246_v6 }
 0x53e   :  { %8800 = vmatmul.mubr.bf16.vlgmr.msra.gmra.mrb[24].mxu1 %v11246_v6 }
 0x610   :  { %v8543_v54 = vpop.f32.mrb[24].mxu0 }
 0x611   :  { %v8810_v27 = vadd.f32 %v10804_v12, %v8543_v54  ;;  %v8801_v55 = vpop.f32.mrb[24].mxu1  ;;  %v8545_v56 = vpop.f32.mrb[25].mxu0 }
 0x612   :  { %v8812_v43 = vadd.f32 %v10805_v25, %v8801_v55  ;;  %v8811_v32 = vadd.f32 %v10806_v31, %v8545_v56  ;;  %v8803_v1 = vpop.f32.mrb[25].mxu1  ;;  %v8547_v45 = vpop.f32.mrb[26].mxu0 }
 0x613   :  { %8818 = vst [vmem:[#allocation10] sm:$0xff] %v8810_v27  ;;  %v8813_v61 = vadd.f32 %v10807_v46, %v8803_v1  ;;  %v8814_v36 = vadd.f32 %v10808_v57, %v8547_v45  ;;  %v8805_v37 = vpop.f32.mrb[26].mxu1  ;;  %v8549_v6 = vpop.f32.mrb[27].mxu0 }
 0x614   :  { %8820 = vst [vmem:[#allocation10 + $0x10] sm:$0xff] %v8812_v43  ;;  %8819 = vst [vmem:[#allocation10 + $0x8] sm:$0xff] %v8811_v32  ;;  %v8816_v49 = vadd.f32 %v10809_v9, %v8805_v37  ;;  %v8815_v59 = vadd.f32 %v10810_v58, %v8549_v6  ;;  %v8807_v2 = vpop.f32.mrb[27].mxu1 }
 0x615   :  { %8821 = vst [vmem:[#allocation10 + $0x18] sm:$0xff] %v8813_v61  ;;  %8822 = vst [vmem:[#allocation10 + $0x20] sm:$0xff] %v8814_v36  ;;  %v8817_v40 = vadd.f32 %v10811_v60, %v8807_v2 }
 0x616   :  { %8824 = vst [vmem:[#allocation10 + $0x30] sm:$0xff] %v8816_v49  ;;  %8823 = vst [vmem:[#allocation10 + $0x28] sm:$0xff] %v8815_v59 }
 0x617   :  { %8825 = vst [vmem:[#allocation10 + $0x38] sm:$0xff] %v8817_v40 }
 0x618   :  { %10911 = shalt.err (!%p10908_p8)
}
 0x619   :  { %s10912_s20 = scalar_lea.hbm %s11281_s4, 1024 }
 0x61a   :  { %p10913_p9 = scmp.ne.s32.totalorder %s11281_s4, %s10912_s20  ;;  %p10916_p10 = scmp.lt.u32.totalorder %s10912_s20, %s11281_s4 }
 0x61c   :  { %p10918_p11 = pnand %p10916_p10, %p10913_p9 }
 0x61e   :  { %10921 = shalt.err (!%p10918_p11)
}
 0x61f   :  { %8837 = dma.vmem_to_hbm [thread:$0]  %s8832_s15, 1024, %s11281_s4, [#allocation4], %s10932_s1, %s10932_s1, %s10933_s11  }
 0x620   :  { %10928 = dma.done.wait [#allocation4], 1024  }
 0x621   :  { %10929 = vsyncadd [#allocation4], 4294966272 }
 0x622   :  { %8841 = vsyncpa [#allocation3], 1 }
 0x623   :  { %8842 = vsyncpa [#allocation6], 1 }
 0x624   :  { %8843 = vsyncpa [#allocation9], 1 }
 0x625   :  { %8844 = vsyncpa [#allocation4], 1 }

</bundles_post_ra>
